<compile_context>
chip_gen: v7x
topology: tpu7x:2x2x1
jax: 0.10.0
libtpu: 0.0.40
codegen_flags: <defaults>
</compile_context>

<pallas_src>
import functools

import jax
import jax.numpy as jnp
from jax.experimental import pallas as pl
from jax.experimental.pallas import tpu as pltpu


def _layernorm(v, w, b, eps=1e-5):
    # v: (rows, C) f32, w/b: (1, C). Matches torch.nn.LayerNorm (biased variance).
    mu = jnp.mean(v, axis=-1, keepdims=True)
    var = jnp.mean((v - mu) ** 2, axis=-1, keepdims=True)
    return (v - mu) * jax.lax.rsqrt(var + eps) * w + b


def _pick_vmem_limit():
    """Generation-aware VMEM budget (leave headroom for compiler scratch)."""
    cap = None
    try:
        info = pltpu.get_tpu_info()
        cap = getattr(info, "vmem_capacity_bytes", None)
    except Exception:
        cap = None
    if not cap:
        cap = 128 * 1024 * 1024  # v5e/v6e default
    return int(min(cap - 12 * 1024 * 1024, 100 * 1024 * 1024))


# --------------------------------------------------------------------------
# Kernel A: qkv = LN1(x) @ Wqkv + bqkv  (q columns pre-scaled on host),
#           emitted as three head-major bf16 arrays q/k/v of shape (B, nh, N, hd).
# --------------------------------------------------------------------------
def qkv_kernel(num_heads, x_ref, n1w_ref, n1b_ref, qkvw_ref, qkvb_ref,
               q_ref, k_ref, v_ref):
    x = x_ref[0].astype(jnp.float32)                               # (TS, C)
    C = x.shape[-1]
    hd = C // num_heads
    xn = _layernorm(x, n1w_ref[...], n1b_ref[...])
    qkv = jnp.dot(xn.astype(jnp.bfloat16), qkvw_ref[...],          # bf16 x bf16 -> f32
                  preferred_element_type=jnp.float32) + qkvb_ref[...]
    qkv = qkv.astype(jnp.bfloat16)                                 # (TS, 3C)
    # One-time head-major repack (amortized over all kv steps of Kernel B).
    for h in range(num_heads):
        lo = h * hd
        q_ref[0, h] = qkv[:, lo:lo + hd]
        k_ref[0, h] = qkv[:, C + lo:C + lo + hd]
        v_ref[0, h] = qkv[:, 2 * C + lo:2 * C + lo + hd]


# --------------------------------------------------------------------------
# Kernel B: flash attention (batched over heads) + proj + residual1 + LN2
#           + MLP + residual2.
# grid = (B, n_q_tiles, n_kv_tiles); kv axis is the reduction ("arbitrary").
# --------------------------------------------------------------------------
def attn_mlp_kernel(num_heads,
                    x_ref, q_ref, k_ref, v_ref,
                    projw_ref, projb_ref, n2w_ref, n2b_ref,
                    fc1w_ref, fc1b_ref, fc2w_ref, fc2b_ref,
                    out_ref,
                    m_scr, l_scr, acc_scr):
    ki = pl.program_id(2)
    nk = pl.num_programs(2)

    # ---- init flash state at the first kv tile of this q tile
    @pl.when(ki == 0)
    def _init():
        m_scr[...] = jnp.full(m_scr.shape, -jnp.inf, m_scr.dtype)
        l_scr[...] = jnp.zeros(l_scr.shape, l_scr.dtype)
        acc_scr[...] = jnp.zeros(acc_scr.shape, acc_scr.dtype)

    q = q_ref[0]          # (nh, TM, hd) bf16, 1/sqrt(hd) folded into weights
    k = k_ref[0]          # (nh, TK, hd) bf16
    v = v_ref[0]          # (nh, TK, hd) bf16

    # ---- one batched online-softmax (flash) step over all heads
    s = jnp.einsum("hqd,hkd->hqk", q, k,
                   preferred_element_type=jnp.float32)              # (nh, TM, TK) f32
    m_prev = m_scr[...]                                             # (nh, TM, 1)
    m_new = jnp.maximum(m_prev, jnp.max(s, axis=-1, keepdims=True))
    alpha = jnp.exp(m_prev - m_new)
    p = jnp.exp(s - m_new)                                          # f32 (v5e-safe)
    l_scr[...] = alpha * l_scr[...] + jnp.sum(p, axis=-1, keepdims=True)
    acc_scr[...] = alpha * acc_scr[...] + jnp.einsum(
        "hqk,hkd->hqd", p.astype(jnp.bfloat16), v,
        preferred_element_type=jnp.float32)                         # (nh, TM, hd)
    m_scr[...] = m_new

    # ---- finalize at the last kv tile: proj + residual1, then MLP + residual2
    @pl.when(ki == nk - 1)
    def _finalize():
        inv_l = pl.reciprocal(l_scr[...], approx=True)              # EUP, not VPU divide
        acc = acc_scr[...] * inv_l                                  # (nh, TM, hd) f32
        # reassemble head-major columns once per q tile
        attn = jnp.concatenate([acc[h] for h in range(num_heads)], axis=-1)
        attn = attn.astype(jnp.bfloat16)                            # (TM, C)
        msa = jnp.dot(attn, projw_ref[...],
                      preferred_element_type=jnp.float32) + projb_ref[...]
        x1 = x_ref[0].astype(jnp.float32) + msa                     # residual 1

        x2n = _layernorm(x1, n2w_ref[...], n2b_ref[...])
        h1 = jnp.dot(x2n.astype(jnp.bfloat16), fc1w_ref[...],
                     preferred_element_type=jnp.float32) + fc1b_ref[...]
        h1 = jax.nn.gelu(h1, approximate=False)                     # exact erf (torch GELU)
        mlp = jnp.dot(h1.astype(jnp.bfloat16), fc2w_ref[...],
                      preferred_element_type=jnp.float32) + fc2b_ref[...]
        out_ref[0] = (x1 + mlp).astype(out_ref.dtype)               # residual 2


# --------------------------------------------------------------------------
# Parameters
# --------------------------------------------------------------------------
def init_params(key, dim, num_heads, mlp_ratio=4.0, dtype=jnp.float32):
    hidden = int(dim * mlp_ratio)
    keys = jax.random.split(key, 10)
    std = 0.02
    return {
        "n1w": 1.0 + 0.1 * jax.random.normal(keys[0], (1, dim), dtype),
        "n1b": 0.1 * jax.random.normal(keys[1], (1, dim), dtype),
        "n2w": 1.0 + 0.1 * jax.random.normal(keys[2], (1, dim), dtype),
        "n2b": 0.1 * jax.random.normal(keys[3], (1, dim), dtype),
        # Linear weights stored pre-transposed as (in, out) so the kernel does x @ W
        "qkvw": std * jax.random.normal(keys[4], (dim, 3 * dim), dtype),
        "qkvb": std * jax.random.normal(keys[5], (1, 3 * dim), dtype),
        "projw": std * jax.random.normal(keys[6], (dim, dim), dtype),
        "projb": jnp.zeros((1, dim), dtype),
        "fc1w": std * jax.random.normal(keys[7], (dim, hidden), dtype),
        "fc1b": std * jax.random.normal(keys[8], (1, hidden), dtype),
        "fc2w": std * jax.random.normal(keys[9], (hidden, dim), dtype),
        "fc2b": jnp.zeros((1, dim), dtype),
    }


# --------------------------------------------------------------------------
# Wrapper
# --------------------------------------------------------------------------
def vit_block_forward(x, params, num_heads, *, tile_q=512, tile_kv=512, tile_qkv=512):
    """x: (B, H, W, C) channels-last. Returns (B, H, W, C)."""
    B, H, W, C = x.shape
    N = H * W
    assert C % num_heads == 0
    hd = C // num_heads
    # Lane-dense channel dim: do not silently accept non-128-multiple C
    # (real MEMatte/ViT dims 256/384/768/1024 satisfy this; otherwise pad on host).
    assert C % 128 == 0, "channel dim must be a multiple of 128 (pad on host)"

    tile_q, tile_kv, tile_qkv = (min(t, N) for t in (tile_q, tile_kv, tile_qkv))
    assert N % tile_q == 0 and N % tile_kv == 0 and N % tile_qkv == 0
    assert tile_q % 8 == 0 and tile_kv % 8 == 0 and tile_qkv % 8 == 0

    x_flat = x.reshape(B, N, C)

    # ---- host-side (one-time per model load in production) weight prep:
    #      fold the 1/sqrt(hd) q-scale into the q columns of Wqkv / bqkv,
    #      cast matmul weights to bf16 (MXU-native; halves weight VMEM & DMA).
    scale = float(hd) ** (-0.5)
    scale_vec = jnp.concatenate([jnp.full((C,), scale, jnp.float32),
                                 jnp.ones((2 * C,), jnp.float32)])[None, :]
    qkvw = (params["qkvw"].astype(jnp.float32) * scale_vec).astype(jnp.bfloat16)
    qkvb = params["qkvb"].astype(jnp.float32) * scale_vec
    projw = params["projw"].astype(jnp.bfloat16)
    fc1w = params["fc1w"].astype(jnp.bfloat16)
    fc2w = params["fc2w"].astype(jnp.bfloat16)
    n1w, n1b = params["n1w"], params["n1b"]
    n2w, n2b = params["n2w"], params["n2b"]
    projb, fc1b, fc2b = params["projb"], params["fc1b"], params["fc2b"]

    vmem_limit = _pick_vmem_limit()
    n_t = N // tile_qkv
    n_q = N // tile_q
    n_k = N // tile_kv

    def _resident_spec(shape, use_buffered):
        # Constant-index (resident) weight: single-buffer to avoid wasting VMEM
        # on a second copy that is never refreshed.
        if use_buffered:
            return pl.BlockSpec(shape, lambda *_: (0, 0),
                                pipeline_mode=pl.Buffered(1))
        return pl.BlockSpec(shape, lambda *_: (0, 0))

    def run(use_buffered):
        # ---------------- Kernel A: LN1 + QKV projection (head-major q/k/v) ----------------
        kernel_a = functools.partial(qkv_kernel, num_heads)
        qkv_struct = jax.ShapeDtypeStruct((B, num_heads, N, hd), jnp.bfloat16)
        q, k, v = pl.pallas_call(
            kernel_a,
            out_shape=(qkv_struct, qkv_struct, qkv_struct),
            grid_spec=pltpu.PrefetchScalarGridSpec(
                num_scalar_prefetch=0,
                grid=(B, n_t),
                in_specs=[
                    pl.BlockSpec((1, tile_qkv, C), lambda b, t: (b, t, 0)),
                    _resident_spec(n1w.shape, use_buffered),
                    _resident_spec(n1b.shape, use_buffered),
                    _resident_spec(qkvw.shape, use_buffered),
                    _resident_spec(qkvb.shape, use_buffered),
                ],
                out_specs=[
                    pl.BlockSpec((1, num_heads, tile_qkv, hd), lambda b, t: (b, 0, t, 0)),
                    pl.BlockSpec((1, num_heads, tile_qkv, hd), lambda b, t: (b, 0, t, 0)),
                    pl.BlockSpec((1, num_heads, tile_qkv, hd), lambda b, t: (b, 0, t, 0)),
                ],
            ),
            compiler_params=pltpu.CompilerParams(
                dimension_semantics=("parallel", "parallel"),
                vmem_limit_bytes=vmem_limit),
        )(x_flat, n1w, n1b, qkvw, qkvb)

        # ------- Kernel B: flash attention + proj + residual + MLP + residual -------
        kernel_b = functools.partial(attn_mlp_kernel, num_heads)
        out = pl.pallas_call(
            kernel_b,
            out_shape=jax.ShapeDtypeStruct((B, N, C), x.dtype),
            grid_spec=pltpu.PrefetchScalarGridSpec(
                num_scalar_prefetch=0,
                grid=(B, n_q, n_k),
                in_specs=[
                    # x q-tile (residual), resident across the kv axis
                    pl.BlockSpec((1, tile_q, C), lambda b, qi, ki: (b, qi, 0)),
                    # head-major q / k / v
                    pl.BlockSpec((1, num_heads, tile_q, hd),
                                 lambda b, qi, ki: (b, 0, qi, 0)),
                    pl.BlockSpec((1, num_heads, tile_kv, hd),
                                 lambda b, qi, ki: (b, 0, ki, 0)),
                    pl.BlockSpec((1, num_heads, tile_kv, hd),
                                 lambda b, qi, ki: (b, 0, ki, 0)),
                    # resident weights (single-buffered when supported)
                    _resident_spec(projw.shape, use_buffered),
                    _resident_spec(projb.shape, use_buffered),
                    _resident_spec(n2w.shape, use_buffered),
                    _resident_spec(n2b.shape, use_buffered),
                    _resident_spec(fc1w.shape, use_buffered),
                    _resident_spec(fc1b.shape, use_buffered),
                    _resident_spec(fc2w.shape, use_buffered),
                    _resident_spec(fc2b.shape, use_buffered),
                ],
                out_specs=pl.BlockSpec((1, tile_q, C), lambda b, qi, ki: (b, qi, 0)),
                scratch_shapes=[
                    pltpu.VMEM((num_heads, tile_q, 1), jnp.float32),   # running max
                    pltpu.VMEM((num_heads, tile_q, 1), jnp.float32),   # running sum
                    pltpu.VMEM((num_heads, tile_q, hd), jnp.float32),  # per-head acc
                ],
            ),
            compiler_params=pltpu.CompilerParams(
                dimension_semantics=("parallel", "parallel", "arbitrary"),
                vmem_limit_bytes=vmem_limit),
        )(x_flat, q, k, v,
          projw, projb, n2w, n2b, fc1w, fc1b, fc2w, fc2b)

        return jax.block_until_ready(out.reshape(B, H, W, C))

    if hasattr(pl, "Buffered"):
        try:
            return run(True)
        except Exception:
            # Older/newer JAX that rejects pipeline_mode on BlockSpec:
            # fall back to default (double-buffered) resident weights.
            pass
    return run(False)


# --------------------------------------------------------------------------
# Pure-JAX f32 reference replicating the PyTorch semantics (for verification)
# --------------------------------------------------------------------------
def reference_forward(x, params, num_heads):
    B, H, W, C = x.shape
    N = H * W
    hd = C // num_heads
    scale = float(hd) ** (-0.5)
    xf = x.reshape(B, N, C).astype(jnp.float32)

    def ln(v, w, b, eps=1e-5):
        mu = jnp.mean(v, axis=-1, keepdims=True)
        var = jnp.mean((v - mu) ** 2, axis=-1, keepdims=True)
        return (v - mu) * jax.lax.rsqrt(var + eps) * w + b

    xn = ln(xf, params["n1w"], params["n1b"])
    qkv = xn @ params["qkvw"] + params["qkvb"]                       # (B, N, 3C)
    qkv = qkv.reshape(B, N, 3, num_heads, hd).transpose(2, 0, 3, 1, 4)
    q, k, v = qkv[0], qkv[1], qkv[2]                                 # (B, h, N, hd)
    s = jnp.einsum("bhnd,bhmd->bhnm", q * scale, k)
    s = s - jnp.max(s, axis=-1, keepdims=True)
    p = jnp.exp(s)
    p = p / jnp.sum(p, axis=-1, keepdims=True)
    o = jnp.einsum("bhnm,bhmd->bhnd", p, v)
    o = o.transpose(0, 2, 1, 3).reshape(B, N, C)
    msa = o @ params["projw"] + params["projb"]
    x1 = xf + msa
    x2n = ln(x1, params["n2w"], params["n2b"])
    h1 = jax.nn.gelu(x2n @ params["fc1w"] + params["fc1b"], approximate=False)
    mlp = h1 @ params["fc2w"] + params["fc2b"]
    return (x1 + mlp).reshape(B, H, W, C).astype(x.dtype)


# TODO(synk): policy-gated routing (softmax_with_policy / efficient_block skip path),
# relative position embeddings, DropPath>0, and the optional ResBottleneck/ConvNeXt
# tails are not exercised by the default Block config and are not implemented here.

if __name__ == "__main__":
    # Small but tiling-exercising config: N = 256 tokens -> 2 q-tiles x 2 kv-tiles,
    # C = 128 (lane-dense), 4 heads (head_dim = 32), MLP hidden = 512.
    B, H, W, C = 2, 16, 16, 128
    num_heads = 4

    key = jax.random.PRNGKey(0)
    k_x, k_p = jax.random.split(key)
    x = jax.random.normal(k_x, (B, H, W, C), jnp.float32)
    params = init_params(k_p, C, num_heads, mlp_ratio=4.0)

    out = vit_block_forward(x, params, num_heads,
                            tile_q=128, tile_kv=128, tile_qkv=128)
    out = jax.block_until_ready(out)

    ref = reference_forward(x, params, num_heads)
    assert out.shape == (B, H, W, C)
    # bf16 MXU operands vs f32 reference -> slightly relaxed tolerance
    assert jnp.allclose(out, ref, atol=2e-2, rtol=2e-2), "mismatch vs reference"

    print("KERNEL_OK")
</pallas_src>

<mosaic_0001>
module attributes {stable_mosaic.version = 11 : i64} {
  func.func @qkv_kernel(%arg0: i32, %arg1: i32, %arg2: memref<1x128x128xf32, #tpu.memory_space<vmem>>, %arg3: memref<1x128xf32, #tpu.memory_space<vmem>>, %arg4: memref<1x128xf32, #tpu.memory_space<vmem>>, %arg5: memref<128x384xbf16, #tpu.memory_space<vmem>>, %arg6: memref<1x384xf32, #tpu.memory_space<vmem>>, %arg7: memref<1x4x128x32xbf16, #tpu.memory_space<vmem>>, %arg8: memref<1x4x128x32xbf16, #tpu.memory_space<vmem>>, %arg9: memref<1x4x128x32xbf16, #tpu.memory_space<vmem>>) attributes {dimension_semantics = [#tpu.dimension_semantics<parallel>, #tpu.dimension_semantics<parallel>], iteration_bounds = array<i64: 2, 2>, scalar_prefetch = 0 : i64, scratch_operands = 0 : i64, tpu.core_type = #tpu.core_type<tc>, window_params = [{transform_indices = @transform_0, window_bounds = array<i64: 1, 128, 128>}, {pipeline_mode = #tpu.pipeline_mode<synchronous>, transform_indices = @transform_1, window_bounds = array<i64: 1, 128>}, {pipeline_mode = #tpu.pipeline_mode<synchronous>, transform_indices = @transform_2, window_bounds = array<i64: 1, 128>}, {pipeline_mode = #tpu.pipeline_mode<synchronous>, transform_indices = @transform_3, window_bounds = array<i64: 128, 384>}, {pipeline_mode = #tpu.pipeline_mode<synchronous>, transform_indices = @transform_4, window_bounds = array<i64: 1, 384>}, {transform_indices = @transform_5, window_bounds = array<i64: 1, 4, 128, 32>}, {transform_indices = @transform_6, window_bounds = array<i64: 1, 4, 128, 32>}, {transform_indices = @transform_7, window_bounds = array<i64: 1, 4, 128, 32>}]} {
    %c0 = arith.constant 0 : index
    %c0_0 = arith.constant 0 : index
    %c0_1 = arith.constant 0 : index
    %0 = vector.load %arg2[%c0, %c0_0, %c0_1] : memref<1x128x128xf32, #tpu.memory_space<vmem>>, vector<1x128x128xf32>
    %1 = vector.shape_cast %0 : vector<1x128x128xf32> to vector<128x128xf32>
    %c0_2 = arith.constant 0 : index
    %c0_3 = arith.constant 0 : index
    %2 = vector.load %arg3[%c0_2, %c0_3] : memref<1x128xf32, #tpu.memory_space<vmem>>, vector<1x128xf32>
    %c0_4 = arith.constant 0 : index
    %c0_5 = arith.constant 0 : index
    %3 = vector.load %arg4[%c0_4, %c0_5] : memref<1x128xf32, #tpu.memory_space<vmem>>, vector<1x128xf32>
    %cst = arith.constant dense<0.000000e+00> : vector<128xf32>
    %4 = vector.multi_reduction <add>, %1, %cst [1] : vector<128x128xf32> to vector<128xf32>
    %5 = vector.shape_cast %4 : vector<128xf32> to vector<128x1xf32>
    %cst_6 = arith.constant 1.280000e+02 : f32
    %6 = vector.broadcast %cst_6 : f32 to vector<128x1xf32>
    %7 = arith.divf %5, %6 : vector<128x1xf32>
    %8 = vector.broadcast %7 : vector<128x1xf32> to vector<128x128xf32>
    %9 = arith.subf %1, %8 : vector<128x128xf32>
    %10 = arith.mulf %9, %9 : vector<128x128xf32>
    %cst_7 = arith.constant dense<0.000000e+00> : vector<128xf32>
    %11 = vector.multi_reduction <add>, %10, %cst_7 [1] : vector<128x128xf32> to vector<128xf32>
    %12 = vector.shape_cast %11 : vector<128xf32> to vector<128x1xf32>
    %cst_8 = arith.constant 1.280000e+02 : f32
    %13 = vector.broadcast %cst_8 : f32 to vector<128x1xf32>
    %14 = arith.divf %12, %13 : vector<128x1xf32>
    %15 = vector.broadcast %7 : vector<128x1xf32> to vector<128x128xf32>
    %16 = arith.subf %1, %15 : vector<128x128xf32>
    %cst_9 = arith.constant 9.99999974E-6 : f32
    %17 = vector.broadcast %cst_9 : f32 to vector<128x1xf32>
    %18 = arith.addf %14, %17 : vector<128x1xf32>
    %19 = math.rsqrt %18 : vector<128x1xf32>
    %20 = vector.broadcast %19 : vector<128x1xf32> to vector<128x128xf32>
    %21 = arith.mulf %16, %20 : vector<128x128xf32>
    %22 = vector.broadcast %2 : vector<1x128xf32> to vector<128x128xf32>
    %23 = arith.mulf %21, %22 : vector<128x128xf32>
    %24 = vector.broadcast %3 : vector<1x128xf32> to vector<128x128xf32>
    %25 = arith.addf %23, %24 : vector<128x128xf32>
    %26 = arith.truncf %25 : vector<128x128xf32> to vector<128x128xbf16>
    %c0_10 = arith.constant 0 : index
    %c0_11 = arith.constant 0 : index
    %27 = vector.load %arg5[%c0_10, %c0_11] : memref<128x384xbf16, #tpu.memory_space<vmem>>, vector<128x384xbf16>
    %cst_12 = arith.constant dense<0.000000e+00> : vector<128x384xf32>
    %28 = tpu.matmul %26, %27, %cst_12 {dimension_numbers = #tpu.dot_dimension_numbers<[1], [0], [0], [1], [0, 0, 1, 1], [], []>} : vector<128x128xbf16>, vector<128x384xbf16>, vector<128x384xf32> -> vector<128x384xf32>
    %c0_13 = arith.constant 0 : index
    %c0_14 = arith.constant 0 : index
    %29 = vector.load %arg6[%c0_13, %c0_14] : memref<1x384xf32, #tpu.memory_space<vmem>>, vector<1x384xf32>
    %30 = vector.broadcast %29 : vector<1x384xf32> to vector<128x384xf32>
    %31 = arith.addf %28, %30 : vector<128x384xf32>
    %32 = arith.truncf %31 : vector<128x384xf32> to vector<128x384xbf16>
    %33 = vector.extract_strided_slice %32 {offsets = [0, 0], sizes = [128, 32], strides = [1, 1]} : vector<128x384xbf16> to vector<128x32xbf16>
    %c0_15 = arith.constant 0 : index
    %c0_16 = arith.constant 0 : index
    %c0_17 = arith.constant 0 : index
    %c0_18 = arith.constant 0 : index
    %34 = vector.load %arg7[%c0_15, %c0_16, %c0_17, %c0_18] : memref<1x4x128x32xbf16, #tpu.memory_space<vmem>>, vector<1x1x128x32xbf16>
    %35 = vector.shape_cast %34 : vector<1x1x128x32xbf16> to vector<128x32xbf16>
    %36 = vector.shape_cast %33 : vector<128x32xbf16> to vector<1x1x128x32xbf16>
    tpu.vector_store %arg7[%c0_15, %c0_16, %c0_17, %c0_18], %36 {strides = array<i32>} : memref<1x4x128x32xbf16, #tpu.memory_space<vmem>>, vector<1x1x128x32xbf16>,
    %37 = vector.extract_strided_slice %32 {offsets = [0, 128], sizes = [128, 32], strides = [1, 1]} : vector<128x384xbf16> to vector<128x32xbf16>
    %c0_19 = arith.constant 0 : index
    %c0_20 = arith.constant 0 : index
    %c0_21 = arith.constant 0 : index
    %c0_22 = arith.constant 0 : index
    %38 = vector.load %arg8[%c0_19, %c0_20, %c0_21, %c0_22] : memref<1x4x128x32xbf16, #tpu.memory_space<vmem>>, vector<1x1x128x32xbf16>
    %39 = vector.shape_cast %38 : vector<1x1x128x32xbf16> to vector<128x32xbf16>
    %40 = vector.shape_cast %37 : vector<128x32xbf16> to vector<1x1x128x32xbf16>
    tpu.vector_store %arg8[%c0_19, %c0_20, %c0_21, %c0_22], %40 {strides = array<i32>} : memref<1x4x128x32xbf16, #tpu.memory_space<vmem>>, vector<1x1x128x32xbf16>,
    %41 = vector.extract_strided_slice %32 {offsets = [0, 256], sizes = [128, 32], strides = [1, 1]} : vector<128x384xbf16> to vector<128x32xbf16>
    %c0_23 = arith.constant 0 : index
    %c0_24 = arith.constant 0 : index
    %c0_25 = arith.constant 0 : index
    %c0_26 = arith.constant 0 : index
    %42 = vector.load %arg9[%c0_23, %c0_24, %c0_25, %c0_26] : memref<1x4x128x32xbf16, #tpu.memory_space<vmem>>, vector<1x1x128x32xbf16>
    %43 = vector.shape_cast %42 : vector<1x1x128x32xbf16> to vector<128x32xbf16>
    %44 = vector.shape_cast %41 : vector<128x32xbf16> to vector<1x1x128x32xbf16>
    tpu.vector_store %arg9[%c0_23, %c0_24, %c0_25, %c0_26], %44 {strides = array<i32>} : memref<1x4x128x32xbf16, #tpu.memory_space<vmem>>, vector<1x1x128x32xbf16>,
    %45 = vector.extract_strided_slice %32 {offsets = [0, 32], sizes = [128, 32], strides = [1, 1]} : vector<128x384xbf16> to vector<128x32xbf16>
    %c0_27 = arith.constant 0 : index
    %c1 = arith.constant 1 : index
    %c0_28 = arith.constant 0 : index
    %c0_29 = arith.constant 0 : index
    %46 = vector.load %arg7[%c0_27, %c1, %c0_28, %c0_29] : memref<1x4x128x32xbf16, #tpu.memory_space<vmem>>, vector<1x1x128x32xbf16>
    %47 = vector.shape_cast %46 : vector<1x1x128x32xbf16> to vector<128x32xbf16>
    %48 = vector.shape_cast %45 : vector<128x32xbf16> to vector<1x1x128x32xbf16>
    tpu.vector_store %arg7[%c0_27, %c1, %c0_28, %c0_29], %48 {strides = array<i32>} : memref<1x4x128x32xbf16, #tpu.memory_space<vmem>>, vector<1x1x128x32xbf16>,
    %49 = vector.extract_strided_slice %32 {offsets = [0, 160], sizes = [128, 32], strides = [1, 1]} : vector<128x384xbf16> to vector<128x32xbf16>
    %c0_30 = arith.constant 0 : index
    %c1_31 = arith.constant 1 : index
    %c0_32 = arith.constant 0 : index
    %c0_33 = arith.constant 0 : index
    %50 = vector.load %arg8[%c0_30, %c1_31, %c0_32, %c0_33] : memref<1x4x128x32xbf16, #tpu.memory_space<vmem>>, vector<1x1x128x32xbf16>
    %51 = vector.shape_cast %50 : vector<1x1x128x32xbf16> to vector<128x32xbf16>
    %52 = vector.shape_cast %49 : vector<128x32xbf16> to vector<1x1x128x32xbf16>
    tpu.vector_store %arg8[%c0_30, %c1_31, %c0_32, %c0_33], %52 {strides = array<i32>} : memref<1x4x128x32xbf16, #tpu.memory_space<vmem>>, vector<1x1x128x32xbf16>,
    %53 = vector.extract_strided_slice %32 {offsets = [0, 288], sizes = [128, 32], strides = [1, 1]} : vector<128x384xbf16> to vector<128x32xbf16>
    %c0_34 = arith.constant 0 : index
    %c1_35 = arith.constant 1 : index
    %c0_36 = arith.constant 0 : index
    %c0_37 = arith.constant 0 : index
    %54 = vector.load %arg9[%c0_34, %c1_35, %c0_36, %c0_37] : memref<1x4x128x32xbf16, #tpu.memory_space<vmem>>, vector<1x1x128x32xbf16>
    %55 = vector.shape_cast %54 : vector<1x1x128x32xbf16> to vector<128x32xbf16>
    %56 = vector.shape_cast %53 : vector<128x32xbf16> to vector<1x1x128x32xbf16>
    tpu.vector_store %arg9[%c0_34, %c1_35, %c0_36, %c0_37], %56 {strides = array<i32>} : memref<1x4x128x32xbf16, #tpu.memory_space<vmem>>, vector<1x1x128x32xbf16>,
    %57 = vector.extract_strided_slice %32 {offsets = [0, 64], sizes = [128, 32], strides = [1, 1]} : vector<128x384xbf16> to vector<128x32xbf16>
    %c0_38 = arith.constant 0 : index
    %c2 = arith.constant 2 : index
    %c0_39 = arith.constant 0 : index
    %c0_40 = arith.constant 0 : index
    %58 = vector.load %arg7[%c0_38, %c2, %c0_39, %c0_40] : memref<1x4x128x32xbf16, #tpu.memory_space<vmem>>, vector<1x1x128x32xbf16>
    %59 = vector.shape_cast %58 : vector<1x1x128x32xbf16> to vector<128x32xbf16>
    %60 = vector.shape_cast %57 : vector<128x32xbf16> to vector<1x1x128x32xbf16>
    tpu.vector_store %arg7[%c0_38, %c2, %c0_39, %c0_40], %60 {strides = array<i32>} : memref<1x4x128x32xbf16, #tpu.memory_space<vmem>>, vector<1x1x128x32xbf16>,
    %61 = vector.extract_strided_slice %32 {offsets = [0, 192], sizes = [128, 32], strides = [1, 1]} : vector<128x384xbf16> to vector<128x32xbf16>
    %c0_41 = arith.constant 0 : index
    %c2_42 = arith.constant 2 : index
    %c0_43 = arith.constant 0 : index
    %c0_44 = arith.constant 0 : index
    %62 = vector.load %arg8[%c0_41, %c2_42, %c0_43, %c0_44] : memref<1x4x128x32xbf16, #tpu.memory_space<vmem>>, vector<1x1x128x32xbf16>
    %63 = vector.shape_cast %62 : vector<1x1x128x32xbf16> to vector<128x32xbf16>
    %64 = vector.shape_cast %61 : vector<128x32xbf16> to vector<1x1x128x32xbf16>
    tpu.vector_store %arg8[%c0_41, %c2_42, %c0_43, %c0_44], %64 {strides = array<i32>} : memref<1x4x128x32xbf16, #tpu.memory_space<vmem>>, vector<1x1x128x32xbf16>,
    %65 = vector.extract_strided_slice %32 {offsets = [0, 320], sizes = [128, 32], strides = [1, 1]} : vector<128x384xbf16> to vector<128x32xbf16>
    %c0_45 = arith.constant 0 : index
    %c2_46 = arith.constant 2 : index
    %c0_47 = arith.constant 0 : index
    %c0_48 = arith.constant 0 : index
    %66 = vector.load %arg9[%c0_45, %c2_46, %c0_47, %c0_48] : memref<1x4x128x32xbf16, #tpu.memory_space<vmem>>, vector<1x1x128x32xbf16>
    %67 = vector.shape_cast %66 : vector<1x1x128x32xbf16> to vector<128x32xbf16>
    %68 = vector.shape_cast %65 : vector<128x32xbf16> to vector<1x1x128x32xbf16>
    tpu.vector_store %arg9[%c0_45, %c2_46, %c0_47, %c0_48], %68 {strides = array<i32>} : memref<1x4x128x32xbf16, #tpu.memory_space<vmem>>, vector<1x1x128x32xbf16>,
    %69 = vector.extract_strided_slice %32 {offsets = [0, 96], sizes = [128, 32], strides = [1, 1]} : vector<128x384xbf16> to vector<128x32xbf16>
    %c0_49 = arith.constant 0 : index
    %c3 = arith.constant 3 : index
    %c0_50 = arith.constant 0 : index
    %c0_51 = arith.constant 0 : index
    %70 = vector.load %arg7[%c0_49, %c3, %c0_50, %c0_51] : memref<1x4x128x32xbf16, #tpu.memory_space<vmem>>, vector<1x1x128x32xbf16>
    %71 = vector.shape_cast %70 : vector<1x1x128x32xbf16> to vector<128x32xbf16>
    %72 = vector.shape_cast %69 : vector<128x32xbf16> to vector<1x1x128x32xbf16>
    tpu.vector_store %arg7[%c0_49, %c3, %c0_50, %c0_51], %72 {strides = array<i32>} : memref<1x4x128x32xbf16, #tpu.memory_space<vmem>>, vector<1x1x128x32xbf16>,
    %73 = vector.extract_strided_slice %32 {offsets = [0, 224], sizes = [128, 32], strides = [1, 1]} : vector<128x384xbf16> to vector<128x32xbf16>
    %c0_52 = arith.constant 0 : index
    %c3_53 = arith.constant 3 : index
    %c0_54 = arith.constant 0 : index
    %c0_55 = arith.constant 0 : index
    %74 = vector.load %arg8[%c0_52, %c3_53, %c0_54, %c0_55] : memref<1x4x128x32xbf16, #tpu.memory_space<vmem>>, vector<1x1x128x32xbf16>
    %75 = vector.shape_cast %74 : vector<1x1x128x32xbf16> to vector<128x32xbf16>
    %76 = vector.shape_cast %73 : vector<128x32xbf16> to vector<1x1x128x32xbf16>
    tpu.vector_store %arg8[%c0_52, %c3_53, %c0_54, %c0_55], %76 {strides = array<i32>} : memref<1x4x128x32xbf16, #tpu.memory_space<vmem>>, vector<1x1x128x32xbf16>,
    %77 = vector.extract_strided_slice %32 {offsets = [0, 352], sizes = [128, 32], strides = [1, 1]} : vector<128x384xbf16> to vector<128x32xbf16>
    %c0_56 = arith.constant 0 : index
    %c3_57 = arith.constant 3 : index
    %c0_58 = arith.constant 0 : index
    %c0_59 = arith.constant 0 : index
    %78 = vector.load %arg9[%c0_56, %c3_57, %c0_58, %c0_59] : memref<1x4x128x32xbf16, #tpu.memory_space<vmem>>, vector<1x1x128x32xbf16>
    %79 = vector.shape_cast %78 : vector<1x1x128x32xbf16> to vector<128x32xbf16>
    %80 = vector.shape_cast %77 : vector<128x32xbf16> to vector<1x1x128x32xbf16>
    tpu.vector_store %arg9[%c0_56, %c3_57, %c0_58, %c0_59], %80 {strides = array<i32>} : memref<1x4x128x32xbf16, #tpu.memory_space<vmem>>, vector<1x1x128x32xbf16>,
    return
  }
  func.func @transform_0(%arg0: i32, %arg1: i32) -> (i32, i32, i32) {
    %c0_i32 = arith.constant 0 : i32
    %c0_i32_0 = arith.constant 0 : i32
    return %arg0, %arg1, %c0_i32 : i32, i32, i32
  }
  func.func @transform_1(%arg0: i32, %arg1: i32) -> (i32, i32) {
    %c0_i32 = arith.constant 0 : i32
    %c0_i32_0 = arith.constant 0 : i32
    %c0_i32_1 = arith.constant 0 : i32
    return %c0_i32, %c0_i32_0 : i32, i32
  }
  func.func @transform_2(%arg0: i32, %arg1: i32) -> (i32, i32) {
    %c0_i32 = arith.constant 0 : i32
    %c0_i32_0 = arith.constant 0 : i32
    %c0_i32_1 = arith.constant 0 : i32
    return %c0_i32, %c0_i32_0 : i32, i32
  }
  func.func @transform_3(%arg0: i32, %arg1: i32) -> (i32, i32) {
    %c0_i32 = arith.constant 0 : i32
    %c0_i32_0 = arith.constant 0 : i32
    %c0_i32_1 = arith.constant 0 : i32
    return %c0_i32, %c0_i32_0 : i32, i32
  }
  func.func @transform_4(%arg0: i32, %arg1: i32) -> (i32, i32) {
    %c0_i32 = arith.constant 0 : i32
    %c0_i32_0 = arith.constant 0 : i32
    %c0_i32_1 = arith.constant 0 : i32
    return %c0_i32, %c0_i32_0 : i32, i32
  }
  func.func @transform_5(%arg0: i32, %arg1: i32) -> (i32, i32, i32, i32) {
    %c0_i32 = arith.constant 0 : i32
    %c0_i32_0 = arith.constant 0 : i32
    %c0_i32_1 = arith.constant 0 : i32
    return %arg0, %c0_i32, %arg1, %c0_i32_0 : i32, i32, i32, i32
  }
  func.func @transform_6(%arg0: i32, %arg1: i32) -> (i32, i32, i32, i32) {
    %c0_i32 = arith.constant 0 : i32
    %c0_i32_0 = arith.constant 0 : i32
    %c0_i32_1 = arith.constant 0 : i32
    return %arg0, %c0_i32, %arg1, %c0_i32_0 : i32, i32, i32, i32
  }
  func.func @transform_7(%arg0: i32, %arg1: i32) -> (i32, i32, i32, i32) {
    %c0_i32 = arith.constant 0 : i32
    %c0_i32_0 = arith.constant 0 : i32
    %c0_i32_1 = arith.constant 0 : i32
    return %arg0, %c0_i32, %arg1, %c0_i32_0 : i32, i32, i32, i32
  }
}

module attributes {stable_mosaic.version = 11 : i64} {
  func.func @qkv_kernel(%arg0: i32, %arg1: i32, %arg2: memref<1x128x128xf32, #tpu.memory_space<vmem>>, %arg3: memref<1x128xf32, #tpu.memory_space<vmem>>, %arg4: memref<1x128xf32, #tpu.memory_space<vmem>>, %arg5: memref<128x384xbf16, #tpu.memory_space<vmem>>, %arg6: memref<1x384xf32, #tpu.memory_space<vmem>>, %arg7: memref<1x4x128x32xbf16, #tpu.memory_space<vmem>>, %arg8: memref<1x4x128x32xbf16, #tpu.memory_space<vmem>>, %arg9: memref<1x4x128x32xbf16, #tpu.memory_space<vmem>>) attributes {dimension_semantics = [#tpu.dimension_semantics<parallel>, #tpu.dimension_semantics<parallel>], iteration_bounds = array<i64: 2, 2>, scalar_prefetch = 0 : i64, scratch_operands = 0 : i64, tpu.core_type = #tpu.core_type<tc>, window_params = [{transform_indices = @transform_0, window_bounds = array<i64: 1, 128, 128>}, {pipeline_mode = #tpu.pipeline_mode<synchronous>, transform_indices = @transform_1, window_bounds = array<i64: 1, 128>}, {pipeline_mode = #tpu.pipeline_mode<synchronous>, transform_indices = @transform_2, window_bounds = array<i64: 1, 128>}, {pipeline_mode = #tpu.pipeline_mode<synchronous>, transform_indices = @transform_3, window_bounds = array<i64: 128, 384>}, {pipeline_mode = #tpu.pipeline_mode<synchronous>, transform_indices = @transform_4, window_bounds = array<i64: 1, 384>}, {transform_indices = @transform_5, window_bounds = array<i64: 1, 4, 128, 32>}, {transform_indices = @transform_6, window_bounds = array<i64: 1, 4, 128, 32>}, {transform_indices = @transform_7, window_bounds = array<i64: 1, 4, 128, 32>}]} {
    %c0 = arith.constant 0 : index
    %c0_0 = arith.constant 0 : index
    %c0_1 = arith.constant 0 : index
    %0 = vector.load %arg2[%c0, %c0_0, %c0_1] : memref<1x128x128xf32, #tpu.memory_space<vmem>>, vector<1x128x128xf32>
    %1 = vector.shape_cast %0 : vector<1x128x128xf32> to vector<128x128xf32>
    %c0_2 = arith.constant 0 : index
    %c0_3 = arith.constant 0 : index
    %2 = vector.load %arg3[%c0_2, %c0_3] : memref<1x128xf32, #tpu.memory_space<vmem>>, vector<1x128xf32>
    %c0_4 = arith.constant 0 : index
    %c0_5 = arith.constant 0 : index
    %3 = vector.load %arg4[%c0_4, %c0_5] : memref<1x128xf32, #tpu.memory_space<vmem>>, vector<1x128xf32>
    %cst = arith.constant dense<0.000000e+00> : vector<128xf32>
    %4 = vector.multi_reduction <add>, %1, %cst [1] : vector<128x128xf32> to vector<128xf32>
    %5 = vector.shape_cast %4 : vector<128xf32> to vector<128x1xf32>
    %cst_6 = arith.constant 1.280000e+02 : f32
    %6 = vector.broadcast %cst_6 : f32 to vector<128x1xf32>
    %7 = arith.divf %5, %6 : vector<128x1xf32>
    %8 = vector.broadcast %7 : vector<128x1xf32> to vector<128x128xf32>
    %9 = arith.subf %1, %8 : vector<128x128xf32>
    %10 = arith.mulf %9, %9 : vector<128x128xf32>
    %cst_7 = arith.constant dense<0.000000e+00> : vector<128xf32>
    %11 = vector.multi_reduction <add>, %10, %cst_7 [1] : vector<128x128xf32> to vector<128xf32>
    %12 = vector.shape_cast %11 : vector<128xf32> to vector<128x1xf32>
    %cst_8 = arith.constant 1.280000e+02 : f32
    %13 = vector.broadcast %cst_8 : f32 to vector<128x1xf32>
    %14 = arith.divf %12, %13 : vector<128x1xf32>
    %15 = vector.broadcast %7 : vector<128x1xf32> to vector<128x128xf32>
    %16 = arith.subf %1, %15 : vector<128x128xf32>
    %cst_9 = arith.constant 9.99999974E-6 : f32
    %17 = vector.broadcast %cst_9 : f32 to vector<128x1xf32>
    %18 = arith.addf %14, %17 : vector<128x1xf32>
    %19 = math.rsqrt %18 : vector<128x1xf32>
    %20 = vector.broadcast %19 : vector<128x1xf32> to vector<128x128xf32>
    %21 = arith.mulf %16, %20 : vector<128x128xf32>
    %22 = vector.broadcast %2 : vector<1x128xf32> to vector<128x128xf32>
    %23 = arith.mulf %21, %22 : vector<128x128xf32>
    %24 = vector.broadcast %3 : vector<1x128xf32> to vector<128x128xf32>
    %25 = arith.addf %23, %24 : vector<128x128xf32>
    %26 = arith.truncf %25 : vector<128x128xf32> to vector<128x128xbf16>
    %c0_10 = arith.constant 0 : index
    %c0_11 = arith.constant 0 : index
    %27 = vector.load %arg5[%c0_10, %c0_11] : memref<128x384xbf16, #tpu.memory_space<vmem>>, vector<128x384xbf16>
    %cst_12 = arith.constant dense<0.000000e+00> : vector<128x384xf32>
    %28 = tpu.matmul %26, %27, %cst_12 {dimension_numbers = #tpu.dot_dimension_numbers<[1], [0], [0], [1], [0, 0, 1, 1], [], []>} : vector<128x128xbf16>, vector<128x384xbf16>, vector<128x384xf32> -> vector<128x384xf32>
    %c0_13 = arith.constant 0 : index
    %c0_14 = arith.constant 0 : index
    %29 = vector.load %arg6[%c0_13, %c0_14] : memref<1x384xf32, #tpu.memory_space<vmem>>, vector<1x384xf32>
    %30 = vector.broadcast %29 : vector<1x384xf32> to vector<128x384xf32>
    %31 = arith.addf %28, %30 : vector<128x384xf32>
    %32 = arith.truncf %31 : vector<128x384xf32> to vector<128x384xbf16>
    %33 = vector.extract_strided_slice %32 {offsets = [0, 0], sizes = [128, 32], strides = [1, 1]} : vector<128x384xbf16> to vector<128x32xbf16>
    %c0_15 = arith.constant 0 : index
    %c0_16 = arith.constant 0 : index
    %c0_17 = arith.constant 0 : index
    %c0_18 = arith.constant 0 : index
    %34 = vector.load %arg7[%c0_15, %c0_16, %c0_17, %c0_18] : memref<1x4x128x32xbf16, #tpu.memory_space<vmem>>, vector<1x1x128x32xbf16>
    %35 = vector.shape_cast %34 : vector<1x1x128x32xbf16> to vector<128x32xbf16>
    %36 = vector.shape_cast %33 : vector<128x32xbf16> to vector<1x1x128x32xbf16>
    tpu.vector_store %arg7[%c0_15, %c0_16, %c0_17, %c0_18], %36 {strides = array<i32>} : memref<1x4x128x32xbf16, #tpu.memory_space<vmem>>, vector<1x1x128x32xbf16>,
    %37 = vector.extract_strided_slice %32 {offsets = [0, 128], sizes = [128, 32], strides = [1, 1]} : vector<128x384xbf16> to vector<128x32xbf16>
    %c0_19 = arith.constant 0 : index
    %c0_20 = arith.constant 0 : index
    %c0_21 = arith.constant 0 : index
    %c0_22 = arith.constant 0 : index
    %38 = vector.load %arg8[%c0_19, %c0_20, %c0_21, %c0_22] : memref<1x4x128x32xbf16, #tpu.memory_space<vmem>>, vector<1x1x128x32xbf16>
    %39 = vector.shape_cast %38 : vector<1x1x128x32xbf16> to vector<128x32xbf16>
    %40 = vector.shape_cast %37 : vector<128x32xbf16> to vector<1x1x128x32xbf16>
    tpu.vector_store %arg8[%c0_19, %c0_20, %c0_21, %c0_22], %40 {strides = array<i32>} : memref<1x4x128x32xbf16, #tpu.memory_space<vmem>>, vector<1x1x128x32xbf16>,
    %41 = vector.extract_strided_slice %32 {offsets = [0, 256], sizes = [128, 32], strides = [1, 1]} : vector<128x384xbf16> to vector<128x32xbf16>
    %c0_23 = arith.constant 0 : index
    %c0_24 = arith.constant 0 : index
    %c0_25 = arith.constant 0 : index
    %c0_26 = arith.constant 0 : index
    %42 = vector.load %arg9[%c0_23, %c0_24, %c0_25, %c0_26] : memref<1x4x128x32xbf16, #tpu.memory_space<vmem>>, vector<1x1x128x32xbf16>
    %43 = vector.shape_cast %42 : vector<1x1x128x32xbf16> to vector<128x32xbf16>
    %44 = vector.shape_cast %41 : vector<128x32xbf16> to vector<1x1x128x32xbf16>
    tpu.vector_store %arg9[%c0_23, %c0_24, %c0_25, %c0_26], %44 {strides = array<i32>} : memref<1x4x128x32xbf16, #tpu.memory_space<vmem>>, vector<1x1x128x32xbf16>,
    %45 = vector.extract_strided_slice %32 {offsets = [0, 32], sizes = [128, 32], strides = [1, 1]} : vector<128x384xbf16> to vector<128x32xbf16>
    %c0_27 = arith.constant 0 : index
    %c1 = arith.constant 1 : index
    %c0_28 = arith.constant 0 : index
    %c0_29 = arith.constant 0 : index
    %46 = vector.load %arg7[%c0_27, %c1, %c0_28, %c0_29] : memref<1x4x128x32xbf16, #tpu.memory_space<vmem>>, vector<1x1x128x32xbf16>
    %47 = vector.shape_cast %46 : vector<1x1x128x32xbf16> to vector<128x32xbf16>
    %48 = vector.shape_cast %45 : vector<128x32xbf16> to vector<1x1x128x32xbf16>
    tpu.vector_store %arg7[%c0_27, %c1, %c0_28, %c0_29], %48 {strides = array<i32>} : memref<1x4x128x32xbf16, #tpu.memory_space<vmem>>, vector<1x1x128x32xbf16>,
    %49 = vector.extract_strided_slice %32 {offsets = [0, 160], sizes = [128, 32], strides = [1, 1]} : vector<128x384xbf16> to vector<128x32xbf16>
    %c0_30 = arith.constant 0 : index
    %c1_31 = arith.constant 1 : index
    %c0_32 = arith.constant 0 : index
    %c0_33 = arith.constant 0 : index
    %50 = vector.load %arg8[%c0_30, %c1_31, %c0_32, %c0_33] : memref<1x4x128x32xbf16, #tpu.memory_space<vmem>>, vector<1x1x128x32xbf16>
    %51 = vector.shape_cast %50 : vector<1x1x128x32xbf16> to vector<128x32xbf16>
    %52 = vector.shape_cast %49 : vector<128x32xbf16> to vector<1x1x128x32xbf16>
    tpu.vector_store %arg8[%c0_30, %c1_31, %c0_32, %c0_33], %52 {strides = array<i32>} : memref<1x4x128x32xbf16, #tpu.memory_space<vmem>>, vector<1x1x128x32xbf16>,
    %53 = vector.extract_strided_slice %32 {offsets = [0, 288], sizes = [128, 32], strides = [1, 1]} : vector<128x384xbf16> to vector<128x32xbf16>
    %c0_34 = arith.constant 0 : index
    %c1_35 = arith.constant 1 : index
    %c0_36 = arith.constant 0 : index
    %c0_37 = arith.constant 0 : index
    %54 = vector.load %arg9[%c0_34, %c1_35, %c0_36, %c0_37] : memref<1x4x128x32xbf16, #tpu.memory_space<vmem>>, vector<1x1x128x32xbf16>
    %55 = vector.shape_cast %54 : vector<1x1x128x32xbf16> to vector<128x32xbf16>
    %56 = vector.shape_cast %53 : vector<128x32xbf16> to vector<1x1x128x32xbf16>
    tpu.vector_store %arg9[%c0_34, %c1_35, %c0_36, %c0_37], %56 {strides = array<i32>} : memref<1x4x128x32xbf16, #tpu.memory_space<vmem>>, vector<1x1x128x32xbf16>,
    %57 = vector.extract_strided_slice %32 {offsets = [0, 64], sizes = [128, 32], strides = [1, 1]} : vector<128x384xbf16> to vector<128x32xbf16>
    %c0_38 = arith.constant 0 : index
    %c2 = arith.constant 2 : index
    %c0_39 = arith.constant 0 : index
    %c0_40 = arith.constant 0 : index
    %58 = vector.load %arg7[%c0_38, %c2, %c0_39, %c0_40] : memref<1x4x128x32xbf16, #tpu.memory_space<vmem>>, vector<1x1x128x32xbf16>
    %59 = vector.shape_cast %58 : vector<1x1x128x32xbf16> to vector<128x32xbf16>
    %60 = vector.shape_cast %57 : vector<128x32xbf16> to vector<1x1x128x32xbf16>
    tpu.vector_store %arg7[%c0_38, %c2, %c0_39, %c0_40], %60 {strides = array<i32>} : memref<1x4x128x32xbf16, #tpu.memory_space<vmem>>, vector<1x1x128x32xbf16>,
    %61 = vector.extract_strided_slice %32 {offsets = [0, 192], sizes = [128, 32], strides = [1, 1]} : vector<128x384xbf16> to vector<128x32xbf16>
    %c0_41 = arith.constant 0 : index
    %c2_42 = arith.constant 2 : index
    %c0_43 = arith.constant 0 : index
    %c0_44 = arith.constant 0 : index
    %62 = vector.load %arg8[%c0_41, %c2_42, %c0_43, %c0_44] : memref<1x4x128x32xbf16, #tpu.memory_space<vmem>>, vector<1x1x128x32xbf16>
    %63 = vector.shape_cast %62 : vector<1x1x128x32xbf16> to vector<128x32xbf16>
    %64 = vector.shape_cast %61 : vector<128x32xbf16> to vector<1x1x128x32xbf16>
    tpu.vector_store %arg8[%c0_41, %c2_42, %c0_43, %c0_44], %64 {strides = array<i32>} : memref<1x4x128x32xbf16, #tpu.memory_space<vmem>>, vector<1x1x128x32xbf16>,
    %65 = vector.extract_strided_slice %32 {offsets = [0, 320], sizes = [128, 32], strides = [1, 1]} : vector<128x384xbf16> to vector<128x32xbf16>
    %c0_45 = arith.constant 0 : index
    %c2_46 = arith.constant 2 : index
    %c0_47 = arith.constant 0 : index
    %c0_48 = arith.constant 0 : index
    %66 = vector.load %arg9[%c0_45, %c2_46, %c0_47, %c0_48] : memref<1x4x128x32xbf16, #tpu.memory_space<vmem>>, vector<1x1x128x32xbf16>
    %67 = vector.shape_cast %66 : vector<1x1x128x32xbf16> to vector<128x32xbf16>
    %68 = vector.shape_cast %65 : vector<128x32xbf16> to vector<1x1x128x32xbf16>
    tpu.vector_store %arg9[%c0_45, %c2_46, %c0_47, %c0_48], %68 {strides = array<i32>} : memref<1x4x128x32xbf16, #tpu.memory_space<vmem>>, vector<1x1x128x32xbf16>,
    %69 = vector.extract_strided_slice %32 {offsets = [0, 96], sizes = [128, 32], strides = [1, 1]} : vector<128x384xbf16> to vector<128x32xbf16>
    %c0_49 = arith.constant 0 : index
    %c3 = arith.constant 3 : index
    %c0_50 = arith.constant 0 : index
    %c0_51 = arith.constant 0 : index
    %70 = vector.load %arg7[%c0_49, %c3, %c0_50, %c0_51] : memref<1x4x128x32xbf16, #tpu.memory_space<vmem>>, vector<1x1x128x32xbf16>
    %71 = vector.shape_cast %70 : vector<1x1x128x32xbf16> to vector<128x32xbf16>
    %72 = vector.shape_cast %69 : vector<128x32xbf16> to vector<1x1x128x32xbf16>
    tpu.vector_store %arg7[%c0_49, %c3, %c0_50, %c0_51], %72 {strides = array<i32>} : memref<1x4x128x32xbf16, #tpu.memory_space<vmem>>, vector<1x1x128x32xbf16>,
    %73 = vector.extract_strided_slice %32 {offsets = [0, 224], sizes = [128, 32], strides = [1, 1]} : vector<128x384xbf16> to vector<128x32xbf16>
    %c0_52 = arith.constant 0 : index
    %c3_53 = arith.constant 3 : index
    %c0_54 = arith.constant 0 : index
    %c0_55 = arith.constant 0 : index
    %74 = vector.load %arg8[%c0_52, %c3_53, %c0_54, %c0_55] : memref<1x4x128x32xbf16, #tpu.memory_space<vmem>>, vector<1x1x128x32xbf16>
    %75 = vector.shape_cast %74 : vector<1x1x128x32xbf16> to vector<128x32xbf16>
    %76 = vector.shape_cast %73 : vector<128x32xbf16> to vector<1x1x128x32xbf16>
    tpu.vector_store %arg8[%c0_52, %c3_53, %c0_54, %c0_55], %76 {strides = array<i32>} : memref<1x4x128x32xbf16, #tpu.memory_space<vmem>>, vector<1x1x128x32xbf16>,
    %77 = vector.extract_strided_slice %32 {offsets = [0, 352], sizes = [128, 32], strides = [1, 1]} : vector<128x384xbf16> to vector<128x32xbf16>
    %c0_56 = arith.constant 0 : index
    %c3_57 = arith.constant 3 : index
    %c0_58 = arith.constant 0 : index
    %c0_59 = arith.constant 0 : index
    %78 = vector.load %arg9[%c0_56, %c3_57, %c0_58, %c0_59] : memref<1x4x128x32xbf16, #tpu.memory_space<vmem>>, vector<1x1x128x32xbf16>
    %79 = vector.shape_cast %78 : vector<1x1x128x32xbf16> to vector<128x32xbf16>
    %80 = vector.shape_cast %77 : vector<128x32xbf16> to vector<1x1x128x32xbf16>
    tpu.vector_store %arg9[%c0_56, %c3_57, %c0_58, %c0_59], %80 {strides = array<i32>} : memref<1x4x128x32xbf16, #tpu.memory_space<vmem>>, vector<1x1x128x32xbf16>,
    return
  }
  func.func @transform_0(%arg0: i32, %arg1: i32) -> (i32, i32, i32) {
    %c0_i32 = arith.constant 0 : i32
    %c0_i32_0 = arith.constant 0 : i32
    return %arg0, %arg1, %c0_i32 : i32, i32, i32
  }
  func.func @transform_1(%arg0: i32, %arg1: i32) -> (i32, i32) {
    %c0_i32 = arith.constant 0 : i32
    %c0_i32_0 = arith.constant 0 : i32
    %c0_i32_1 = arith.constant 0 : i32
    return %c0_i32, %c0_i32_0 : i32, i32
  }
  func.func @transform_2(%arg0: i32, %arg1: i32) -> (i32, i32) {
    %c0_i32 = arith.constant 0 : i32
    %c0_i32_0 = arith.constant 0 : i32
    %c0_i32_1 = arith.constant 0 : i32
    return %c0_i32, %c0_i32_0 : i32, i32
  }
  func.func @transform_3(%arg0: i32, %arg1: i32) -> (i32, i32) {
    %c0_i32 = arith.constant 0 : i32
    %c0_i32_0 = arith.constant 0 : i32
    %c0_i32_1 = arith.constant 0 : i32
    return %c0_i32, %c0_i32_0 : i32, i32
  }
  func.func @transform_4(%arg0: i32, %arg1: i32) -> (i32, i32) {
    %c0_i32 = arith.constant 0 : i32
    %c0_i32_0 = arith.constant 0 : i32
    %c0_i32_1 = arith.constant 0 : i32
    return %c0_i32, %c0_i32_0 : i32, i32
  }
  func.func @transform_5(%arg0: i32, %arg1: i32) -> (i32, i32, i32, i32) {
    %c0_i32 = arith.constant 0 : i32
    %c0_i32_0 = arith.constant 0 : i32
    %c0_i32_1 = arith.constant 0 : i32
    return %arg0, %c0_i32, %arg1, %c0_i32_0 : i32, i32, i32, i32
  }
  func.func @transform_6(%arg0: i32, %arg1: i32) -> (i32, i32, i32, i32) {
    %c0_i32 = arith.constant 0 : i32
    %c0_i32_0 = arith.constant 0 : i32
    %c0_i32_1 = arith.constant 0 : i32
    return %arg0, %c0_i32, %arg1, %c0_i32_0 : i32, i32, i32, i32
  }
  func.func @transform_7(%arg0: i32, %arg1: i32) -> (i32, i32, i32, i32) {
    %c0_i32 = arith.constant 0 : i32
    %c0_i32_0 = arith.constant 0 : i32
    %c0_i32_1 = arith.constant 0 : i32
    return %arg0, %c0_i32, %arg1, %c0_i32_0 : i32, i32, i32, i32
  }
}

</mosaic_0001>

<bundles_post_ra>
// kernel: tpu_custom_call.1
= control target key start
LH: loop header
LB: loop body
LE: loop exit
PB: predicated region body
PF: predicated region fallthrough
CT: control target
= control target key end

     0   :  { %s4494_s0 = inlined_call_operand.hbm [shape: f32[2,256,128], index: 0, kind: input, shape index: {}]   ;;  %s4495_s1 = inlined_call_operand.hbm [shape: f32[1,128], index: 1, kind: input, shape index: {}]   ;;  %s4496_s2 = inlined_call_operand.hbm [shape: f32[1,128], index: 2, kind: input, shape index: {}]   ;;  %s4497_s3 = inlined_call_operand.hbm [shape: bf16[128,384], index: 3, kind: input, shape index: {}]   ;;  %s4498_s4 = inlined_call_operand.hbm [shape: f32[1,384], index: 4, kind: input, shape index: {}]   ;;  %s4499_s5 = inlined_call_operand.hbm [shape: bf16[2,4,256,32], index: 5, kind: output, shape index: {0}]   ;;  %s4500_s6 = inlined_call_operand.hbm [shape: bf16[2,4,256,32], index: 6, kind: output, shape index: {1}]   ;;  %s4501_s7 = inlined_call_operand.hbm [shape: bf16[2,4,256,32], index: 7, kind: output, shape index: {2}]  }
   0x1   :  { %4509 = sst [smem:[#allocation29_spill]] %s4495_s1 }
   0x2   :  { %4510 = sst [smem:[#allocation30_spill]] %s4496_s2 }
   0x3   :  { %4511 = sst [smem:[#allocation31_spill]] %s4497_s3 }
   0x4   :  { %4512 = sst [smem:[#allocation32_spill]] %s4498_s4 }
   0x5   :  { %4513 = sst [smem:[#allocation33_spill]] %s4500_s6 }
   0x6   :  { %4514 = sst [smem:[#allocation34_spill]] %s4501_s7 }
   0x7   :  { %13 = vsyncpa [#allocation3], 0 }
   0x8   :  { %15 = vsyncpa [#allocation3 + $0x1], 0 }
   0x9   :  { %16 = vsyncpa [#allocation6], 0 }
   0xa   :  { %17 = vsyncpa [#allocation9], 0 }
   0xb   :  { %18 = vsyncpa [#allocation4], 0 }
   0xc   :  { %20 = vsyncpa [#allocation4 + $0x1], 0 }
   0xd   :  { %21 = vsyncpa [#allocation13], 0 }
   0xe   :  { %23 = vsyncpa [#allocation13 + $0x1], 0  ;;  %s3087_s24 = smov 0   ;;  %s3089_s25 = smov 0  }
   0xf   :  { %s3091_s26 = smov 0   ;;  %s3093_s27 = smov 0  }
  0x10   :  { %s3095_s28 = smov 0   ;;  %s3097_s29 = smov 0  }
  0x11   :  { %s3099_s30 = smov 0   ;;  %s3101_s8 = smov 0  }
  0x12 LB: > { %4515 = sst [smem:[#allocation26_spill]] %s2983_s24  ;;  %s3128_s9 = sadd.s32 4294967295, %s3011_s8   ;;  %s3011_s8 = sphi %s3101_s8, %s29_s8   ;;  %s3007_s30 = sphi %s3099_s30, %s4550_s30   ;;  %s3003_s29 = sphi %s3097_s29, %s4549_s29   ;;  %s2999_s28 = sphi %s3095_s28, %s4548_s28   ;;  %s2995_s27 = sphi %s3093_s27, %s4547_s27   ;;  %s2991_s26 = sphi %s3091_s26, %s4546_s26   ;;  %s2987_s25 = sphi %s3089_s25, %s4545_s25   ;;  %s2983_s24 = sphi %s3087_s24, %s4544_s24  }
  0x13   : > { %s4502_s10 = sadd.s32 4294967294, %s3011_s8   ;;  %p63_p0 = scmp.ne.s32.totalorder %s2987_s25, %s2983_s24 }
  0x14   : > { %p4504_p1 = scmp.eq.s32.totalorder %s3128_s9, 0  ;;  %p179_p3 = scmp.eq.s32.totalorder %s4502_s10, 3 }
  0x15   : > { %p2200_p5 = scmp.ge.s32.totalorder %s3011_s8, 1  ;;  %p242_p7 = scmp.lt.s32.totalorder %s3011_s8, 5 }
  0x16   : > { %p3139_p4 = por %p4504_p1, %p63_p0  ;;  %p3144_p6 = por %p179_p3, %p63_p0 }
  0x17   : > { %p3149_p8 = pnand %p2200_p5, %p242_p7  ;;  %s3013_s14 = smov [#allocation5]  }
  0x18   : > { %s4516_s11 = scalar_select %p3139_p4, 1, 0 }
  0x19   : > { %s4517_s12 = scalar_select %p3144_p6, 1, 0 }
  0x1a   : > { %s4519_s13 = scalar_select %p3149_p8, 1, 0 }
  0x1b   : > { %4518 = sst [smem:[#allocation27_spill]] %s4517_s12  ;;  %s255_s15 = sshll.u32 %s3013_s14, 4  ;;  %s256_s15 = int_to_ptr.vmem [resolvable:$true] %s255_s15 }
  0x1c   : > { %p2589_p9 = pneg %p3149_p8  ;;  %s3014_s16 = smov [#allocation8]  }
  0x1d   : > { %s276_s17 = sshll.u32 %s3014_s16, 4  ;;  %s3015_s19 = smov [#allocation7]   ;;  %s3161_s17 = int_to_ptr.vmem [resolvable:$true] %s276_s17 }
  0x1e   : > { %p3157_p10 = pnand %p2589_p9, %p4504_p1  ;;  %s3163_s20 = sshll.u32 %s3015_s19, 4  ;;  %s267_s20 = int_to_ptr.vmem [resolvable:$true] %s3163_s20 }
  0x1f   : > { %s4521_s1 = sld [smem:[#allocation29_spill]] }
  0x20   : > { %p3173_p12 = pneg %p3157_p10 }
  0x25   : > { %s2787_s23 = scalar_lea.hbm %s4521_s1, 16 }
  0x26   : > { %p2788_p11 = scmp.ne.s32.totalorder %s4521_s1, %s2787_s23  ;;  %p2794_p3 = scmp.lt.u32.totalorder %s2787_s23, %s4521_s1 }
  0x28   : > { %p2790_p13 = pnand %p3173_p12, %p2788_p11 }
  0x2a   : > { %p2791_p0 = pneg %p2790_p13 }
  0x2c   : > { %p2796_p5 = pnand %p2794_p3, %p2791_p0 }
  0x2e   : > { %2799 = shalt.err (!%p2796_p5)
}
  0x2f   : > { %s2800_s21 = scalar_lea.vmem %s256_s15, 16  ;;  %s2807_s10 = scalar_lea.vmem %s256_s15, 32 }
  0x30   : > { %p2801_p7 = scmp.ne.s32.totalorder %s256_s15, %s2800_s21  ;;  %p2808_p2 = scmp.lt.s32.totalorder %s256_s15, %s256_s15 }
  0x31   : > { %p2809_p6 = scmp.lt.s32.totalorder %s2807_s10, %s2800_s21 }
  0x32   : > { %p2803_p9 = pnand %p2801_p7, %p3173_p12 }
  0x33   : > { %p2810_p4 = por %p2809_p6, %p2808_p2 }
  0x34   : > { %p2804_p1 = pneg %p2803_p9 }
  0x36   : > { %p2811_p8 = pnand %p2810_p4, %p2804_p1 }
  0x38   : > { %2814 = shalt.err (!%p2811_p8)
}
  0x39   : > { %2592 = dma.hbm_to_vmem [thread:$0]  (!%p3157_p10), %s4521_s1, 16, %s256_s15, [#allocation6]  }
  0x3a   : > { %s4523_s3 = sld [smem:[#allocation31_spill]] }
  0x40   : > { %s2815_s19 = scalar_lea.hbm %s4523_s3, 3072 }
  0x41   : > { %p2816_p11 = scmp.ne.s32.totalorder %s4523_s3, %s2815_s19  ;;  %p2822_p1 = scmp.lt.u32.totalorder %s2815_s19, %s4523_s3 }
  0x43   : > { %p2818_p13 = pnand %p2816_p11, %p3173_p12 }
  0x45   : > { %p2819_p2 = pneg %p2818_p13 }
  0x47   : > { %p2824_p4 = pnand %p2822_p1, %p2819_p2 }
  0x49   : > { %2827 = shalt.err (!%p2824_p4)
}
  0x4a   : > { %s2828_s15 = scalar_lea.vmem %s3161_s17, 3072  ;;  %p2836_p3 = scmp.lt.s32.totalorder %s3161_s17, %s3161_s17 }
  0x4b   : > { %p2829_p6 = scmp.ne.s32.totalorder %s3161_s17, %s2828_s15  ;;  %p2837_p5 = scmp.lt.s32.totalorder %s2828_s15, %s2828_s15 }
  0x4d   : > { %p2831_p8 = pnand %p2829_p6, %p3173_p12  ;;  %p2838_p7 = por %p2837_p5, %p2836_p3 }
  0x4f   : > { %p2832_p0 = pneg %p2831_p8 }
  0x51   : > { %p2839_p9 = pnand %p2838_p7, %p2832_p0 }
  0x53   : > { %2842 = shalt.err (!%p2839_p9)
}
  0x54   : > { %s3016_s7 = smov 192   ;;  %s3017_s24 = smov 12  }
  0x55   : > { %2598 = dma.hbm_to_vmem [thread:$0]  (!%p3157_p10), %s4523_s3, 3072, %s3161_s17, [#allocation9], %s3016_s7, %s3016_s7, %s3017_s24  }
  0x56   : > { %s4524_s2 = sld [smem:[#allocation30_spill]] }
  0x5c   : > { %s2843_s19 = scalar_lea.hbm %s4524_s2, 16 }
  0x5d   : > { %p2844_p11 = scmp.ne.s32.totalorder %s4524_s2, %s2843_s19  ;;  %p2850_p1 = scmp.lt.u32.totalorder %s2843_s19, %s4524_s2 }
  0x5f   : > { %p2846_p13 = pnand %p2844_p11, %p3173_p12 }
  0x61   : > { %p2847_p2 = pneg %p2846_p13 }
  0x63   : > { %p2852_p4 = pnand %p2850_p1, %p2847_p2 }
  0x65   : > { %2855 = shalt.err (!%p2852_p4)
}
  0x66   : > { %s2856_s22 = scalar_lea.vmem %s267_s20, 16  ;;  %s2863_s17 = scalar_lea.vmem %s267_s20, 32 }
  0x67   : > { %p2857_p6 = scmp.ne.s32.totalorder %s267_s20, %s2856_s22  ;;  %p2864_p3 = scmp.lt.s32.totalorder %s267_s20, %s267_s20 }
  0x68   : > { %p2865_p5 = scmp.lt.s32.totalorder %s2863_s17, %s2856_s22 }
  0x69   : > { %p2859_p8 = pnand %p2857_p6, %p3173_p12 }
  0x6a   : > { %p2866_p7 = por %p2865_p5, %p2864_p3 }
  0x6b   : > { %p2860_p0 = pneg %p2859_p8 }
  0x6d   : > { %p2867_p9 = pnand %p2866_p7, %p2860_p0 }
  0x6f   : > { %2870 = shalt.err (!%p2867_p9)
}
  0x70   : > { %2595 = dma.hbm_to_vmem [thread:$0]  (!%p3157_p10), %s4524_s2, 16, %s267_s20, [#allocation6]  }
  0x71   : > { %s3018_s1 = smov [#allocation10]   ;;  %s4525_s4 = sld [smem:[#allocation32_spill]] }
  0x72   : > { %s290_s14 = sshll.u32 %s3018_s1, 4  ;;  %s291_s14 = int_to_ptr.vmem [resolvable:$true] %s290_s14 }
  0x77   : > { %s2871_s19 = scalar_lea.hbm %s4525_s4, 48 }
  0x78   : > { %p2872_p11 = scmp.ne.s32.totalorder %s4525_s4, %s2871_s19  ;;  %p2878_p1 = scmp.lt.u32.totalorder %s2871_s19, %s4525_s4 }
  0x7a   : > { %p2874_p13 = pnand %p2872_p11, %p3173_p12 }
  0x7c   : > { %p2875_p2 = pneg %p2874_p13 }
  0x7e   : > { %p2880_p4 = pnand %p2878_p1, %p2875_p2 }
  0x80   : > { %2883 = shalt.err (!%p2880_p4)
}
  0x81   : > { %s2884_s20 = scalar_lea.vmem %s291_s14, 48  ;;  %s2891_s17 = scalar_lea.vmem %s291_s14, 64 }
  0x82   : > { %p2885_p6 = scmp.ne.s32.totalorder %s291_s14, %s2884_s20  ;;  %p2892_p3 = scmp.lt.s32.totalorder %s291_s14, %s291_s14 }
  0x83   : > { %p2893_p5 = scmp.lt.s32.totalorder %s2891_s17, %s2884_s20 }
  0x84   : > { %p2887_p8 = pnand %p2885_p6, %p3173_p12 }
  0x85   : > { %p2894_p7 = por %p2893_p5, %p2892_p3 }
  0x86   : > { %p2888_p0 = pneg %p2887_p8 }
  0x88   : > { %p2895_p9 = pnand %p2894_p7, %p2888_p0 }
  0x8a   : > { %2898 = shalt.err (!%p2895_p9)
}
  0x8b   : > { %2601 = dma.hbm_to_vmem [thread:$0]  (!%p3157_p10), %s4525_s4, 48, %s291_s14, [#allocation9]  }
  0x8c   : > { %s38_s16 = sadd.s32 1, %s3003_s29  ;;  %s41_s1 = sadd.s32 1, %s3007_s30 }
  0x8d   : > { %p39_p12 = scmp.ge.s32.totalorder %s38_s16, 2  ;;  %s50_s18 = sadd.s32 1, %s2991_s26 }
  0x8e   : > { %p57_p11 = scmp.ne.s32.totalorder %s2991_s26, %s2987_s25  ;;  %p58_p13 = scmp.eq.s32.totalorder %s3011_s8, 0 }
  0x8f   : > { %s4552_s16 = smov (%p39_p12, %s38_s16), 0  ;;  %s4554_s1 = smov (!%p39_p12, %s41_s1), %s3007_s30 }
  0x90   : > { %4526 = sst [smem:[#allocation28_spill]] %s4552_s16  ;;  %s46_s12 = ssub.s32 %s3003_s29, %s4552_s16 }
  0x91   : > { %p3260_p2 = por %p58_p13, %p57_p11  ;;  %p43_p10 = scmp.ge.s32.totalorder %s4554_s1, 2 }
  0x92   : > { %p4528_p1 = scmp.eq.s32.totalorder %s3128_s9, 3  ;;  %p2620_p6 = scmp.lt.s32.totalorder %s3011_s8, 4 }
  0x93   : > { %s301_s19 = sand.u32 1, %s2991_s26   ;;  %s4556_s1 = smov (%p43_p10, %s4554_s1), 0 }
  0x94   : > { %p3266_p4 = por %p4528_p1, %p57_p11  ;;  %s2206_s21 = sshll.u32 %s301_s19, 7 }
  0x95   : > { %s45_s10 = ssub.s32 %s3007_s30, %s4556_s1  ;;  %s2207_s22 = sshll.u32 %s3003_s29, 4 }
  0x96   : > { %s47_s15 = sor.u32 %s46_s12, %s45_s10  ;;  %s2208_s20 = sshll.u32 %s3007_s30, 5 }
  0x97   : > { %p48_p8 = scmp.eq.s32.totalorder %s47_s15, 0  ;;  %s311_s17 = sadd.s32 %s2208_s20, %s2207_s22 }
  0x98   : > { %s305_s7 = scalar_lea.vmem [#allocation2], %s2206_s21  ;;  %s2209_s3 = sshll.u32 %s311_s17, 7 }
  0x99   : > { %s314_s24 = sshll.u32 %s305_s7, 4  ;;  %s3286_s6 = scalar_lea.hbm %s4494_s0, %s2209_s3  ;;  %s3281_s24 = int_to_ptr.vmem [resolvable:$true] %s314_s24 }
  0x9a   : > { %s3279_s2 = scalar_select %p48_p8, %s2991_s26, %s50_s18  }
  0x9b   : > { %p3292_p0 = pnand %p2620_p6, %p3260_p2  ;;  %s3296_s18 = scalar_lea.sflag [#allocation3], %s301_s19 }
  0x9c   : > { %s2899_s21 = scalar_lea.hbm %s3286_s6, 2048  ;;  %s2904_s16 = scalar_lea.hbm %s4494_s0, 8192 }
  0x9d   : > { %p2900_p3 = scmp.ne.s32.totalorder %s3286_s6, %s2899_s21  ;;  %p2901_p5 = pneg %p3292_p0 }
  0x9e   : > { %p2905_p12 = scmp.lt.u32.totalorder %s3286_s6, %s4494_s0  ;;  %p2906_p11 = scmp.lt.u32.totalorder %s2904_s16, %s2899_s21 }
  0x9f   : > { %p2902_p7 = pnand %p2901_p5, %p2900_p3  ;;  %p2908_p2 = scmp.lt.u32.totalorder %s2899_s21, %s3286_s6 }
  0xa0   : > { %p2907_p13 = por %p2906_p11, %p2905_p12 }
  0xa1   : > { %p2903_p9 = pneg %p2902_p7 }
  0xa2   : > { %p2909_p10 = por %p2908_p2, %p2907_p13 }
  0xa4   : > { %p2910_p1 = pnand %p2909_p10, %p2903_p9 }
  0xa6   : > { %2913 = shalt.err (!%p2910_p1)
}
  0xa7   : > { %s2914_s19 = scalar_lea.vmem %s3281_s24, 2048  ;;  %s3019_s15 = smov [#allocation2]  }
  0xa8   : > { %p2915_p6 = scmp.ne.s32.totalorder %s3281_s24, %s2914_s19  ;;  %s2919_s22 = sshll.u32 %s3019_s15, 4  ;;  %s2920_s22 = int_to_ptr.vmem [resolvable:$false] %s2919_s22 }
  0xa9   : > { %s2921_s20 = scalar_lea.vmem %s2920_s22, 4096  ;;  %p2922_p7 = scmp.lt.s32.totalorder %s3281_s24, %s2920_s22 }
  0xaa   : > { %p2917_p8 = pnand %p2915_p6, %p2901_p5  ;;  %p2923_p12 = scmp.lt.s32.totalorder %s2921_s20, %s2914_s19 }
  0xac   : > { %p2918_p3 = pneg %p2917_p8  ;;  %p2924_p11 = por %p2923_p12, %p2922_p7 }
  0xae   : > { %p2925_p13 = pnand %p2924_p11, %p2918_p3 }
  0xb0   : > { %2928 = shalt.err (!%p2925_p13)
}
  0xb1   : > { %s3020_s17 = smov 128   ;;  %s3021_s7 = smov 8  }
  0xb2   : > { %2605 = dma.hbm_to_vmem [thread:$0]  (!%p3292_p0), %s3286_s6, 2048, %s3281_s24, %s3296_s18, %s3020_s17, %s3020_s17, %s3021_s7  }
  0xb3   : > { %p4531_p5 = scmp.ne.s32.totalorder %s4519_s13, 0 }
  0xb4   : > { %s3327_s21 = sand.u32 (!%p4531_p5), 1, %s2987_s25   ;;  %p4532_p9 = scmp.ne.s32.totalorder (!%p4531_p5), %s4516_s11, 0 }
  0xb5   : > { %326 = sbr.rel (%p4531_p5) target bundleno = 1164 (0x48c), region = 40  ;;  %s2211_s3 = sshll.u32 (!%p4531_p5), %s3327_s21, 7 }
  0xb6   : > { %s329_s4 = scalar_lea.sflag (!%p4531_p5), [#allocation3], %s3327_s21  ;;  %s3331_s16 = scalar_lea.vmem (!%p4531_p5), [#allocation2], %s2211_s3 }
  0xbc   : > { %2962 = dma.done.wait (%p4532_p9), %s329_s4, 2048  }
  0xbd   : > { %2964 = vsyncadd (%p4532_p9), %s329_s4, 4294965248  ;;  %p4533_p0 = scmp.eq.s32.totalorder %s3128_s9, 0 }
  0xbf   : > { %2966 = dma.done.wait (%p4533_p0), [#allocation6], 32   ;;  %p4534_p2 = pmov %p4533_p0 }
  0xc0   : > { %p4535_p10 = pmov %p4533_p0 }
  0xc1   : > { %2968 = vsyncadd (%p4534_p2), [#allocation6], 4294967264 }
  0xc2   : > { %2970 = dma.done.wait (%p4535_p10), [#allocation9], 3120   ;;  %p4536_p1 = pmov %p4533_p0 }
  0xc3   : > { %v394_v0 = vld [vmem:[%s3331_s16] sm:$0xff]  ;;  %v396_v1 = vld [vmem:[%s3331_s16 + $0x10] sm:$0xff]  ;;  %v395_v2 = vld [vmem:[%s3331_s16 + $0x8] sm:$0xff]  ;;  %s3530_s6 = sshll.u32 %s3327_s21, 8  ;;  %vm1108_vm0 = vcmask 257024   ;;  %s3023_s13 = smov 96  }
  0xc4   : > { %2972 = vsyncadd (%p4536_p1), [#allocation9], 4294964176  ;;  %412 = vadd.xlane.f32.xlu0 %v394_v0  ;;  %416 = vadd.xlane.f32.xlu1 %v396_v1  ;;  %v397_v3 = vld [vmem:[%s3331_s16 + $0x18] sm:$0xff]  ;;  %v398_v4 = vld [vmem:[%s3331_s16 + $0x20] sm:$0xff]  ;;  %s3541_s11 = scalar_lea.vmem [#allocation11], %s3530_s6  ;;  %s3548_s24 = scalar_lea.vmem [#allocation12], %s3530_s6 }
  0xc5   : > { %v399_v5 = vld [vmem:[%s3331_s16 + $0x28] sm:$0xff]  ;;  %v3352_v6 = vld [vmem:[%s3331_s16 + $0x30] sm:$0xff]  ;;  %v3355_v7 = vld [vmem:[%s3331_s16 + $0x38] sm:$0xff]  ;;  %s3569_s12 = scalar_lea.vmem [#allocation14], %s3530_s6  ;;  %s3024_s18 = smov 64  }
  0xc6   : > { %v3358_v8 = vld [vmem:[%s3331_s16 + $0x40] sm:$0xff]  ;;  %v3361_v9 = vld [vmem:[%s3331_s16 + $0x48] sm:$0xff]  ;;  %v3368_v10 = vld [vmem:[%s3331_s16 + $0x50] sm:$0xff]  ;;  %s3025_s23 = smov 32   ;;  %s1859_s10 = sand.u32 1, %s3128_s9  }
  0xc7   : > { %v3371_v11 = vld [vmem:[%s3331_s16 + $0x58] sm:$0xff]  ;;  %v3376_v12 = vld [vmem:[%s3331_s16 + $0x60] sm:$0xff]  ;;  %v3379_v13 = vld [vmem:[%s3331_s16 + $0x68] sm:$0xff]  ;;  %s1855_s19 = scalar_lea.sflag [#allocation4], %s3327_s21  ;;  %s4399_s15 = scalar_lea.sflag [#allocation13], %s1859_s10 }
  0xc8   : > { %414 = vadd.xlane.f32.xlu0 %v395_v2  ;;  %418 = vadd.xlane.f32.xlu1 %v397_v3  ;;  %v3384_v14 = vld [vmem:[%s3331_s16 + $0x70] sm:$0xff]  ;;  %v3387_v15 = vld [vmem:[%s3331_s16 + $0x78] sm:$0xff]  ;;  %v2726_v18 = vld [vmem:[#allocation8 + $0x1c] ss:$12 sps:$4 sm:$0xff]  }
  0xc9   : > { %v2723_v16 = vld [vmem:[#allocation8 + $0x4] ss:$12 sps:$4 sm:$0xff]   ;;  %v2725_v17 = vld [vmem:[#allocation8] ss:$12 sps:$4 sm:$0xff]   ;;  %v2728_v19 = vld [vmem:[#allocation8 + $0x8] ss:$12 sps:$4 sm:$0xff]  }
  0xca   : > { %818 = vmatprep.subr.bf16.mxu0 %v2723_v16  ;;  %2515 = vmatprep.subr.bf16.mxu1 %v2728_v19  ;;  %v2729_v58 = vld [vmem:[#allocation8 + $0x18] ss:$12 sps:$4 sm:$0xff]  }
  0xcb   : > { %819 = vmatpush1.bf16.msra.mxu0 %v2725_v17  ;;  %2516 = vmatpush3.bf16.msra.mxu1 %v2728_v19  ;;  %v2736_v19 = vld [vmem:[#allocation8 + $0x38] ss:$12 sps:$4 sm:$0xff]  }
  0xcc   : > { %420 = vadd.xlane.f32.xlu0 %v398_v4  ;;  %422 = vadd.xlane.f32.xlu1 %v399_v5 }
  0xcd   : > { %820 = vmatprep.subr.bf16.mxu0 %v2726_v18  ;;  %v2734_v18 = vld [vmem:[#allocation8 + $0x4c] ss:$12 sps:$4 sm:$0xff]  }
  0xcf   : > { %821 = vmatpush1.bf16.msra.mxu0 %v2729_v58 }
  0xd0   : > { %424 = vadd.xlane.f32.xlu0 %v3352_v6  ;;  %426 = vadd.xlane.f32.xlu1 %v3355_v7 }
  0xd4   : > { %428 = vadd.xlane.f32.xlu0 %v3358_v8  ;;  %430 = vadd.xlane.f32.xlu1 %v3361_v9 }
  0xd8   : > { %432 = vadd.xlane.f32.xlu0 %v3368_v10  ;;  %434 = vadd.xlane.f32.xlu1 %v3371_v11 }
  0xdc   : > { %436 = vadd.xlane.f32.xlu0 %v3376_v12  ;;  %438 = vadd.xlane.f32.xlu1 %v3379_v13 }
  0xe0   : > { %440 = vadd.xlane.f32.xlu0 %v3384_v14  ;;  %442 = vadd.xlane.f32.xlu1 %v3387_v15 }
 0x151   : > { %v413_v20 = vpop.xlane.xlu0 %412  ;;  %v417_v21 = vpop.xlane.xlu1 %416 }
 0x152   : > { %v445_v22 = vmul.f32 0.0078125, %v413_v20  ;;  %v447_v23 = vmul.f32 0.0078125, %v417_v21 }
 0x154   : > { %v3391_v24 = vsub.f32 %v394_v0, %v445_v22  ;;  %v3393_v25 = vsub.f32 %v396_v1, %v447_v23  ;;  %v2730_v0 = vld [vmem:[#allocation8 + $0x34] ss:$12 sps:$4 sm:$0xff]  }
 0x155   : > { %v415_v26 = vpop.xlane.xlu0 %414  ;;  %v419_v27 = vpop.xlane.xlu1 %418  ;;  %v2732_v1 = vld [vmem:[#allocation8 + $0x20] ss:$12 sps:$4 sm:$0xff]   ;;  %822 = vmatprep.subr.bf16.mxu0 %v2730_v0  ;;  %v2737_v22 = vld [vmem:[#allocation8 + $0x48] ss:$12 sps:$4 sm:$0xff]  }
 0x156   : > { %v446_v28 = vmul.f32 0.0078125, %v415_v26  ;;  %v477_v29 = vmul.f32 %v3391_v24, %v3391_v24  ;;  %v448_v30 = vmul.f32 0.0078125, %v419_v27  ;;  %v479_v31 = vmul.f32 %v3393_v25, %v3393_v25  ;;  %2517 = vmatprep.subr.bf16.mxu1 %v2732_v1 }
 0x157   : > { %2518 = vmatpush3.bf16.msra.mxu1 %v2732_v1 }
 0x158   : > { %493 = vadd.xlane.f32.xlu0 %v477_v29  ;;  %v3399_v32 = vsub.f32 %v395_v2, %v446_v28  ;;  %v3401_v33 = vsub.f32 %v397_v3, %v448_v30  ;;  %2519 = vmatprep.subr.bf16.mxu1 %v2736_v19  ;;  %v2738_v29 = vld [vmem:[#allocation8 + $0x64] ss:$12 sps:$4 sm:$0xff]  }
 0x159   : > { %v421_v34 = vpop.xlane.xlu0 %420  ;;  %v423_v35 = vpop.xlane.xlu1 %422  ;;  %v2740_v30 = vld [vmem:[#allocation8 + $0x50] ss:$12 sps:$4 sm:$0xff]  }
 0x15a   : > { %v449_v36 = vmul.f32 0.0078125, %v421_v34  ;;  %v478_v37 = vmul.f32 %v3399_v32, %v3399_v32  ;;  %v450_v38 = vmul.f32 0.0078125, %v423_v35  ;;  %v480_v39 = vmul.f32 %v3401_v33, %v3401_v33 }
 0x15b   : > { %2520 = vmatpush3.bf16.msra.mxu1 %v2736_v19 }
 0x15c   : > { %497 = vadd.xlane.f32.xlu0 %v479_v31  ;;  %495 = vadd.xlane.f32.xlu1 %v478_v37  ;;  %v3407_v40 = vsub.f32 %v398_v4, %v449_v36  ;;  %v3409_v41 = vsub.f32 %v399_v5, %v450_v38  ;;  %v2741_v31 = vld [vmem:[#allocation8 + $0x60] ss:$12 sps:$4 sm:$0xff]   ;;  %v2744_v36 = vld [vmem:[#allocation8 + $0x68] ss:$12 sps:$4 sm:$0xff]   ;;  %v2745_v37 = vld [vmem:[#allocation8 + $0x78] ss:$12 sps:$4 sm:$0xff]  }
 0x15d   : > { %v425_v42 = vpop.xlane.xlu0 %424  ;;  %v427_v43 = vpop.xlane.xlu1 %426  ;;  %2521 = vmatprep.subr.bf16.mxu1 %v2740_v30  ;;  %v2748_v38 = vld [vmem:[#allocation8 + $0x80] ss:$12 sps:$4 sm:$0xff]  }
 0x15e   : > { %v451_v44 = vmul.f32 0.0078125, %v425_v42  ;;  %v481_v45 = vmul.f32 %v3407_v40, %v3407_v40  ;;  %v452_v46 = vmul.f32 0.0078125, %v427_v43  ;;  %v482_v47 = vmul.f32 %v3409_v41, %v3409_v41  ;;  %v2750_v42 = vld [vmem:[#allocation8 + $0xac] ss:$12 sps:$4 sm:$0xff]  }
 0x15f   : > { %2522 = vmatpush3.bf16.msra.mxu1 %v2740_v30  ;;  %v2752_v43 = vld [vmem:[#allocation8 + $0x98] ss:$12 sps:$4 sm:$0xff]  }
 0x160   : > { %499 = vadd.xlane.f32.xlu1 %v480_v39  ;;  %501 = vadd.xlane.f32.xlu0 %v481_v45  ;;  %v3416_v48 = vsub.f32 %v3352_v6, %v451_v44  ;;  %v3419_v49 = vsub.f32 %v3355_v7, %v452_v46  ;;  %v2733_v7 = vld [vmem:[#allocation8 + $0x30] ss:$12 sps:$4 sm:$0xff]   ;;  %v2753_v44 = vld [vmem:[#allocation8 + $0xa8] ss:$12 sps:$4 sm:$0xff]   ;;  %v3022_v46 = vmov 0  }
 0x161   : > { %v429_v50 = vpop.xlane.xlu0 %428  ;;  %v431_v51 = vpop.xlane.xlu1 %430  ;;  %823 = vmatpush1.bf16.msra.mxu0 %v2733_v7  ;;  %2523 = vmatprep.subr.bf16.mxu1 %v2744_v36  ;;  %v2749_v39 = vld [vmem:[#allocation8 + $0x90] ss:$12 sps:$4 sm:$0xff]  }
 0x162   : > { %v453_v52 = vmul.f32 0.0078125, %v429_v50  ;;  %v483_v53 = vmul.f32 %v3416_v48, %v3416_v48  ;;  %v454_v54 = vmul.f32 0.0078125, %v431_v51  ;;  %v484_v55 = vmul.f32 %v3419_v49, %v3419_v49  ;;  %824 = vmatprep.subr.bf16.mxu0 %v2734_v18  ;;  %v2754_v45 = vld [vmem:[#allocation8 + $0xb0] ss:$12 sps:$4 sm:$0xff]   ;;  %850 = vmatprep.mubr.bf16.mxu0 %v3022_v46 }
 0x163   : > { %2524 = vmatpush3.bf16.msra.mxu1 %v2744_v36 }
 0x164   : > { %503 = vadd.xlane.f32.xlu1 %v482_v47  ;;  %505 = vadd.xlane.f32.xlu0 %v483_v53  ;;  %v3426_v56 = vsub.f32 %v3358_v8, %v453_v52  ;;  %v3429_v57 = vsub.f32 %v3361_v9, %v454_v54 }
 0x165   : > { %v433_v59 = vpop.xlane.xlu0 %432  ;;  %v435_v60 = vpop.xlane.xlu1 %434  ;;  %825 = vmatpush1.bf16.msra.mxu0 %v2737_v22  ;;  %2525 = vmatprep.subr.bf16.mxu1 %v2748_v38  ;;  %v3467_v22 = vld [vmem:[#allocation5] ss:$0 sm:$0xff] }
 0x166   : > { %v455_v61 = vmul.f32 0.0078125, %v433_v59  ;;  %v485_v62 = vmul.f32 %v3426_v56, %v3426_v56  ;;  %v456_v63 = vmul.f32 0.0078125, %v435_v60  ;;  %v486_v2 = vmul.f32 %v3429_v57, %v3429_v57  ;;  %826 = vmatprep.subr.bf16.mxu0 %v2738_v29 }
 0x167   : > { %2526 = vmatpush3.bf16.msra.mxu1 %v2748_v38 }
 0x168   : > { %507 = vadd.xlane.f32.xlu1 %v484_v55  ;;  %509 = vadd.xlane.f32.xlu0 %v485_v62  ;;  %v3436_v3 = vsub.f32 %v3368_v10, %v455_v61  ;;  %v3439_v4 = vsub.f32 %v3371_v11, %v456_v63 }
 0x169   : > { %v437_v5 = vpop.xlane.xlu0 %436  ;;  %v439_v6 = vpop.xlane.xlu1 %438  ;;  %827 = vmatpush1.bf16.msra.mxu0 %v2741_v31  ;;  %2527 = vmatprep.subr.bf16.mxu1 %v2752_v43 }
 0x16a   : > { %v457_v8 = vmul.f32 0.0078125, %v437_v5  ;;  %v487_v9 = vmul.f32 %v3436_v3, %v3436_v3  ;;  %v458_v16 = vmul.f32 0.0078125, %v439_v6  ;;  %v488_v10 = vmul.f32 %v3439_v4, %v3439_v4 }
 0x16b   : > { %2528 = vmatpush3.bf16.msra.mxu1 %v2752_v43 }
 0x16c   : > { %511 = vadd.xlane.f32.xlu1 %v486_v2  ;;  %513 = vadd.xlane.f32.xlu0 %v487_v9  ;;  %v3446_v11 = vsub.f32 %v3376_v12, %v457_v8  ;;  %v3449_v17 = vsub.f32 %v3379_v13, %v458_v16 }
 0x16d   : > { %v441_v20 = vpop.xlane.xlu0 %440  ;;  %v443_v21 = vpop.xlane.xlu1 %442  ;;  %2529 = vmatprep.subr.bf16.mxu1 %v2754_v45 }
 0x16e   : > { %v459_v23 = vmul.f32 0.0078125, %v441_v20  ;;  %v489_v26 = vmul.f32 %v3446_v11, %v3446_v11  ;;  %v460_v27 = vmul.f32 0.0078125, %v443_v21  ;;  %v490_v12 = vmul.f32 %v3449_v17, %v3449_v17 }
 0x16f   : > { %2530 = vmatpush3.bf16.msra.mxu1 %v2754_v45 }
 0x170   : > { %515 = vadd.xlane.f32.xlu1 %v488_v10  ;;  %517 = vadd.xlane.f32.xlu0 %v489_v26  ;;  %v3456_v13 = vsub.f32 %v3384_v14, %v459_v23  ;;  %v3459_v28 = vsub.f32 %v3387_v15, %v460_v27  ;;  %v2742_v14 = vld [vmem:[#allocation8 + $0x7c] ss:$12 sps:$4 sm:$0xff]   ;;  %v2746_v15 = vld [vmem:[#allocation8 + $0x94] ss:$12 sps:$4 sm:$0xff]  }
 0x171   : > { %828 = vmatprep.subr.bf16.mxu0 %v2742_v14 }
 0x172   : > { %v491_v34 = vmul.f32 %v3456_v13, %v3456_v13  ;;  %v492_v35 = vmul.f32 %v3459_v28, %v3459_v28  ;;  %829 = vmatpush1.bf16.msra.mxu0 %v2745_v37 }
 0x173   : > { %830 = vmatprep.subr.bf16.mxu0 %v2746_v15 }
 0x174   : > { %519 = vadd.xlane.f32.xlu1 %v490_v12  ;;  %521 = vadd.xlane.f32.xlu0 %v491_v34 }
 0x176   : > { %831 = vmatpush1.bf16.msra.mxu0 %v2749_v39 }
 0x177   : > { %832 = vmatprep.subr.bf16.mxu0 %v2750_v42 }
 0x178   : > { %523 = vadd.xlane.f32.xlu1 %v492_v35 }
 0x17a   : > { %833 = vmatpush1.bf16.msra.mxu0 %v2753_v44 }
 0x1e5   : > { %v494_v47 = vpop.xlane.xlu0 %493 }
 0x1e6   : > { %v525_v50 = vmul.f32 0.0078125, %v494_v47 }
 0x1e8   : > { %v541_v51 = vadd.f32 1e-05, %v525_v50 }
 0x1e9   : > { %v496_v52 = vpop.xlane.xlu1 %495  ;;  %v498_v53 = vpop.xlane.xlu0 %497 }
 0x1ea   : > { %2755 = vrsqrt.f32 %v541_v51  ;;  %v526_v54 = vmul.f32 0.0078125, %v496_v52  ;;  %v527_v55 = vmul.f32 0.0078125, %v498_v53 }
 0x1ec   : > { %v542_v58 = vadd.f32 1e-05, %v526_v54  ;;  %v543_v59 = vadd.f32 1e-05, %v527_v55 }
 0x1ed   : > { %v500_v60 = vpop.xlane.xlu1 %499  ;;  %v502_v61 = vpop.xlane.xlu0 %501 }
 0x1ee   : > { %2757 = vrsqrt.f32 %v542_v58  ;;  %v528_v62 = vmul.f32 0.0078125, %v500_v60  ;;  %v529_v63 = vmul.f32 0.0078125, %v502_v61 }
 0x1ef   : > { %2759 = vrsqrt.f32 %v543_v59 }
 0x1f0   : > { %v544_v0 = vadd.f32 1e-05, %v528_v62  ;;  %v545_v1 = vadd.f32 1e-05, %v529_v63 }
 0x1f1   : > { %v504_v2 = vpop.xlane.xlu1 %503  ;;  %v506_v5 = vpop.xlane.xlu0 %505 }
 0x1f2   : > { %2761 = vrsqrt.f32 %v544_v0  ;;  %v530_v6 = vmul.f32 0.0078125, %v504_v2  ;;  %v531_v7 = vmul.f32 0.0078125, %v506_v5 }
 0x1f3   : > { %2763 = vrsqrt.f32 %v545_v1 }
 0x1f4   : > { %v2756_v8 = vpop.eup %2755  ;;  %v546_v9 = vadd.f32 1e-05, %v530_v6  ;;  %v547_v16 = vadd.f32 1e-05, %v531_v7 }
 0x1f5   : > { %v508_v10 = vpop.xlane.xlu1 %507  ;;  %v510_v18 = vpop.xlane.xlu0 %509  ;;  %v573_v19 = vmul.f32 %v2756_v8, %v3391_v24  ;;  %v3471_v24 = vld [vmem:[#allocation7] ss:$0 sm:$0xff] }
 0x1f6   : > { %2765 = vrsqrt.f32 %v546_v9  ;;  %v532_v20 = vmul.f32 0.0078125, %v508_v10  ;;  %v533_v21 = vmul.f32 0.0078125, %v510_v18 }
 0x1f7   : > { %2767 = vrsqrt.f32 %v547_v16  ;;  %v595_v34 = vmul.f32 %v3467_v22, %v573_v19 }
 0x1f8   : > { %v2758_v23 = vpop.eup %2757  ;;  %v548_v26 = vadd.f32 1e-05, %v532_v20  ;;  %v549_v27 = vadd.f32 1e-05, %v533_v21 }
 0x1f9   : > { %v2760_v12 = vpop.eup %2759  ;;  %v512_v29 = vpop.xlane.xlu1 %511  ;;  %v574_v31 = vmul.f32 %v2758_v23, %v3399_v32  ;;  %v617_v45 = vadd.f32 %v3471_v24, %v595_v34 }
 0x1fa   : > { %v514_v30 = vpop.xlane.xlu0 %513  ;;  %2769 = vrsqrt.f32 %v548_v26  ;;  %v534_v35 = vmul.f32 0.0078125, %v512_v29  ;;  %v575_v36 = vmul.f32 %v2760_v12, %v3393_v25 }
 0x1fb   : > { %v535_v14 = vmul.f32 0.0078125, %v514_v30  ;;  %2771 = vrsqrt.f32 %v549_v27  ;;  %v596_v37 = vmul.f32 %v3467_v22, %v574_v31 }
 0x1fc   : > { %v2762_v15 = vpop.eup %2761  ;;  %v550_v38 = vadd.f32 1e-05, %v534_v35  ;;  %v597_v42 = vmul.f32 %v3467_v22, %v575_v36 }
 0x1fd   : > { %v551_v39 = vadd.f32 1e-05, %v535_v14  ;;  %v2764_v43 = vpop.eup %2763  ;;  %v516_v44 = vpop.xlane.xlu1 %515  ;;  %v618_v47 = vadd.f32 %v3471_v24, %v596_v37  ;;  %v576_v50 = vmul.f32 %v2762_v15, %v3401_v33 }
 0x1fe   : > { %v518_v32 = vpop.xlane.xlu0 %517  ;;  %2773 = vrsqrt.f32 %v550_v38  ;;  %v536_v51 = vmul.f32 0.0078125, %v516_v44  ;;  %v577_v54 = vmul.f32 %v2764_v43, %v3407_v40  ;;  %v619_v60 = vadd.f32 %v3471_v24, %v597_v42 }
 0x1ff   : > { %v537_v25 = vmul.f32 0.0078125, %v518_v32  ;;  %2775 = vrsqrt.f32 %v551_v39  ;;  %v633_v52 = vpack.c.bf16 %v618_v47, %v617_v45  ;;  %v598_v53 = vmul.f32 %v3467_v22, %v576_v50 }
 0x200   : > { %v2766_v55 = vpop.eup %2765  ;;  %v552_v58 = vadd.f32 1e-05, %v536_v51  ;;  %v599_v1 = vmul.f32 %v3467_v22, %v577_v54 }
 0x201   : > { %v553_v59 = vadd.f32 1e-05, %v537_v25  ;;  %v2768_v61 = vpop.eup %2767  ;;  %v520_v62 = vpop.xlane.xlu1 %519  ;;  %851 = vmatmul.mubr.bf16.vlgmr.msra.gmra.mrb[0].mxu0 %v633_v52  ;;  %2531 = vmatprep.mubr.bf16.mxu1 %v633_v52  ;;  %v620_v33 = vadd.f32 %v3471_v24, %v598_v53  ;;  %v578_v0 = vmul.f32 %v2766_v55, %v3409_v41 }
 0x202   : > { %v522_v63 = vpop.xlane.xlu0 %521  ;;  %2777 = vrsqrt.f32 %v552_v58  ;;  %v538_v2 = vmul.f32 0.0078125, %v520_v62  ;;  %860 = vmatprep.mubr.bf16.mxu0 %v3022_v46  ;;  %v579_v40 = vmul.f32 %v2768_v61, %v3416_v48  ;;  %v621_v19 = vadd.f32 %v3471_v24, %v599_v1 }
 0x203   : > { %v539_v5 = vmul.f32 0.0078125, %v522_v63  ;;  %2779 = vrsqrt.f32 %v553_v59  ;;  %v634_v6 = vpack.c.bf16 %v620_v33, %v619_v60  ;;  %v600_v7 = vmul.f32 %v3467_v22, %v578_v0  ;;  %v673_v33 = vld [vmem:[#allocation10] sm:$0x7] }
 0x204   : > { %v2770_v8 = vpop.eup %2769  ;;  %v554_v9 = vadd.f32 1e-05, %v538_v2  ;;  %v601_v10 = vmul.f32 %v3467_v22, %v579_v40 }
 0x205   : > { %v555_v16 = vadd.f32 1e-05, %v539_v5  ;;  %v2772_v18 = vpop.eup %2771  ;;  %v524_v41 = vpop.xlane.xlu1 %523  ;;  %2532 = vmatmul.mubr.bf16.vlgmr.msra.gmra.mrb[0].mxu1 %v634_v6  ;;  %v622_v20 = vadd.f32 %v3471_v24, %v600_v7  ;;  %v580_v21 = vmul.f32 %v2770_v8, %v3419_v49 }
 0x206   : > { %2781 = vrsqrt.f32 %v554_v9  ;;  %v540_v48 = vmul.f32 0.0078125, %v524_v41  ;;  %v581_v23 = vmul.f32 %v2772_v18, %v3426_v56  ;;  %v623_v30 = vadd.f32 %v3471_v24, %v601_v10 }
 0x207   : > { %2783 = vrsqrt.f32 %v555_v16  ;;  %v635_v26 = vpack.c.bf16 %v622_v20, %v621_v19  ;;  %v602_v27 = vmul.f32 %v3467_v22, %v580_v21 }
 0x208   : > { %v2774_v12 = vpop.eup %2773  ;;  %v556_v29 = vadd.f32 1e-05, %v540_v48  ;;  %v603_v49 = vmul.f32 %v3467_v22, %v581_v23 }
 0x209   : > { %v2776_v31 = vpop.eup %2775  ;;  %861 = vmatmul.mubr.bf16.gmra.mrb[4].mxu0 %v634_v6  ;;  %2535 = vmatprep.mubr.bf16.mxu1 %v635_v26  ;;  %v624_v34 = vadd.f32 %v3471_v24, %v602_v27  ;;  %v582_v35 = vmul.f32 %v2774_v12, %v3429_v57 }
 0x20a   : > { %2785 = vrsqrt.f32 %v556_v29  ;;  %870 = vmatprep.mubr.bf16.mxu0 %v3022_v46  ;;  %v583_v56 = vmul.f32 %v2776_v31, %v3436_v3  ;;  %v625_v39 = vadd.f32 %v3471_v24, %v603_v49 }
 0x20b   : > { %v636_v14 = vpack.c.bf16 %v624_v34, %v623_v30  ;;  %v604_v36 = vmul.f32 %v3467_v22, %v582_v35 }
 0x20c   : > { %v2778_v37 = vpop.eup %2777  ;;  %v605_v15 = vmul.f32 %v3467_v22, %v583_v56 }
 0x20d   : > { %v2780_v38 = vpop.eup %2779  ;;  %2536 = vmatmul.mubr.bf16.gmra.mrb[4].mxu1 %v636_v14  ;;  %v626_v42 = vadd.f32 %v3471_v24, %v604_v36  ;;  %v584_v57 = vmul.f32 %v2778_v37, %v3439_v4 }
 0x20e   : > { %v585_v43 = vmul.f32 %v2780_v38, %v3446_v11  ;;  %v627_v45 = vadd.f32 %v3471_v24, %v605_v15 }
 0x20f   : > { %v637_v44 = vpack.c.bf16 %v626_v42, %v625_v39  ;;  %v606_v32 = vmul.f32 %v3467_v22, %v584_v57 }
 0x210   : > { %v2782_v3 = vpop.eup %2781  ;;  %v607_v25 = vmul.f32 %v3467_v22, %v585_v43 }
 0x211   : > { %v2784_v47 = vpop.eup %2783  ;;  %871 = vmatmul.mubr.bf16.gmra.mrb[8].mxu0 %v635_v26  ;;  %2539 = vmatprep.mubr.bf16.mxu1 %v637_v44  ;;  %v628_v50 = vadd.f32 %v3471_v24, %v606_v32  ;;  %v586_v51 = vmul.f32 %v2782_v3, %v3449_v17 }
 0x212   : > { %880 = vmatprep.mubr.bf16.mxu0 %v3022_v46  ;;  %v587_v4 = vmul.f32 %v2784_v47, %v3456_v13  ;;  %v629_v54 = vadd.f32 %v3471_v24, %v607_v25 }
 0x213   : > { %v638_v11 = vpack.c.bf16 %v628_v50, %v627_v45  ;;  %v608_v52 = vmul.f32 %v3467_v22, %v586_v51 }
 0x214   : > { %v2786_v53 = vpop.eup %2785  ;;  %v609_v59 = vmul.f32 %v3467_v22, %v587_v4 }
 0x215   : > { %2540 = vmatmul.mubr.bf16.gmra.mrb[8].mxu1 %v638_v11  ;;  %v630_v55 = vadd.f32 %v3471_v24, %v608_v52  ;;  %v588_v58 = vmul.f32 %v2786_v53, %v3459_v28  ;;  %v675_v28 = vlaneseq }
 0x216   : > { %v631_v13 = vadd.f32 %v3471_v24, %v609_v59 }
 0x217   : > { %v639_v17 = vpack.c.bf16 %v630_v55, %v629_v54  ;;  %v610_v60 = vmul.f32 %v3467_v22, %v588_v58  ;;  %v676_v22 = vshrl.u32 %v675_v28, 7 }
 0x219   : > { %881 = vmatmul.mubr.bf16.gmra.mrb[12].mxu0 %v636_v14  ;;  %2543 = vmatprep.mubr.bf16.mxu1 %v639_v17  ;;  %v632_v61 = vadd.f32 %v3471_v24, %v610_v60  ;;  %v677_v63 = vsub.s32 0, %v676_v22  ;;  %v681_v24 = vsub.s32 1, %v676_v22  ;;  %v685_v1 = vsub.s32 2, %v676_v22 }
 0x21a   : > { %890 = vmatprep.mubr.bf16.mxu0 %v3022_v46 }
 0x21b   : > { %v640_v62 = vpack.c.bf16 %v632_v61, %v631_v13  ;;  %v3525_v0 = vrot.slane %v673_v33, %v677_v63  ;;  %v3527_v2 = vrot.slane %v673_v33, %v681_v24  ;;  %v3533_v7 = vrot.slane %v673_v33, %v685_v1 }
 0x21d   : > { %2544 = vmatmul.mubr.bf16.gmra.mrb[12].mxu1 %v640_v62 }
 0x221   : > { %891 = vmatmul.mubr.bf16.gmra.mrb[16].mxu0 %v637_v44 }
 0x222   : > { %900 = vmatprep.mubr.bf16.mxu0 %v3022_v46 }
 0x229   : > { %901 = vmatmul.mubr.bf16.gmra.mrb[20].mxu0 %v638_v11 }
 0x22a   : > { %910 = vmatprep.mubr.bf16.mxu0 %v3022_v46 }
 0x231   : > { %911 = vmatmul.mubr.bf16.gmra.mrb[24].mxu0 %v639_v17 }
 0x232   : > { %920 = vmatprep.mubr.bf16.mxu0 %v3022_v46 }
 0x239   : > { %921 = vmatmul.mubr.bf16.gmra.mrb[28].mxu0 %v640_v62 }
 0x2d4   : > { %v852_v5 = vpop.f32.mrb[0].mxu0 }
 0x2d5   : > { %v853_v40 = vadd.f32 %v852_v5, %v3525_v0  ;;  %v854_v6 = vpop.f32.mrb[1].mxu0 }
 0x2d6   : > { %v855_v46 = vadd.f32 %v854_v6, %v3527_v2  ;;  %v856_v8 = vpop.f32.mrb[2].mxu0 }
 0x2d7   : > { %v2451_v9 = vpack.c.bf16 %v853_v40, %v853_v40  ;;  %v857_v16 = vadd.f32 %v856_v8, %v3525_v0  ;;  %v858_v10 = vpop.f32.mrb[3].mxu0 }
 0x2d8   : > { %v3537_v18 = vpack.c.bf16 %v855_v46, %v855_v46  ;;  %v859_v41 = vadd.f32 %v858_v10, %v3527_v2  ;;  %v2533_v19 = vpop.f32.mrb[0].mxu1 }
 0x2d9   : > { %1109 = vst.msk [vmem:[%s3541_s11] sm:$0xf] %vm1108_vm0, %v2451_v9  ;;  %v2452_v20 = vpack.c.bf16 %v857_v16, %v857_v16  ;;  %v974_v21 = vadd.f32 %v2533_v19, %v3533_v7  ;;  %1269 = vrot.lane.b32.xlu0 %v2451_v9, %s3023_s13  ;;  %v965_v48 = vpop.f32.mrb[1].mxu1 }
 0x2da   : > { %1181 = vst.msk [vmem:[%s3548_s24] sm:$0xf] %vm1108_vm0, %v3537_v18  ;;  %v3553_v23 = vpack.c.bf16 %v859_v41, %v859_v41  ;;  %v966_v26 = vadd.f32 %v965_v48, %v3533_v7  ;;  %v2534_v27 = vpop.f32.mrb[2].mxu1 }
 0x2db   : > { %1110 = vst.msk [vmem:[%s3541_s11 + $0x4] sm:$0xf] %vm1108_vm0, %v2452_v20  ;;  %v3558_v12 = vpack.c.bf16 %v974_v21, %v974_v21  ;;  %v977_v29 = vadd.f32 %v2534_v27, %v3533_v7  ;;  %1271 = vrot.lane.b32.xlu1 %v2452_v20, %s3023_s13  ;;  %v968_v30 = vpop.f32.mrb[3].mxu1 }
 0x2dc   : > { %1182 = vst.msk [vmem:[%s3548_s24 + $0x4] sm:$0xf] %vm1108_vm0, %v3553_v23  ;;  %v3565_v31 = vpack.c.bf16 %v966_v26, %v966_v26  ;;  %v969_v34 = vadd.f32 %v968_v30, %v3533_v7  ;;  %v862_v35 = vpop.f32.mrb[4].mxu0 }
 0x2dd   : > { %1255 = vst.msk [vmem:[%s3569_s12 + $0x8] sm:$0xf] %vm1108_vm0, %v3558_v12  ;;  %v3574_v49 = vpack.c.bf16 %v977_v29, %v977_v29  ;;  %v863_v56 = vadd.f32 %v862_v35, %v3525_v0  ;;  %1464 = vrot.lane.b32.xlu0 %v2451_v9, %s3024_s18  ;;  %v864_v14 = vpop.f32.mrb[5].mxu0 }
 0x2de   : > { %1253 = vst.msk [vmem:[%s3569_s12] sm:$0xf] %vm1108_vm0, %v3565_v31  ;;  %v3581_v36 = vpack.c.bf16 %v969_v34, %v969_v34  ;;  %v865_v37 = vadd.f32 %v864_v14, %v3527_v2  ;;  %v866_v15 = vpop.f32.mrb[6].mxu0 }
 0x2df   : > { %1256 = vst.msk [vmem:[%s3569_s12 + $0xc] sm:$0xf] %vm1108_vm0, %v3574_v49  ;;  %v3587_v38 = vpack.c.bf16 %v863_v56, %v863_v56  ;;  %v867_v39 = vadd.f32 %v866_v15, %v3525_v0  ;;  %1466 = vrot.lane.b32.xlu1 %v2452_v20, %s3024_s18  ;;  %v868_v42 = vpop.f32.mrb[7].mxu0 }
 0x2e0   : > { %1254 = vst.msk [vmem:[%s3569_s12 + $0x4] sm:$0xf] %vm1108_vm0, %v3581_v36  ;;  %v3594_v57 = vpack.c.bf16 %v865_v37, %v865_v37  ;;  %v869_v43 = vadd.f32 %v868_v42, %v3527_v2  ;;  %v2537_v44 = vpop.f32.mrb[4].mxu1 }
 0x2e1   : > { %1111 = vst.msk [vmem:[%s3541_s11 + $0x8] sm:$0xf] %vm1108_vm0, %v3587_v38  ;;  %v3600_v32 = vpack.c.bf16 %v867_v39, %v867_v39  ;;  %v990_v3 = vadd.f32 %v2537_v44, %v3533_v7  ;;  %1659 = vrot.lane.b32.xlu0 %v2451_v9, %s3025_s23  ;;  %v981_v45 = vpop.f32.mrb[5].mxu1 }
 0x2e2   : > { %1183 = vst.msk [vmem:[%s3548_s24 + $0x8] sm:$0xf] %vm1108_vm0, %v3594_v57  ;;  %v3607_v47 = vpack.c.bf16 %v869_v43, %v869_v43  ;;  %v982_v50 = vadd.f32 %v981_v45, %v3533_v7  ;;  %v2538_v51 = vpop.f32.mrb[6].mxu1 }
 0x2e3   : > { %1112 = vst.msk [vmem:[%s3541_s11 + $0xc] sm:$0xf] %vm1108_vm0, %v3600_v32  ;;  %v3613_v25 = vpack.c.bf16 %v990_v3, %v990_v3  ;;  %v993_v4 = vadd.f32 %v2538_v51, %v3533_v7  ;;  %1661 = vrot.lane.b32.xlu1 %v2452_v20, %s3025_s23  ;;  %v984_v11 = vpop.f32.mrb[7].mxu1 }
 0x2e4   : > { %1184 = vst.msk [vmem:[%s3548_s24 + $0xc] sm:$0xf] %vm1108_vm0, %v3607_v47  ;;  %v3620_v52 = vpack.c.bf16 %v982_v50, %v982_v50  ;;  %v985_v53 = vadd.f32 %v984_v11, %v3533_v7  ;;  %v872_v54 = vpop.f32.mrb[8].mxu0 }
 0x2e5   : > { %1259 = vst.msk [vmem:[%s3569_s12 + $0x18] sm:$0xf] %vm1108_vm0, %v3613_v25  ;;  %v3626_v55 = vpack.c.bf16 %v993_v4, %v993_v4  ;;  %v873_v58 = vadd.f32 %v872_v54, %v3525_v0  ;;  %1334 = vrot.lane.b32.xlu0 %v3537_v18, %s3023_s13  ;;  %v874_v59 = vpop.f32.mrb[9].mxu0 }
 0x2e6   : > { %1257 = vst.msk [vmem:[%s3569_s12 + $0x10] sm:$0xf] %vm1108_vm0, %v3620_v52  ;;  %v3634_v17 = vpack.c.bf16 %v985_v53, %v985_v53  ;;  %v875_v60 = vadd.f32 %v874_v59, %v3527_v2  ;;  %v876_v13 = vpop.f32.mrb[10].mxu0 }
 0x2e7   : > { %1260 = vst.msk [vmem:[%s3569_s12 + $0x1c] sm:$0xf] %vm1108_vm0, %v3626_v55  ;;  %v3640_v61 = vpack.c.bf16 %v873_v58, %v873_v58  ;;  %v877_v62 = vadd.f32 %v876_v13, %v3525_v0  ;;  %1336 = vrot.lane.b32.xlu1 %v3553_v23, %s3023_s13  ;;  %v878_v28 = vpop.f32.mrb[11].mxu0 }
 0x2e8   : > { %1258 = vst.msk [vmem:[%s3569_s12 + $0x14] sm:$0xf] %vm1108_vm0, %v3634_v17  ;;  %v3648_v22 = vpack.c.bf16 %v875_v60, %v875_v60  ;;  %v879_v63 = vadd.f32 %v878_v28, %v3527_v2  ;;  %v2541_v33 = vpop.f32.mrb[8].mxu1 }
 0x2e9   : > { %1113 = vst.msk [vmem:[%s3541_s11 + $0x10] sm:$0xf] %vm1108_vm0, %v3640_v61  ;;  %v3654_v24 = vpack.c.bf16 %v877_v62, %v877_v62  ;;  %v1006_v1 = vadd.f32 %v2541_v33, %v3533_v7  ;;  %1403 = vrot.lane.b32.xlu0 %v3558_v12, %s3023_s13  ;;  %v997_v5 = vpop.f32.mrb[9].mxu1 }
 0x2ea   : > { %1185 = vst.msk [vmem:[%s3548_s24 + $0x10] sm:$0xf] %vm1108_vm0, %v3648_v22  ;;  %v3662_v40 = vpack.c.bf16 %v879_v63, %v879_v63  ;;  %v998_v6 = vadd.f32 %v997_v5, %v3533_v7  ;;  %v2542_v46 = vpop.f32.mrb[10].mxu1 }
 0x2eb   : > { %1114 = vst.msk [vmem:[%s3541_s11 + $0x14] sm:$0xf] %vm1108_vm0, %v3654_v24  ;;  %v3668_v8 = vpack.c.bf16 %v1006_v1, %v1006_v1  ;;  %v1009_v9 = vadd.f32 %v2542_v46, %v3533_v7  ;;  %1405 = vrot.lane.b32.xlu1 %v3574_v49, %s3023_s13  ;;  %v1000_v16 = vpop.f32.mrb[11].mxu1 }
 0x2ec   : > { %1186 = vst.msk [vmem:[%s3548_s24 + $0x14] sm:$0xf] %vm1108_vm0, %v3662_v40  ;;  %v3676_v10 = vpack.c.bf16 %v998_v6, %v998_v6  ;;  %v1001_v41 = vadd.f32 %v1000_v16, %v3533_v7  ;;  %v882_v19 = vpop.f32.mrb[12].mxu0 }
 0x2ed   : > { %1263 = vst.msk [vmem:[%s3569_s12 + $0x28] sm:$0xf] %vm1108_vm0, %v3668_v8  ;;  %v3682_v20 = vpack.c.bf16 %v1009_v9, %v1009_v9  ;;  %v883_v21 = vadd.f32 %v882_v19, %v3525_v0  ;;  %1529 = vrot.lane.b32.xlu0 %v3537_v18, %s3024_s18  ;;  %v884_v48 = vpop.f32.mrb[13].mxu0 }
 0x2ee   : > { %1261 = vst.msk [vmem:[%s3569_s12 + $0x20] sm:$0xf] %vm1108_vm0, %v3676_v10  ;;  %v3690_v26 = vpack.c.bf16 %v1001_v41, %v1001_v41  ;;  %v885_v27 = vadd.f32 %v884_v48, %v3527_v2  ;;  %v886_v29 = vpop.f32.mrb[14].mxu0 }
 0x2ef   : > { %1264 = vst.msk [vmem:[%s3569_s12 + $0x2c] sm:$0xf] %vm1108_vm0, %v3682_v20  ;;  %v3696_v30 = vpack.c.bf16 %v883_v21, %v883_v21  ;;  %v887_v34 = vadd.f32 %v886_v29, %v3525_v0  ;;  %1531 = vrot.lane.b32.xlu1 %v3553_v23, %s3024_s18  ;;  %v888_v35 = vpop.f32.mrb[15].mxu0 }
 0x2f0   : > { %1262 = vst.msk [vmem:[%s3569_s12 + $0x24] sm:$0xf] %vm1108_vm0, %v3690_v26  ;;  %v3704_v56 = vpack.c.bf16 %v885_v27, %v885_v27  ;;  %v889_v14 = vadd.f32 %v888_v35, %v3527_v2  ;;  %v2545_v37 = vpop.f32.mrb[12].mxu1 }
 0x2f1   : > { %1115 = vst.msk [vmem:[%s3541_s11 + $0x18] sm:$0xf] %vm1108_vm0, %v3696_v30  ;;  %v3710_v15 = vpack.c.bf16 %v887_v34, %v887_v34  ;;  %v1022_v39 = vadd.f32 %v2545_v37, %v3533_v7  ;;  %1598 = vrot.lane.b32.xlu0 %v3558_v12, %s3024_s18  ;;  %v1013_v42 = vpop.f32.mrb[13].mxu1 }
 0x2f2   : > { %1187 = vst.msk [vmem:[%s3548_s24 + $0x18] sm:$0xf] %vm1108_vm0, %v3704_v56  ;;  %v3718_v43 = vpack.c.bf16 %v889_v14, %v889_v14  ;;  %v1014_v44 = vadd.f32 %v1013_v42, %v3533_v7  ;;  %v2546_v3 = vpop.f32.mrb[14].mxu1 }
 0x2f3   : > { %1116 = vst.msk [vmem:[%s3541_s11 + $0x1c] sm:$0xf] %vm1108_vm0, %v3710_v15  ;;  %v3724_v45 = vpack.c.bf16 %v1022_v39, %v1022_v39  ;;  %v1025_v50 = vadd.f32 %v2546_v3, %v3533_v7  ;;  %1600 = vrot.lane.b32.xlu1 %v3574_v49, %s3024_s18  ;;  %v1016_v51 = vpop.f32.mrb[15].mxu1 }
 0x2f4   : > { %1188 = vst.msk [vmem:[%s3548_s24 + $0x1c] sm:$0xf] %vm1108_vm0, %v3718_v43  ;;  %v3732_v4 = vpack.c.bf16 %v1014_v44, %v1014_v44  ;;  %v1017_v11 = vadd.f32 %v1016_v51, %v3533_v7  ;;  %v892_v53 = vpop.f32.mrb[16].mxu0 }
 0x2f5   : > { %1267 = vst.msk [vmem:[%s3569_s12 + $0x38] sm:$0xf] %vm1108_vm0, %v3724_v45  ;;  %v3738_v54 = vpack.c.bf16 %v1025_v50, %v1025_v50  ;;  %v893_v58 = vadd.f32 %v892_v53, %v3525_v0  ;;  %1724 = vrot.lane.b32.xlu0 %v3537_v18, %s3025_s23  ;;  %v894_v59 = vpop.f32.mrb[17].mxu0 }
 0x2f6   : > { %1265 = vst.msk [vmem:[%s3569_s12 + $0x30] sm:$0xf] %vm1108_vm0, %v3732_v4  ;;  %v3746_v60 = vpack.c.bf16 %v1017_v11, %v1017_v11  ;;  %v895_v7 = vadd.f32 %v894_v59, %v3527_v2  ;;  %v896_v13 = vpop.f32.mrb[18].mxu0 }
 0x2f7   : > { %1268 = vst.msk [vmem:[%s3569_s12 + $0x3c] sm:$0xf] %vm1108_vm0, %v3738_v54  ;;  %v3752_v62 = vpack.c.bf16 %v893_v58, %v893_v58  ;;  %v897_v28 = vadd.f32 %v896_v13, %v3525_v0  ;;  %1726 = vrot.lane.b32.xlu1 %v3553_v23, %s3025_s23  ;;  %v898_v18 = vpop.f32.mrb[19].mxu0 }
 0x2f8   : > { %1266 = vst.msk [vmem:[%s3569_s12 + $0x34] sm:$0xf] %vm1108_vm0, %v3746_v60  ;;  %v3760_v63 = vpack.c.bf16 %v895_v7, %v895_v7  ;;  %v899_v33 = vadd.f32 %v898_v18, %v3527_v2 }
 0x2f9   : > { %1117 = vst.msk [vmem:[%s3541_s11 + $0x20] sm:$0xf] %vm1108_vm0, %v3752_v62  ;;  %v3766_v1 = vpack.c.bf16 %v897_v28, %v897_v28  ;;  %1793 = vrot.lane.b32.xlu0 %v3558_v12, %s3025_s23 }
 0x2fa   : > { %1189 = vst.msk [vmem:[%s3548_s24 + $0x20] sm:$0xf] %vm1108_vm0, %v3760_v63  ;;  %v3773_v23 = vpack.c.bf16 %v899_v33, %v899_v33 }
 0x2fb   : > { %1118 = vst.msk [vmem:[%s3541_s11 + $0x24] sm:$0xf] %vm1108_vm0, %v3766_v1  ;;  %1795 = vrot.lane.b32.xlu1 %v3574_v49, %s3025_s23 }
 0x2fc   : > { %1190 = vst.msk [vmem:[%s3548_s24 + $0x24] sm:$0xf] %vm1108_vm0, %v3773_v23  ;;  %v902_v5 = vpop.f32.mrb[20].mxu0 }
 0x2fd   : > { %v903_v6 = vadd.f32 %v902_v5, %v3525_v0  ;;  %1399 = vrot.lane.b32.xlu0 %v3565_v31, %s3023_s13  ;;  %v904_v12 = vpop.f32.mrb[21].mxu0 }
 0x2fe   : > { %v905_v46 = vadd.f32 %v904_v12, %v3527_v2  ;;  %v906_v9 = vpop.f32.mrb[22].mxu0 }
 0x2ff   : > { %v3787_v16 = vpack.c.bf16 %v903_v6, %v903_v6  ;;  %v907_v49 = vadd.f32 %v906_v9, %v3525_v0  ;;  %1401 = vrot.lane.b32.xlu1 %v3581_v36, %s3023_s13  ;;  %v908_v41 = vpop.f32.mrb[23].mxu0 }
 0x300   : > { %v3792_v19 = vpack.c.bf16 %v905_v46, %v905_v46  ;;  %v909_v21 = vadd.f32 %v908_v41, %v3527_v2 }
 0x301   : > { %1119 = vst.msk [vmem:[%s3541_s11 + $0x28] sm:$0xf] %vm1108_vm0, %v3787_v16  ;;  %v3798_v48 = vpack.c.bf16 %v907_v49, %v907_v49  ;;  %1594 = vrot.lane.b32.xlu0 %v3565_v31, %s3024_s18 }
 0x302   : > { %1191 = vst.msk [vmem:[%s3548_s24 + $0x28] sm:$0xf] %vm1108_vm0, %v3792_v19  ;;  %v3805_v27 = vpack.c.bf16 %v909_v21, %v909_v21 }
 0x303   : > { %1120 = vst.msk [vmem:[%s3541_s11 + $0x2c] sm:$0xf] %vm1108_vm0, %v3798_v48  ;;  %1596 = vrot.lane.b32.xlu1 %v3581_v36, %s3024_s18 }
 0x304   : > { %1192 = vst.msk [vmem:[%s3548_s24 + $0x2c] sm:$0xf] %vm1108_vm0, %v3805_v27  ;;  %v912_v29 = vpop.f32.mrb[24].mxu0 }
 0x305   : > { %v913_v34 = vadd.f32 %v912_v29, %v3525_v0  ;;  %1789 = vrot.lane.b32.xlu0 %v3565_v31, %s3025_s23  ;;  %v914_v35 = vpop.f32.mrb[25].mxu0 }
 0x306   : > { %v915_v14 = vadd.f32 %v914_v35, %v3527_v2  ;;  %v916_v37 = vpop.f32.mrb[26].mxu0 }
 0x307   : > { %v3819_v39 = vpack.c.bf16 %v913_v34, %v913_v34  ;;  %v917_v42 = vadd.f32 %v916_v37, %v3525_v0  ;;  %1791 = vrot.lane.b32.xlu1 %v3581_v36, %s3025_s23  ;;  %v918_v44 = vpop.f32.mrb[27].mxu0 }
 0x308   : > { %v3824_v3 = vpack.c.bf16 %v915_v14, %v915_v14  ;;  %v919_v50 = vadd.f32 %v918_v44, %v3527_v2 }
 0x309   : > { %1121 = vst.msk [vmem:[%s3541_s11 + $0x30] sm:$0xf] %vm1108_vm0, %v3819_v39  ;;  %v3830_v31 = vpack.c.bf16 %v917_v42, %v917_v42  ;;  %1468 = vrot.lane.b32.xlu0 %v3587_v38, %s3024_s18 }
 0x30a   : > { %1193 = vst.msk [vmem:[%s3548_s24 + $0x30] sm:$0xf] %vm1108_vm0, %v3824_v3  ;;  %v3837_v51 = vpack.c.bf16 %v919_v50, %v919_v50 }
 0x30b   : > { %1122 = vst.msk [vmem:[%s3541_s11 + $0x34] sm:$0xf] %vm1108_vm0, %v3830_v31  ;;  %1273 = vrot.lane.b32.xlu1 %v3587_v38, %s3023_s13 }
 0x30c   : > { %1194 = vst.msk [vmem:[%s3548_s24 + $0x34] sm:$0xf] %vm1108_vm0, %v3837_v51  ;;  %v922_v36 = vpop.f32.mrb[28].mxu0 }
 0x30d   : > { %v923_v11 = vadd.f32 %v922_v36, %v3525_v0  ;;  %1663 = vrot.lane.b32.xlu0 %v3587_v38, %s3025_s23  ;;  %v924_v53 = vpop.f32.mrb[29].mxu0 }
 0x30e   : > { %v925_v58 = vadd.f32 %v924_v53, %v3527_v2  ;;  %v926_v59 = vpop.f32.mrb[30].mxu0 }
 0x30f   : > { %v3851_v7 = vpack.c.bf16 %v923_v11, %v923_v11  ;;  %v927_v13 = vadd.f32 %v926_v59, %v3525_v0  ;;  %1275 = vrot.lane.b32.xlu1 %v3600_v32, %s3023_s13  ;;  %v928_v28 = vpop.f32.mrb[31].mxu0 }
 0x310   : > { %v3856_v18 = vpack.c.bf16 %v925_v58, %v925_v58  ;;  %v929_v33 = vadd.f32 %v928_v28, %v3527_v2 }
 0x311   : > { %1123 = vst.msk [vmem:[%s3541_s11 + $0x38] sm:$0xf] %vm1108_vm0, %v3851_v7  ;;  %v3862_v38 = vpack.c.bf16 %v927_v13, %v927_v13  ;;  %1338 = vrot.lane.b32.xlu0 %v3594_v57, %s3023_s13 }
 0x312   : > { %1195 = vst.msk [vmem:[%s3548_s24 + $0x38] sm:$0xf] %vm1108_vm0, %v3856_v18  ;;  %v3869_v0 = vpack.c.bf16 %v929_v33, %v929_v33 }
 0x313   : > { %1124 = vst.msk [vmem:[%s3541_s11 + $0x3c] sm:$0xf] %vm1108_vm0, %v3862_v38  ;;  %1470 = vrot.lane.b32.xlu1 %v3600_v32, %s3024_s18 }
 0x314   : > { %1196 = vst.msk [vmem:[%s3548_s24 + $0x3c] sm:$0xf] %vm1108_vm0, %v3869_v0 }
 0x315   : > { %1411 = vrot.lane.b32.xlu0 %v3613_v25, %s3023_s13 }
 0x317   : > { %1665 = vrot.lane.b32.xlu1 %v3600_v32, %s3025_s23 }
 0x319   : > { %1533 = vrot.lane.b32.xlu0 %v3594_v57, %s3024_s18 }
 0x31b   : > { %1340 = vrot.lane.b32.xlu1 %v3607_v47, %s3023_s13 }
 0x31d   : > { %1606 = vrot.lane.b32.xlu0 %v3613_v25, %s3024_s18 }
 0x31f   : > { %1413 = vrot.lane.b32.xlu1 %v3626_v55, %s3023_s13 }
 0x321   : > { %1728 = vrot.lane.b32.xlu0 %v3594_v57, %s3025_s23 }
 0x323   : > { %1535 = vrot.lane.b32.xlu1 %v3607_v47, %s3024_s18 }
 0x325   : > { %1801 = vrot.lane.b32.xlu0 %v3613_v25, %s3025_s23 }
 0x327   : > { %1608 = vrot.lane.b32.xlu1 %v3626_v55, %s3024_s18 }
 0x329   : > { %1407 = vrot.lane.b32.xlu0 %v3620_v52, %s3023_s13 }
 0x32b   : > { %1730 = vrot.lane.b32.xlu1 %v3607_v47, %s3025_s23 }
 0x32d   : > { %1602 = vrot.lane.b32.xlu0 %v3620_v52, %s3024_s18 }
 0x32f   : > { %1803 = vrot.lane.b32.xlu1 %v3626_v55, %s3025_s23 }
 0x331   : > { %1797 = vrot.lane.b32.xlu0 %v3620_v52, %s3025_s23 }
 0x333   : > { %1409 = vrot.lane.b32.xlu1 %v3634_v17, %s3023_s13 }
 0x335   : > { %1277 = vrot.lane.b32.xlu0 %v3640_v61, %s3023_s13 }
 0x337   : > { %1604 = vrot.lane.b32.xlu1 %v3634_v17, %s3024_s18 }
 0x339   : > { %1472 = vrot.lane.b32.xlu0 %v3640_v61, %s3024_s18 }
 0x33b   : > { %1799 = vrot.lane.b32.xlu1 %v3634_v17, %s3025_s23 }
 0x33d   : > { %1667 = vrot.lane.b32.xlu0 %v3640_v61, %s3025_s23 }
 0x33f   : > { %1279 = vrot.lane.b32.xlu1 %v3654_v24, %s3023_s13 }
 0x341   : > { %1342 = vrot.lane.b32.xlu0 %v3648_v22, %s3023_s13 }
 0x343   : > { %1474 = vrot.lane.b32.xlu1 %v3654_v24, %s3024_s18 }
 0x345   : > { %1419 = vrot.lane.b32.xlu0 %v3668_v8, %s3023_s13 }
 0x347   : > { %1669 = vrot.lane.b32.xlu1 %v3654_v24, %s3025_s23 }
 0x349   : > { %1537 = vrot.lane.b32.xlu0 %v3648_v22, %s3024_s18 }
 0x34b   : > { %1344 = vrot.lane.b32.xlu1 %v3662_v40, %s3023_s13  ;;  %v1270_v2 = vpop.permute.xlu0 %1269 }
 0x34c   : > { %2293 = vst.msk [vmem:[%s3541_s11 + $0x40] sm:$0xf] %vm1108_vm0, %v1270_v2 }
 0x34d   : > { %v1272_v57 = vpop.permute.xlu1 %1271  ;;  %1614 = vrot.lane.b32.xlu0 %v3668_v8, %s3024_s18 }
 0x34e   : > { %2294 = vst.msk [vmem:[%s3541_s11 + $0x44] sm:$0xf] %vm1108_vm0, %v1272_v57 }
 0x34f   : > { %1421 = vrot.lane.b32.xlu1 %v3682_v20, %s3023_s13  ;;  %v1465_v32 = vpop.permute.xlu0 %1464 }
 0x350   : > { %2341 = vst.msk [vmem:[%s3541_s11 + $0x80] sm:$0xf] %vm1108_vm0, %v1465_v32 }
 0x351   : > { %v1467_v47 = vpop.permute.xlu1 %1466  ;;  %1732 = vrot.lane.b32.xlu0 %v3648_v22, %s3025_s23 }
 0x352   : > { %2342 = vst.msk [vmem:[%s3541_s11 + $0x84] sm:$0xf] %vm1108_vm0, %v1467_v47 }
 0x353   : > { %1539 = vrot.lane.b32.xlu1 %v3662_v40, %s3024_s18  ;;  %v1660_v25 = vpop.permute.xlu0 %1659 }
 0x354   : > { %2389 = vst.msk [vmem:[%s3541_s11 + $0xc0] sm:$0xf] %vm1108_vm0, %v1660_v25 }
 0x355   : > { %v1662_v52 = vpop.permute.xlu1 %1661  ;;  %1809 = vrot.lane.b32.xlu0 %v3668_v8, %s3025_s23 }
 0x356   : > { %2390 = vst.msk [vmem:[%s3541_s11 + $0xc4] sm:$0xf] %vm1108_vm0, %v1662_v52 }
 0x357   : > { %1616 = vrot.lane.b32.xlu1 %v3682_v20, %s3024_s18  ;;  %v1335_v55 = vpop.permute.xlu0 %1334 }
 0x358   : > { %2309 = vst.msk [vmem:[%s3548_s24 + $0x40] sm:$0xf] %vm1108_vm0, %v1335_v55 }
 0x359   : > { %v1337_v17 = vpop.permute.xlu1 %1336  ;;  %1415 = vrot.lane.b32.xlu0 %v3676_v10, %s3023_s13 }
 0x35a   : > { %2310 = vst.msk [vmem:[%s3548_s24 + $0x44] sm:$0xf] %vm1108_vm0, %v1337_v17 }
 0x35b   : > { %1734 = vrot.lane.b32.xlu1 %v3662_v40, %s3025_s23  ;;  %v1404_v61 = vpop.permute.xlu0 %1403 }
 0x35c   : > { %2327 = vst.msk [vmem:[%s3569_s12 + $0x48] sm:$0xf] %vm1108_vm0, %v1404_v61 }
 0x35d   : > { %v1406_v22 = vpop.permute.xlu1 %1405  ;;  %1610 = vrot.lane.b32.xlu0 %v3676_v10, %s3024_s18 }
 0x35e   : > { %2328 = vst.msk [vmem:[%s3569_s12 + $0x4c] sm:$0xf] %vm1108_vm0, %v1406_v22 }
 0x35f   : > { %1811 = vrot.lane.b32.xlu1 %v3682_v20, %s3025_s23  ;;  %v1530_v24 = vpop.permute.xlu0 %1529 }
 0x360   : > { %2357 = vst.msk [vmem:[%s3548_s24 + $0x80] sm:$0xf] %vm1108_vm0, %v1530_v24 }
 0x361   : > { %v1532_v8 = vpop.permute.xlu1 %1531  ;;  %1805 = vrot.lane.b32.xlu0 %v3676_v10, %s3025_s23 }
 0x362   : > { %2358 = vst.msk [vmem:[%s3548_s24 + $0x84] sm:$0xf] %vm1108_vm0, %v1532_v8 }
 0x363   : > { %1417 = vrot.lane.b32.xlu1 %v3690_v26, %s3023_s13  ;;  %v1599_v40 = vpop.permute.xlu0 %1598 }
 0x364   : > { %2375 = vst.msk [vmem:[%s3569_s12 + $0x88] sm:$0xf] %vm1108_vm0, %v1599_v40 }
 0x365   : > { %v1601_v5 = vpop.permute.xlu1 %1600  ;;  %1281 = vrot.lane.b32.xlu0 %v3696_v30, %s3023_s13 }
 0x366   : > { %2376 = vst.msk [vmem:[%s3569_s12 + $0x8c] sm:$0xf] %vm1108_vm0, %v1601_v5 }
 0x367   : > { %1612 = vrot.lane.b32.xlu1 %v3690_v26, %s3024_s18  ;;  %v1725_v10 = vpop.permute.xlu0 %1724 }
 0x368   : > { %2405 = vst.msk [vmem:[%s3548_s24 + $0xc0] sm:$0xf] %vm1108_vm0, %v1725_v10 }
 0x369   : > { %v1727_v20 = vpop.permute.xlu1 %1726  ;;  %1476 = vrot.lane.b32.xlu0 %v3696_v30, %s3024_s18 }
 0x36a   : > { %2406 = vst.msk [vmem:[%s3548_s24 + $0xc4] sm:$0xf] %vm1108_vm0, %v1727_v20 }
 0x36b   : > { %1807 = vrot.lane.b32.xlu1 %v3690_v26, %s3025_s23  ;;  %v1794_v6 = vpop.permute.xlu0 %1793 }
 0x36c   : > { %2423 = vst.msk [vmem:[%s3569_s12 + $0xc8] sm:$0xf] %vm1108_vm0, %v1794_v6 }
 0x36d   : > { %v1796_v12 = vpop.permute.xlu1 %1795  ;;  %1671 = vrot.lane.b32.xlu0 %v3696_v30, %s3025_s23 }
 0x36e   : > { %2424 = vst.msk [vmem:[%s3569_s12 + $0xcc] sm:$0xf] %vm1108_vm0, %v1796_v12 }
 0x36f   : > { %1283 = vrot.lane.b32.xlu1 %v3710_v15, %s3023_s13  ;;  %v1400_v46 = vpop.permute.xlu0 %1399 }
 0x370   : > { %2325 = vst.msk [vmem:[%s3569_s12 + $0x40] sm:$0xf] %vm1108_vm0, %v1400_v46 }
 0x371   : > { %v1402_v9 = vpop.permute.xlu1 %1401  ;;  %1346 = vrot.lane.b32.xlu0 %v3704_v56, %s3023_s13 }
 0x372   : > { %2326 = vst.msk [vmem:[%s3569_s12 + $0x44] sm:$0xf] %vm1108_vm0, %v1402_v9 }
 0x373   : > { %1478 = vrot.lane.b32.xlu1 %v3710_v15, %s3024_s18  ;;  %v1595_v26 = vpop.permute.xlu0 %1594 }
 0x374   : > { %2373 = vst.msk [vmem:[%s3569_s12 + $0x80] sm:$0xf] %vm1108_vm0, %v1595_v26 }
 0x375   : > { %v1597_v30 = vpop.permute.xlu1 %1596  ;;  %1427 = vrot.lane.b32.xlu0 %v3724_v45, %s3023_s13 }
 0x376   : > { %2374 = vst.msk [vmem:[%s3569_s12 + $0x84] sm:$0xf] %vm1108_vm0, %v1597_v30 }
 0x377   : > { %1673 = vrot.lane.b32.xlu1 %v3710_v15, %s3025_s23  ;;  %v1790_v49 = vpop.permute.xlu0 %1789 }
 0x378   : > { %2421 = vst.msk [vmem:[%s3569_s12 + $0xc0] sm:$0xf] %vm1108_vm0, %v1790_v49 }
 0x379   : > { %v1792_v41 = vpop.permute.xlu1 %1791  ;;  %1541 = vrot.lane.b32.xlu0 %v3704_v56, %s3024_s18 }
 0x37a   : > { %2422 = vst.msk [vmem:[%s3569_s12 + $0xc4] sm:$0xf] %vm1108_vm0, %v1792_v41 }
 0x37b   : > { %1348 = vrot.lane.b32.xlu1 %v3718_v43, %s3023_s13  ;;  %v1469_v21 = vpop.permute.xlu0 %1468 }
 0x37c   : > { %2343 = vst.msk [vmem:[%s3541_s11 + $0x88] sm:$0xf] %vm1108_vm0, %v1469_v21 }
 0x37d   : > { %v1274_v29 = vpop.permute.xlu1 %1273  ;;  %1622 = vrot.lane.b32.xlu0 %v3724_v45, %s3024_s18 }
 0x37e   : > { %2295 = vst.msk [vmem:[%s3541_s11 + $0x48] sm:$0xf] %vm1108_vm0, %v1274_v29 }
 0x37f   : > { %1429 = vrot.lane.b32.xlu1 %v3738_v54, %s3023_s13  ;;  %v1664_v15 = vpop.permute.xlu0 %1663 }
 0x380   : > { %2391 = vst.msk [vmem:[%s3541_s11 + $0xc8] sm:$0xf] %vm1108_vm0, %v1664_v15 }
 0x381   : > { %v1276_v34 = vpop.permute.xlu1 %1275  ;;  %1736 = vrot.lane.b32.xlu0 %v3704_v56, %s3025_s23 }
 0x382   : > { %2296 = vst.msk [vmem:[%s3541_s11 + $0x4c] sm:$0xf] %vm1108_vm0, %v1276_v34 }
 0x383   : > { %1543 = vrot.lane.b32.xlu1 %v3718_v43, %s3024_s18  ;;  %v1339_v35 = vpop.permute.xlu0 %1338 }
 0x384   : > { %2311 = vst.msk [vmem:[%s3548_s24 + $0x48] sm:$0xf] %vm1108_vm0, %v1339_v35 }
 0x385   : > { %v1471_v14 = vpop.permute.xlu1 %1470  ;;  %1423 = vrot.lane.b32.xlu0 %v3732_v4, %s3023_s13 }
 0x386   : > { %2344 = vst.msk [vmem:[%s3541_s11 + $0x8c] sm:$0xf] %vm1108_vm0, %v1471_v14 }
 0x387   : > { %1624 = vrot.lane.b32.xlu1 %v3738_v54, %s3024_s18  ;;  %v1412_v56 = vpop.permute.xlu0 %1411 }
 0x388   : > { %2331 = vst.msk [vmem:[%s3569_s12 + $0x58] sm:$0xf] %vm1108_vm0, %v1412_v56 }
 0x389   : > { %v1666_v37 = vpop.permute.xlu1 %1665  ;;  %1618 = vrot.lane.b32.xlu0 %v3732_v4, %s3024_s18 }
 0x38a   : > { %2392 = vst.msk [vmem:[%s3541_s11 + $0xcc] sm:$0xf] %vm1108_vm0, %v1666_v37 }
 0x38b   : > { %1738 = vrot.lane.b32.xlu1 %v3718_v43, %s3025_s23  ;;  %v1534_v42 = vpop.permute.xlu0 %1533 }
 0x38c   : > { %2359 = vst.msk [vmem:[%s3548_s24 + $0x88] sm:$0xf] %vm1108_vm0, %v1534_v42 }
 0x38d   : > { %v1341_v44 = vpop.permute.xlu1 %1340  ;;  %1813 = vrot.lane.b32.xlu0 %v3732_v4, %s3025_s23 }
 0x38e   : > { %2312 = vst.msk [vmem:[%s3548_s24 + $0x4c] sm:$0xf] %vm1108_vm0, %v1341_v44 }
 0x38f   : > { %1425 = vrot.lane.b32.xlu1 %v3746_v60, %s3023_s13  ;;  %v1607_v50 = vpop.permute.xlu0 %1606 }
 0x390   : > { %2379 = vst.msk [vmem:[%s3569_s12 + $0x98] sm:$0xf] %vm1108_vm0, %v1607_v50 }
 0x391   : > { %v1414_v36 = vpop.permute.xlu1 %1413  ;;  %1285 = vrot.lane.b32.xlu0 %v3752_v62, %s3023_s13 }
 0x392   : > { %2332 = vst.msk [vmem:[%s3569_s12 + $0x5c] sm:$0xf] %vm1108_vm0, %v1414_v36 }
 0x393   : > { %1620 = vrot.lane.b32.xlu1 %v3746_v60, %s3024_s18  ;;  %v1729_v43 = vpop.permute.xlu0 %1728 }
 0x394   : > { %2407 = vst.msk [vmem:[%s3548_s24 + $0xc8] sm:$0xf] %vm1108_vm0, %v1729_v43 }
 0x395   : > { %v1536_v4 = vpop.permute.xlu1 %1535  ;;  %1480 = vrot.lane.b32.xlu0 %v3752_v62, %s3024_s18 }
 0x396   : > { %2360 = vst.msk [vmem:[%s3548_s24 + $0x8c] sm:$0xf] %vm1108_vm0, %v1536_v4 }
 0x397   : > { %1815 = vrot.lane.b32.xlu1 %v3746_v60, %s3025_s23  ;;  %v1802_v11 = vpop.permute.xlu0 %1801 }
 0x398   : > { %2427 = vst.msk [vmem:[%s3569_s12 + $0xd8] sm:$0xf] %vm1108_vm0, %v1802_v11 }
 0x399   : > { %v1609_v53 = vpop.permute.xlu1 %1608  ;;  %1675 = vrot.lane.b32.xlu0 %v3752_v62, %s3025_s23 }
 0x39a   : > { %2380 = vst.msk [vmem:[%s3569_s12 + $0x9c] sm:$0xf] %vm1108_vm0, %v1609_v53 }
 0x39b   : > { %1287 = vrot.lane.b32.xlu1 %v3766_v1, %s3023_s13  ;;  %v1408_v58 = vpop.permute.xlu0 %1407 }
 0x39c   : > { %2329 = vst.msk [vmem:[%s3569_s12 + $0x50] sm:$0xf] %vm1108_vm0, %v1408_v58 }
 0x39d   : > { %v1731_v59 = vpop.permute.xlu1 %1730  ;;  %1350 = vrot.lane.b32.xlu0 %v3760_v63, %s3023_s13 }
 0x39e   : > { %2408 = vst.msk [vmem:[%s3548_s24 + $0xcc] sm:$0xf] %vm1108_vm0, %v1731_v59 }
 0x39f   : > { %1482 = vrot.lane.b32.xlu1 %v3766_v1, %s3024_s18  ;;  %v1603_v60 = vpop.permute.xlu0 %1602 }
 0x3a0   : > { %2377 = vst.msk [vmem:[%s3569_s12 + $0x90] sm:$0xf] %vm1108_vm0, %v1603_v60 }
 0x3a1   : > { %v1804_v62 = vpop.permute.xlu1 %1803  ;;  %1545 = vrot.lane.b32.xlu0 %v3760_v63, %s3024_s18 }
 0x3a2   : > { %2428 = vst.msk [vmem:[%s3569_s12 + $0xdc] sm:$0xf] %vm1108_vm0, %v1804_v62 }
 0x3a3   : > { %1677 = vrot.lane.b32.xlu1 %v3766_v1, %s3025_s23  ;;  %v1798_v13 = vpop.permute.xlu0 %1797 }
 0x3a4   : > { %2425 = vst.msk [vmem:[%s3569_s12 + $0xd0] sm:$0xf] %vm1108_vm0, %v1798_v13 }
 0x3a5   : > { %v1410_v28 = vpop.permute.xlu1 %1409  ;;  %1740 = vrot.lane.b32.xlu0 %v3760_v63, %s3025_s23 }
 0x3a6   : > { %2330 = vst.msk [vmem:[%s3569_s12 + $0x54] sm:$0xf] %vm1108_vm0, %v1410_v28 }
 0x3a7   : > { %1352 = vrot.lane.b32.xlu1 %v3773_v23, %s3023_s13  ;;  %v1278_v33 = vpop.permute.xlu0 %1277 }
 0x3a8   : > { %2297 = vst.msk [vmem:[%s3541_s11 + $0x50] sm:$0xf] %vm1108_vm0, %v1278_v33 }
 0x3a9   : > { %v1605_v2 = vpop.permute.xlu1 %1604  ;;  %1289 = vrot.lane.b32.xlu0 %v3787_v16, %s3023_s13 }
 0x3aa   : > { %2378 = vst.msk [vmem:[%s3569_s12 + $0x94] sm:$0xf] %vm1108_vm0, %v1605_v2 }
 0x3ab   : > { %1547 = vrot.lane.b32.xlu1 %v3773_v23, %s3024_s18  ;;  %v1473_v63 = vpop.permute.xlu0 %1472 }
 0x3ac   : > { %2345 = vst.msk [vmem:[%s3541_s11 + $0x90] sm:$0xf] %vm1108_vm0, %v1473_v63 }
 0x3ad   : > { %v1800_v1 = vpop.permute.xlu1 %1799  ;;  %1484 = vrot.lane.b32.xlu0 %v3787_v16, %s3024_s18 }
 0x3ae   : > { %2426 = vst.msk [vmem:[%s3569_s12 + $0xd4] sm:$0xf] %vm1108_vm0, %v1800_v1 }
 0x3af   : > { %1742 = vrot.lane.b32.xlu1 %v3773_v23, %s3025_s23  ;;  %v1668_v57 = vpop.permute.xlu0 %1667 }
 0x3b0   : > { %2393 = vst.msk [vmem:[%s3541_s11 + $0xd0] sm:$0xf] %vm1108_vm0, %v1668_v57 }
 0x3b1   : > { %v1280_v32 = vpop.permute.xlu1 %1279  ;;  %1679 = vrot.lane.b32.xlu0 %v3787_v16, %s3025_s23 }
 0x3b2   : > { %2298 = vst.msk [vmem:[%s3541_s11 + $0x54] sm:$0xf] %vm1108_vm0, %v1280_v32 }
 0x3b3   : > { %1291 = vrot.lane.b32.xlu1 %v3798_v48, %s3023_s13  ;;  %v1343_v47 = vpop.permute.xlu0 %1342 }
 0x3b4   : > { %2313 = vst.msk [vmem:[%s3548_s24 + $0x50] sm:$0xf] %vm1108_vm0, %v1343_v47 }
 0x3b5   : > { %v1475_v25 = vpop.permute.xlu1 %1474  ;;  %1354 = vrot.lane.b32.xlu0 %v3792_v19, %s3023_s13 }
 0x3b6   : > { %2346 = vst.msk [vmem:[%s3541_s11 + $0x94] sm:$0xf] %vm1108_vm0, %v1475_v25 }
 0x3b7   : > { %1486 = vrot.lane.b32.xlu1 %v3798_v48, %s3024_s18  ;;  %v1420_v23 = vpop.permute.xlu0 %1419 }
 0x3b8   : > { %2335 = vst.msk [vmem:[%s3569_s12 + $0x68] sm:$0xf] %vm1108_vm0, %v1420_v23 }
 0x3b9   : > { %v1670_v16 = vpop.permute.xlu1 %1669  ;;  %1549 = vrot.lane.b32.xlu0 %v3792_v19, %s3024_s18 }
 0x3ba   : > { %2394 = vst.msk [vmem:[%s3541_s11 + $0xd4] sm:$0xf] %vm1108_vm0, %v1670_v16 }
 0x3bb   : > { %1681 = vrot.lane.b32.xlu1 %v3798_v48, %s3025_s23  ;;  %v1538_v52 = vpop.permute.xlu0 %1537 }
 0x3bc   : > { %2361 = vst.msk [vmem:[%s3548_s24 + $0x90] sm:$0xf] %vm1108_vm0, %v1538_v52 }
 0x3bd   : > { %v1345_v55 = vpop.permute.xlu1 %1344  ;;  %1744 = vrot.lane.b32.xlu0 %v3792_v19, %s3025_s23 }
 0x3be   : > { %2314 = vst.msk [vmem:[%s3548_s24 + $0x54] sm:$0xf] %vm1108_vm0, %v1345_v55 }
 0x3bf   : > { %1356 = vrot.lane.b32.xlu1 %v3805_v27, %s3023_s13  ;;  %v1615_v17 = vpop.permute.xlu0 %1614 }
 0x3c0   : > { %2383 = vst.msk [vmem:[%s3569_s12 + $0xa8] sm:$0xf] %vm1108_vm0, %v1615_v17 }
 0x3c1   : > { %v1422_v61 = vpop.permute.xlu1 %1421  ;;  %1293 = vrot.lane.b32.xlu0 %v3819_v39, %s3023_s13 }
 0x3c2   : > { %2336 = vst.msk [vmem:[%s3569_s12 + $0x6c] sm:$0xf] %vm1108_vm0, %v1422_v61 }
 0x3c3   : > { %1551 = vrot.lane.b32.xlu1 %v3805_v27, %s3024_s18  ;;  %v1733_v19 = vpop.permute.xlu0 %1732 }
 0x3c4   : > { %2409 = vst.msk [vmem:[%s3548_s24 + $0xd0] sm:$0xf] %vm1108_vm0, %v1733_v19 }
 0x3c5   : > { %v1540_v48 = vpop.permute.xlu1 %1539  ;;  %1488 = vrot.lane.b32.xlu0 %v3819_v39, %s3024_s18 }
 0x3c6   : > { %2362 = vst.msk [vmem:[%s3548_s24 + $0x94] sm:$0xf] %vm1108_vm0, %v1540_v48 }
 0x3c7   : > { %1746 = vrot.lane.b32.xlu1 %v3805_v27, %s3025_s23  ;;  %v1810_v22 = vpop.permute.xlu0 %1809 }
 0x3c8   : > { %2431 = vst.msk [vmem:[%s3569_s12 + $0xe8] sm:$0xf] %vm1108_vm0, %v1810_v22 }
 0x3c9   : > { %v1617_v24 = vpop.permute.xlu1 %1616  ;;  %1683 = vrot.lane.b32.xlu0 %v3819_v39, %s3025_s23 }
 0x3ca   : > { %2384 = vst.msk [vmem:[%s3569_s12 + $0xac] sm:$0xf] %vm1108_vm0, %v1617_v24 }
 0x3cb   : > { %1295 = vrot.lane.b32.xlu1 %v3830_v31, %s3023_s13  ;;  %v1416_v8 = vpop.permute.xlu0 %1415 }
 0x3cc   : > { %2333 = vst.msk [vmem:[%s3569_s12 + $0x60] sm:$0xf] %vm1108_vm0, %v1416_v8 }
 0x3cd   : > { %v1735_v40 = vpop.permute.xlu1 %1734  ;;  %1358 = vrot.lane.b32.xlu0 %v3824_v3, %s3023_s13 }
 0x3ce   : > { %2410 = vst.msk [vmem:[%s3548_s24 + $0xd4] sm:$0xf] %vm1108_vm0, %v1735_v40 }
 0x3cf   : > { %1490 = vrot.lane.b32.xlu1 %v3830_v31, %s3024_s18  ;;  %v1611_v27 = vpop.permute.xlu0 %1610 }
 0x3d0   : > { %2381 = vst.msk [vmem:[%s3569_s12 + $0xa0] sm:$0xf] %vm1108_vm0, %v1611_v27 }
 0x3d1   : > { %v1812_v39 = vpop.permute.xlu1 %1811  ;;  %1553 = vrot.lane.b32.xlu0 %v3824_v3, %s3024_s18 }
 0x3d2   : > { %2432 = vst.msk [vmem:[%s3569_s12 + $0xec] sm:$0xf] %vm1108_vm0, %v1812_v39 }
 0x3d3   : > { %1685 = vrot.lane.b32.xlu1 %v3830_v31, %s3025_s23  ;;  %v1806_v5 = vpop.permute.xlu0 %1805 }
 0x3d4   : > { %2429 = vst.msk [vmem:[%s3569_s12 + $0xe0] sm:$0xf] %vm1108_vm0, %v1806_v5 }
 0x3d5   : > { %v1418_v10 = vpop.permute.xlu1 %1417  ;;  %1748 = vrot.lane.b32.xlu0 %v3824_v3, %s3025_s23 }
 0x3d6   : > { %2334 = vst.msk [vmem:[%s3569_s12 + $0x64] sm:$0xf] %vm1108_vm0, %v1418_v10 }
 0x3d7   : > { %1360 = vrot.lane.b32.xlu1 %v3837_v51, %s3023_s13  ;;  %v1282_v20 = vpop.permute.xlu0 %1281 }
 0x3d8   : > { %2299 = vst.msk [vmem:[%s3541_s11 + $0x58] sm:$0xf] %vm1108_vm0, %v1282_v20 }
 0x3d9   : > { %v1613_v6 = vpop.permute.xlu1 %1612  ;;  %1297 = vrot.lane.b32.xlu0 %v3851_v7, %s3023_s13 }
 0x3da   : > { %2382 = vst.msk [vmem:[%s3569_s12 + $0xa4] sm:$0xf] %vm1108_vm0, %v1613_v6 }
 0x3db   : > { %1555 = vrot.lane.b32.xlu1 %v3837_v51, %s3024_s18  ;;  %v1477_v3 = vpop.permute.xlu0 %1476 }
 0x3dc   : > { %2347 = vst.msk [vmem:[%s3541_s11 + $0x98] sm:$0xf] %vm1108_vm0, %v1477_v3 }
 0x3dd   : > { %v1808_v31 = vpop.permute.xlu1 %1807  ;;  %1492 = vrot.lane.b32.xlu0 %v3851_v7, %s3024_s18 }
 0x3de   : > { %2430 = vst.msk [vmem:[%s3569_s12 + $0xe4] sm:$0xf] %vm1108_vm0, %v1808_v31 }
 0x3df   : > { %1750 = vrot.lane.b32.xlu1 %v3837_v51, %s3025_s23  ;;  %v1672_v12 = vpop.permute.xlu0 %1671 }
 0x3e0   : > { %2395 = vst.msk [vmem:[%s3541_s11 + $0xd8] sm:$0xf] %vm1108_vm0, %v1672_v12 }
 0x3e1   : > { %v1284_v46 = vpop.permute.xlu1 %1283  ;;  %1687 = vrot.lane.b32.xlu0 %v3851_v7, %s3025_s23 }
 0x3e2   : > { %2300 = vst.msk [vmem:[%s3541_s11 + $0x5c] sm:$0xf] %vm1108_vm0, %v1284_v46 }
 0x3e3   : > { %1299 = vrot.lane.b32.xlu1 %v3862_v38, %s3023_s13  ;;  %v1347_v9 = vpop.permute.xlu0 %1346 }
 0x3e4   : > { %2315 = vst.msk [vmem:[%s3548_s24 + $0x58] sm:$0xf] %vm1108_vm0, %v1347_v9 }
 0x3e5   : > { %v1479_v51 = vpop.permute.xlu1 %1478  ;;  %1362 = vrot.lane.b32.xlu0 %v3856_v18, %s3023_s13 }
 0x3e6   : > { %2348 = vst.msk [vmem:[%s3541_s11 + $0x9c] sm:$0xf] %vm1108_vm0, %v1479_v51 }
 0x3e7   : > { %1494 = vrot.lane.b32.xlu1 %v3862_v38, %s3024_s18  ;;  %v1428_v7 = vpop.permute.xlu0 %1427 }
 0x3e8   : > { %2339 = vst.msk [vmem:[%s3569_s12 + $0x78] sm:$0xf] %vm1108_vm0, %v1428_v7 }
 0x3e9   : > { %v1674_v26 = vpop.permute.xlu1 %1673  ;;  %1557 = vrot.lane.b32.xlu0 %v3856_v18, %s3024_s18 }
 0x3ea   : > { %2396 = vst.msk [vmem:[%s3541_s11 + $0xdc] sm:$0xf] %vm1108_vm0, %v1674_v26 }
 0x3eb   : > { %1689 = vrot.lane.b32.xlu1 %v3862_v38, %s3025_s23  ;;  %v1542_v30 = vpop.permute.xlu0 %1541 }
 0x3ec   : > { %2363 = vst.msk [vmem:[%s3548_s24 + $0x98] sm:$0xf] %vm1108_vm0, %v1542_v30 }
 0x3ed   : > { %v1349_v49 = vpop.permute.xlu1 %1348  ;;  %1752 = vrot.lane.b32.xlu0 %v3856_v18, %s3025_s23 }
 0x3ee   : > { %2316 = vst.msk [vmem:[%s3548_s24 + $0x5c] sm:$0xf] %vm1108_vm0, %v1349_v49 }
 0x3ef   : > { %1364 = vrot.lane.b32.xlu1 %v3869_v0, %s3023_s13  ;;  %v1623_v41 = vpop.permute.xlu0 %1622 }
 0x3f0   : > { %2387 = vst.msk [vmem:[%s3569_s12 + $0xb8] sm:$0xf] %vm1108_vm0, %v1623_v41 }
 0x3f1   : > { %v1430_v38 = vpop.permute.xlu1 %1429  ;;  %1817 = vrot.lane.b32.xlu0 %v3724_v45, %s3025_s23 }
 0x3f2   : > { %2340 = vst.msk [vmem:[%s3569_s12 + $0x7c] sm:$0xf] %vm1108_vm0, %v1430_v38 }
 0x3f3   : > { %1559 = vrot.lane.b32.xlu1 %v3869_v0, %s3024_s18  ;;  %v1737_v18 = vpop.permute.xlu0 %1736 }
 0x3f4   : > { %2411 = vst.msk [vmem:[%s3548_s24 + $0xd8] sm:$0xf] %vm1108_vm0, %v1737_v18 }
 0x3f5   : > { %v1544_v21 = vpop.permute.xlu1 %1543 }
 0x3f6   : > { %2364 = vst.msk [vmem:[%s3548_s24 + $0x9c] sm:$0xf] %vm1108_vm0, %v1544_v21 }
 0x3f7   : > { %1754 = vrot.lane.b32.xlu1 %v3869_v0, %s3025_s23  ;;  %v1424_v29 = vpop.permute.xlu0 %1423 }
 0x3f8   : > { %2337 = vst.msk [vmem:[%s3569_s12 + $0x70] sm:$0xf] %vm1108_vm0, %v1424_v29 }
 0x3f9   : > { %v1625_v45 = vpop.permute.xlu1 %1624 }
 0x3fa   : > { %2388 = vst.msk [vmem:[%s3569_s12 + $0xbc] sm:$0xf] %vm1108_vm0, %v1625_v45 }
 0x3fb   : > { %1819 = vrot.lane.b32.xlu1 %v3738_v54, %s3025_s23  ;;  %v1619_v15 = vpop.permute.xlu0 %1618 }
 0x3fc   : > { %2385 = vst.msk [vmem:[%s3569_s12 + $0xb0] sm:$0xf] %vm1108_vm0, %v1619_v15 }
 0x3fd   : > { %v1739_v34 = vpop.permute.xlu1 %1738 }
 0x3fe   : > { %2412 = vst.msk [vmem:[%s3548_s24 + $0xdc] sm:$0xf] %vm1108_vm0, %v1739_v34 }
 0x3ff   : > { %v1814_v0 = vpop.permute.xlu0 %1813 }
 0x400   : > { %2433 = vst.msk [vmem:[%s3569_s12 + $0xf0] sm:$0xf] %vm1108_vm0, %v1814_v0 }
 0x401   : > { %v1426_v35 = vpop.permute.xlu1 %1425 }
 0x402   : > { %2338 = vst.msk [vmem:[%s3569_s12 + $0x74] sm:$0xf] %vm1108_vm0, %v1426_v35 }
 0x403   : > { %v1286_v14 = vpop.permute.xlu0 %1285 }
 0x404   : > { %2301 = vst.msk [vmem:[%s3541_s11 + $0x60] sm:$0xf] %vm1108_vm0, %v1286_v14 }
 0x405   : > { %v1621_v54 = vpop.permute.xlu1 %1620 }
 0x406   : > { %2386 = vst.msk [vmem:[%s3569_s12 + $0xb4] sm:$0xf] %vm1108_vm0, %v1621_v54 }
 0x407   : > { %v1481_v56 = vpop.permute.xlu0 %1480 }
 0x408   : > { %2349 = vst.msk [vmem:[%s3541_s11 + $0xa0] sm:$0xf] %vm1108_vm0, %v1481_v56 }
 0x409   : > { %v1816_v37 = vpop.permute.xlu1 %1815 }
 0x40a   : > { %2434 = vst.msk [vmem:[%s3569_s12 + $0xf4] sm:$0xf] %vm1108_vm0, %v1816_v37 }
 0x40b   : > { %v1676_v42 = vpop.permute.xlu0 %1675 }
 0x40c   : > { %2397 = vst.msk [vmem:[%s3541_s11 + $0xe0] sm:$0xf] %vm1108_vm0, %v1676_v42 }
 0x40d   : > { %v1288_v44 = vpop.permute.xlu1 %1287 }
 0x40e   : > { %2302 = vst.msk [vmem:[%s3541_s11 + $0x64] sm:$0xf] %vm1108_vm0, %v1288_v44 }
 0x40f   : > { %v1351_v50 = vpop.permute.xlu0 %1350 }
 0x410   : > { %2317 = vst.msk [vmem:[%s3548_s24 + $0x60] sm:$0xf] %vm1108_vm0, %v1351_v50 }
 0x411   : > { %v1483_v36 = vpop.permute.xlu1 %1482 }
 0x412   : > { %2350 = vst.msk [vmem:[%s3541_s11 + $0xa4] sm:$0xf] %vm1108_vm0, %v1483_v36 }
 0x413   : > { %v1546_v43 = vpop.permute.xlu0 %1545 }
 0x414   : > { %2365 = vst.msk [vmem:[%s3548_s24 + $0xa0] sm:$0xf] %vm1108_vm0, %v1546_v43 }
 0x415   : > { %v1678_v4 = vpop.permute.xlu1 %1677 }
 0x416   : > { %2398 = vst.msk [vmem:[%s3541_s11 + $0xe4] sm:$0xf] %vm1108_vm0, %v1678_v4 }
 0x417   : > { %v1741_v11 = vpop.permute.xlu0 %1740 }
 0x418   : > { %2413 = vst.msk [vmem:[%s3548_s24 + $0xe0] sm:$0xf] %vm1108_vm0, %v1741_v11 }
 0x419   : > { %v1353_v53 = vpop.permute.xlu1 %1352 }
 0x41a   : > { %2318 = vst.msk [vmem:[%s3548_s24 + $0x64] sm:$0xf] %vm1108_vm0, %v1353_v53 }
 0x41b   : > { %v1290_v58 = vpop.permute.xlu0 %1289 }
 0x41c   : > { %2303 = vst.msk [vmem:[%s3541_s11 + $0x68] sm:$0xf] %vm1108_vm0, %v1290_v58 }
 0x41d   : > { %v1548_v59 = vpop.permute.xlu1 %1547 }
 0x41e   : > { %2366 = vst.msk [vmem:[%s3548_s24 + $0xa4] sm:$0xf] %vm1108_vm0, %v1548_v59 }
 0x41f   : > { %v1485_v60 = vpop.permute.xlu0 %1484 }
 0x420   : > { %2351 = vst.msk [vmem:[%s3541_s11 + $0xa8] sm:$0xf] %vm1108_vm0, %v1485_v60 }
 0x421   : > { %v1743_v62 = vpop.permute.xlu1 %1742 }
 0x422   : > { %2414 = vst.msk [vmem:[%s3548_s24 + $0xe4] sm:$0xf] %vm1108_vm0, %v1743_v62 }
 0x423   : > { %v1680_v13 = vpop.permute.xlu0 %1679 }
 0x424   : > { %2399 = vst.msk [vmem:[%s3541_s11 + $0xe8] sm:$0xf] %vm1108_vm0, %v1680_v13 }
 0x425   : > { %v1292_v28 = vpop.permute.xlu1 %1291 }
 0x426   : > { %2304 = vst.msk [vmem:[%s3541_s11 + $0x6c] sm:$0xf] %vm1108_vm0, %v1292_v28 }
 0x427   : > { %v1355_v33 = vpop.permute.xlu0 %1354 }
 0x428   : > { %2319 = vst.msk [vmem:[%s3548_s24 + $0x68] sm:$0xf] %vm1108_vm0, %v1355_v33 }
 0x429   : > { %v1487_v2 = vpop.permute.xlu1 %1486 }
 0x42a   : > { %2352 = vst.msk [vmem:[%s3541_s11 + $0xac] sm:$0xf] %vm1108_vm0, %v1487_v2 }
 0x42b   : > { %v1550_v63 = vpop.permute.xlu0 %1549 }
 0x42c   : > { %2367 = vst.msk [vmem:[%s3548_s24 + $0xa8] sm:$0xf] %vm1108_vm0, %v1550_v63 }
 0x42d   : > { %v1682_v1 = vpop.permute.xlu1 %1681 }
 0x42e   : > { %2400 = vst.msk [vmem:[%s3541_s11 + $0xec] sm:$0xf] %vm1108_vm0, %v1682_v1 }
 0x42f   : > { %v1745_v57 = vpop.permute.xlu0 %1744 }
 0x430   : > { %2415 = vst.msk [vmem:[%s3548_s24 + $0xe8] sm:$0xf] %vm1108_vm0, %v1745_v57 }
 0x431   : > { %v1357_v32 = vpop.permute.xlu1 %1356 }
 0x432   : > { %2320 = vst.msk [vmem:[%s3548_s24 + $0x6c] sm:$0xf] %vm1108_vm0, %v1357_v32 }
 0x433   : > { %v1294_v47 = vpop.permute.xlu0 %1293 }
 0x434   : > { %2305 = vst.msk [vmem:[%s3541_s11 + $0x70] sm:$0xf] %vm1108_vm0, %v1294_v47 }
 0x435   : > { %v1552_v25 = vpop.permute.xlu1 %1551 }
 0x436   : > { %2368 = vst.msk [vmem:[%s3548_s24 + $0xac] sm:$0xf] %vm1108_vm0, %v1552_v25 }
 0x437   : > { %v1489_v23 = vpop.permute.xlu0 %1488 }
 0x438   : > { %2353 = vst.msk [vmem:[%s3541_s11 + $0xb0] sm:$0xf] %vm1108_vm0, %v1489_v23 }
 0x439   : > { %v1747_v16 = vpop.permute.xlu1 %1746 }
 0x43a   : > { %2416 = vst.msk [vmem:[%s3548_s24 + $0xec] sm:$0xf] %vm1108_vm0, %v1747_v16 }
 0x43b   : > { %v1684_v52 = vpop.permute.xlu0 %1683 }
 0x43c   : > { %2401 = vst.msk [vmem:[%s3541_s11 + $0xf0] sm:$0xf] %vm1108_vm0, %v1684_v52 }
 0x43d   : > { %v1296_v55 = vpop.permute.xlu1 %1295 }
 0x43e   : > { %2306 = vst.msk [vmem:[%s3541_s11 + $0x74] sm:$0xf] %vm1108_vm0, %v1296_v55 }
 0x43f   : > { %v1359_v17 = vpop.permute.xlu0 %1358 }
 0x440   : > { %2321 = vst.msk [vmem:[%s3548_s24 + $0x70] sm:$0xf] %vm1108_vm0, %v1359_v17 }
 0x441   : > { %v1491_v61 = vpop.permute.xlu1 %1490 }
 0x442   : > { %2354 = vst.msk [vmem:[%s3541_s11 + $0xb4] sm:$0xf] %vm1108_vm0, %v1491_v61 }
 0x443   : > { %v1554_v19 = vpop.permute.xlu0 %1553 }
 0x444   : > { %2369 = vst.msk [vmem:[%s3548_s24 + $0xb0] sm:$0xf] %vm1108_vm0, %v1554_v19 }
 0x445   : > { %v1686_v48 = vpop.permute.xlu1 %1685 }
 0x446   : > { %2402 = vst.msk [vmem:[%s3541_s11 + $0xf4] sm:$0xf] %vm1108_vm0, %v1686_v48 }
 0x447   : > { %v1749_v22 = vpop.permute.xlu0 %1748 }
 0x448   : > { %2417 = vst.msk [vmem:[%s3548_s24 + $0xf0] sm:$0xf] %vm1108_vm0, %v1749_v22 }
 0x449   : > { %v1361_v24 = vpop.permute.xlu1 %1360 }
 0x44a   : > { %2322 = vst.msk [vmem:[%s3548_s24 + $0x74] sm:$0xf] %vm1108_vm0, %v1361_v24 }
 0x44b   : > { %v1298_v8 = vpop.permute.xlu0 %1297 }
 0x44c   : > { %2307 = vst.msk [vmem:[%s3541_s11 + $0x78] sm:$0xf] %vm1108_vm0, %v1298_v8 }
 0x44d   : > { %v1556_v40 = vpop.permute.xlu1 %1555 }
 0x44e   : > { %2370 = vst.msk [vmem:[%s3548_s24 + $0xb4] sm:$0xf] %vm1108_vm0, %v1556_v40 }
 0x44f   : > { %v1493_v27 = vpop.permute.xlu0 %1492 }
 0x450   : > { %2355 = vst.msk [vmem:[%s3541_s11 + $0xb8] sm:$0xf] %vm1108_vm0, %v1493_v27 }
 0x451   : > { %v1751_v39 = vpop.permute.xlu1 %1750 }
 0x452   : > { %2418 = vst.msk [vmem:[%s3548_s24 + $0xf4] sm:$0xf] %vm1108_vm0, %v1751_v39 }
 0x453   : > { %v1688_v5 = vpop.permute.xlu0 %1687 }
 0x454   : > { %2403 = vst.msk [vmem:[%s3541_s11 + $0xf8] sm:$0xf] %vm1108_vm0, %v1688_v5 }
 0x455   : > { %v1300_v10 = vpop.permute.xlu1 %1299 }
 0x456   : > { %2308 = vst.msk [vmem:[%s3541_s11 + $0x7c] sm:$0xf] %vm1108_vm0, %v1300_v10 }
 0x457   : > { %v1363_v20 = vpop.permute.xlu0 %1362 }
 0x458   : > { %2323 = vst.msk [vmem:[%s3548_s24 + $0x78] sm:$0xf] %vm1108_vm0, %v1363_v20 }
 0x459   : > { %v1495_v6 = vpop.permute.xlu1 %1494 }
 0x45a   : > { %2356 = vst.msk [vmem:[%s3541_s11 + $0xbc] sm:$0xf] %vm1108_vm0, %v1495_v6 }
 0x45b   : > { %v1558_v3 = vpop.permute.xlu0 %1557 }
 0x45c   : > { %2371 = vst.msk [vmem:[%s3548_s24 + $0xb8] sm:$0xf] %vm1108_vm0, %v1558_v3 }
 0x45d   : > { %v1690_v31 = vpop.permute.xlu1 %1689 }
 0x45e   : > { %2404 = vst.msk [vmem:[%s3541_s11 + $0xfc] sm:$0xf] %vm1108_vm0, %v1690_v31 }
 0x45f   : > { %v1753_v12 = vpop.permute.xlu0 %1752 }
 0x460   : > { %2419 = vst.msk [vmem:[%s3548_s24 + $0xf8] sm:$0xf] %vm1108_vm0, %v1753_v12 }
 0x461   : > { %v1365_v46 = vpop.permute.xlu1 %1364 }
 0x462   : > { %2324 = vst.msk [vmem:[%s3548_s24 + $0x7c] sm:$0xf] %vm1108_vm0, %v1365_v46 }
 0x463   : > { %v1818_v9 = vpop.permute.xlu0 %1817 }
 0x464   : > { %2435 = vst.msk [vmem:[%s3569_s12 + $0xf8] sm:$0xf] %vm1108_vm0, %v1818_v9 }
 0x465   : > { %v1560_v51 = vpop.permute.xlu1 %1559 }
 0x466   : > { %2372 = vst.msk [vmem:[%s3548_s24 + $0xbc] sm:$0xf] %vm1108_vm0, %v1560_v51 }
 0x469   : > { %v1755_v7 = vpop.permute.xlu1 %1754 }
 0x46a   : > { %2420 = vst.msk [vmem:[%s3548_s24 + $0xfc] sm:$0xf] %vm1108_vm0, %v1755_v7 }
 0x46d   : > { %v1820_v26 = vpop.permute.xlu1 %1819 }
 0x46e   : > { %2436 = vst.msk [vmem:[%s3569_s12 + $0xfc] sm:$0xf] %vm1108_vm0, %v1820_v26 }
 0x46f   : > { %s2440_s22 = sshll.u32 %s2995_s27, 4  ;;  %s2441_s20 = sshll.u32 %s2999_s28, 7 }
 0x470   : > { %s1877_s17 = sadd.s32 %s2441_s20, %s2440_s22  ;;  %s1896_s7 = sshll.u32 %s3541_s11, 4  ;;  %s1897_s7 = int_to_ptr.vmem [resolvable:$true] %s1896_s7 }
 0x471   : > { %s4404_s3 = sshll.u32 %s1877_s17, 6  ;;  %s3026_s16 = smov 1024  }
 0x472   : > { %s1879_s4 = scalar_lea.hbm %s4499_s5, %s4404_s3  ;;  %2565 = sst [smem:[#allocation16]] (%p3266_p4), %s3026_s16 }
 0x473   : > { %s3027_s6 = smov 2048   ;;  %s3028_s27 = smov 16  }
 0x474   : > { %2566 = sst [smem:[#allocation16 + $0x1]] (%p3266_p4), %s3027_s6  ;;  %s3029_s28 = smov 64  }
 0x475   : > { %2567 = sst [smem:[#allocation16 + $0x2]] (%p3266_p4), %s3028_s27  ;;  %s3030_s11 = smov 4  }
 0x476   : > { %2568 = sst [smem:[#allocation16 + $0x3]] (%p3266_p4), %s3029_s28  ;;  %s3031_s13 = smov [#allocation15]  }
 0x477   : > { %2569 = sst [smem:[#allocation16 + $0x4]] (%p3266_p4), %s3029_s28  ;;  %s3032_s18 = smov 0  }
 0x478   : > { %2570 = sst [smem:[#allocation16 + $0x5]] (%p3266_p4), %s3030_s11 }
 0x479   : > { %2571 = dma.general (%p3266_p4), %s1897_s7, 4096, %s1879_s4, %s1855_s19, %s3031_s13, [#allocation16], %s3032_s18, 0  }
 0x47a   : > { %s4537_s22 = sld [smem:[#allocation33_spill]]  ;;  %s1943_s17 = sshll.u32 %s3548_s24, 4  ;;  %s1944_s17 = int_to_ptr.vmem [resolvable:$true] %s1943_s17 }
 0x47b   : > { %s3033_s9 = smov 1024   ;;  %s3034_s19 = smov 2048  }
 0x47c   : > { %2572 = sst [smem:[#allocation18]] (%p3266_p4), %s3033_s9  ;;  %s3035_s7 = smov 16  }
 0x47d   : > { %2573 = sst [smem:[#allocation18 + $0x1]] (%p3266_p4), %s3034_s19  ;;  %s3036_s21 = smov 64  }
 0x47e   : > { %2574 = sst [smem:[#allocation18 + $0x2]] (%p3266_p4), %s3035_s7  ;;  %s3037_s4 = smov 4  }
 0x47f   : > { %2575 = sst [smem:[#allocation18 + $0x3]] (%p3266_p4), %s3036_s21  ;;  %s3038_s16 = smov [#allocation17]  }
 0x480   : > { %s1926_s20 = scalar_lea.hbm %s4537_s22, %s4404_s3  ;;  %2576 = sst [smem:[#allocation18 + $0x4]] (%p3266_p4), %s3036_s21 }
 0x481   : > { %2577 = sst [smem:[#allocation18 + $0x5]] (%p3266_p4), %s3037_s4  ;;  %s3039_s24 = smov 0  }
 0x482   : > { %2578 = dma.general (%p3266_p4), %s1944_s17, 4096, %s1926_s20, %s4399_s15, %s3038_s16, [#allocation18], %s3039_s24, 0  }
 0x483   : > { %s4538_s28 = sld [smem:[#allocation34_spill]]  ;;  %s1990_s13 = sshll.u32 %s3569_s12, 4  ;;  %s1991_s13 = int_to_ptr.vmem [resolvable:$true] %s1990_s13 }
 0x484   : > { %s3040_s18 = smov 1024   ;;  %s3041_s23 = smov 2048  }
 0x485   : > { %2579 = sst [smem:[#allocation20]] (%p3266_p4), %s3040_s18  ;;  %s3042_s10 = smov 16  }
 0x486   : > { %2580 = sst [smem:[#allocation20 + $0x1]] (%p3266_p4), %s3041_s23  ;;  %s3043_s22 = smov 64  }
 0x487   : > { %2581 = sst [smem:[#allocation20 + $0x2]] (%p3266_p4), %s3042_s10  ;;  %s3044_s20 = smov 4  }
 0x488   : > { %2582 = sst [smem:[#allocation20 + $0x3]] (%p3266_p4), %s3043_s22  ;;  %s3046_s12 = smov 0  }
 0x489   : > { %s1973_s11 = scalar_lea.hbm %s4538_s28, %s4404_s3  ;;  %2583 = sst [smem:[#allocation20 + $0x4]] (%p3266_p4), %s3043_s22 }
 0x48a   : > { %2584 = sst [smem:[#allocation20 + $0x5]] (%p3266_p4), %s3044_s20  ;;  %s3045_s3 = smov [#allocation19]  }
 0x48b   : > { %2585 = dma.general (%p3266_p4), %s1991_s13, 4096, %s1973_s11, %s4399_s15, %s3045_s3, [#allocation20], %s3046_s12, 0  }
 0x48c PF: > { %s4539_s17 = sld [smem:[#allocation26_spill]]  ;;  %s4540_s9 = sld [smem:[#allocation27_spill]] }
 0x48d   : > { %p2625_p6 = scmp.ge.s32.totalorder %s3011_s8, 2 }
 0x492   : > { %s2018_s19 = sand.u32 1, %s4539_s17   ;;  %p4541_p8 = scmp.ne.s32.totalorder %s4540_s9, 0 }
 0x493   : > { %s2019_s7 = scalar_lea.sflag [#allocation4], %s2018_s19 }
 0x494   : > { %p2607_p3 = pnand %p2625_p6, %p4541_p8 }
 0x496   : > { %2974 = dma.done.wait (!%p2607_p3), %s2019_s7, 4096  }
 0x497   : > { %2976 = vsyncadd (!%p2607_p3), %s2019_s7, 4294963200  ;;  %s4542_s21 = sadd.s32 4294967294, %s3011_s8  }
 0x498   : > { %s2027_s4 = sand.u32 1, %s4542_s21  }
 0x499   : > { %s2028_s16 = scalar_lea.sflag [#allocation13], %s2027_s4 }
 0x49a   : > { %2978 = dma.done.wait (!%p2607_p3), %s2028_s16, 8192  }
 0x49b   : > { %2980 = vsyncadd (!%p2607_p3), %s2028_s16, 4294959104  ;;  %s29_s8 = sadd.s32 1, %s3011_s8   ;;  %s4543_s14 = sld [smem:[#allocation28_spill]] }
 0x49c   : > { %p26_p4 = scmp.ge.s32.totalorder %s29_s8, 6   ;;  %s4544_s24 = smov %s2987_s25 }
 0x49d   : > { %s4545_s25 = smov %s2991_s26  ;;  %s4546_s26 = smov %s3279_s2 }
 0x49e   : > { %s4547_s27 = smov %s3003_s29  ;;  %s4548_s28 = smov %s3007_s30 }
 0x49f   : > { %s4550_s30 = smov %s4556_s1  ;;  %28 = sbr.rel (!%p26_p4) target bundleno = 18 (0x12), region = 157 }
 0x4a1   : > { %s4549_s29 = smov %s4543_s14 }
 0x4a6   :  { %2042 = vsyncpa [#allocation3], 1 }
 0x4a7   :  { %2044 = vsyncpa [#allocation3 + $0x1], 1 }
 0x4a8   :  { %2045 = vsyncpa [#allocation6], 1 }
 0x4a9   :  { %2046 = vsyncpa [#allocation9], 1 }
 0x4aa   :  { %2047 = vsyncpa [#allocation4], 1 }
 0x4ab   :  { %2049 = vsyncpa [#allocation4 + $0x1], 1 }
 0x4ac   :  { %2050 = vsyncpa [#allocation13], 1 }
 0x4ad   :  { %2052 = vsyncpa [#allocation13 + $0x1], 1 }

// kernel: tpu_custom_call.1
= control target key start
LH: loop header
LB: loop body
LE: loop exit
PB: predicated region body
PF: predicated region fallthrough
CT: control target
= control target key end

     0   :  { %s4494_s0 = inlined_call_operand.hbm [shape: f32[2,256,128], index: 0, kind: input, shape index: {}]   ;;  %s4495_s1 = inlined_call_operand.hbm [shape: f32[1,128], index: 1, kind: input, shape index: {}]   ;;  %s4496_s2 = inlined_call_operand.hbm [shape: f32[1,128], index: 2, kind: input, shape index: {}]   ;;  %s4497_s3 = inlined_call_operand.hbm [shape: bf16[128,384], index: 3, kind: input, shape index: {}]   ;;  %s4498_s4 = inlined_call_operand.hbm [shape: f32[1,384], index: 4, kind: input, shape index: {}]   ;;  %s4499_s5 = inlined_call_operand.hbm [shape: bf16[2,4,256,32], index: 5, kind: output, shape index: {0}]   ;;  %s4500_s6 = inlined_call_operand.hbm [shape: bf16[2,4,256,32], index: 6, kind: output, shape index: {1}]   ;;  %s4501_s7 = inlined_call_operand.hbm [shape: bf16[2,4,256,32], index: 7, kind: output, shape index: {2}]  }
   0x1   :  { %4509 = sst [smem:[#allocation29_spill]] %s4495_s1 }
   0x2   :  { %4510 = sst [smem:[#allocation30_spill]] %s4496_s2 }
   0x3   :  { %4511 = sst [smem:[#allocation31_spill]] %s4497_s3 }
   0x4   :  { %4512 = sst [smem:[#allocation32_spill]] %s4498_s4 }
   0x5   :  { %4513 = sst [smem:[#allocation33_spill]] %s4500_s6 }
   0x6   :  { %4514 = sst [smem:[#allocation34_spill]] %s4501_s7 }
   0x7   :  { %13 = vsyncpa [#allocation3], 0 }
   0x8   :  { %15 = vsyncpa [#allocation3 + $0x1], 0 }
   0x9   :  { %16 = vsyncpa [#allocation6], 0 }
   0xa   :  { %17 = vsyncpa [#allocation9], 0 }
   0xb   :  { %18 = vsyncpa [#allocation4], 0 }
   0xc   :  { %20 = vsyncpa [#allocation4 + $0x1], 0 }
   0xd   :  { %21 = vsyncpa [#allocation13], 0 }
   0xe   :  { %23 = vsyncpa [#allocation13 + $0x1], 0  ;;  %s3087_s24 = smov 0   ;;  %s3089_s25 = smov 0  }
   0xf   :  { %s3091_s26 = smov 0   ;;  %s3093_s27 = smov 0  }
  0x10   :  { %s3095_s28 = smov 0   ;;  %s3097_s29 = smov 0  }
  0x11   :  { %s3099_s30 = smov 0   ;;  %s3101_s8 = smov 0  }
  0x12 LB: > { %4515 = sst [smem:[#allocation26_spill]] %s2983_s24  ;;  %s3128_s9 = sadd.s32 4294967295, %s3011_s8   ;;  %s3011_s8 = sphi %s3101_s8, %s29_s8   ;;  %s3007_s30 = sphi %s3099_s30, %s4550_s30   ;;  %s3003_s29 = sphi %s3097_s29, %s4549_s29   ;;  %s2999_s28 = sphi %s3095_s28, %s4548_s28   ;;  %s2995_s27 = sphi %s3093_s27, %s4547_s27   ;;  %s2991_s26 = sphi %s3091_s26, %s4546_s26   ;;  %s2987_s25 = sphi %s3089_s25, %s4545_s25   ;;  %s2983_s24 = sphi %s3087_s24, %s4544_s24  }
  0x13   : > { %s4502_s10 = sadd.s32 4294967294, %s3011_s8   ;;  %p63_p0 = scmp.ne.s32.totalorder %s2987_s25, %s2983_s24 }
  0x14   : > { %p4504_p1 = scmp.eq.s32.totalorder %s3128_s9, 0  ;;  %p179_p3 = scmp.eq.s32.totalorder %s4502_s10, 3 }
  0x15   : > { %p2200_p5 = scmp.ge.s32.totalorder %s3011_s8, 1  ;;  %p242_p7 = scmp.lt.s32.totalorder %s3011_s8, 5 }
  0x16   : > { %p3139_p4 = por %p4504_p1, %p63_p0  ;;  %p3144_p6 = por %p179_p3, %p63_p0 }
  0x17   : > { %p3149_p8 = pnand %p2200_p5, %p242_p7  ;;  %s3013_s14 = smov [#allocation5]  }
  0x18   : > { %s4516_s11 = scalar_select %p3139_p4, 1, 0 }
  0x19   : > { %s4517_s12 = scalar_select %p3144_p6, 1, 0 }
  0x1a   : > { %s4519_s13 = scalar_select %p3149_p8, 1, 0 }
  0x1b   : > { %4518 = sst [smem:[#allocation27_spill]] %s4517_s12  ;;  %s255_s15 = sshll.u32 %s3013_s14, 4  ;;  %s256_s15 = int_to_ptr.vmem [resolvable:$true] %s255_s15 }
  0x1c   : > { %p2589_p9 = pneg %p3149_p8  ;;  %s3014_s16 = smov [#allocation8]  }
  0x1d   : > { %s276_s17 = sshll.u32 %s3014_s16, 4  ;;  %s3015_s19 = smov [#allocation7]   ;;  %s3161_s17 = int_to_ptr.vmem [resolvable:$true] %s276_s17 }
  0x1e   : > { %p3157_p10 = pnand %p2589_p9, %p4504_p1  ;;  %s3163_s20 = sshll.u32 %s3015_s19, 4  ;;  %s267_s20 = int_to_ptr.vmem [resolvable:$true] %s3163_s20 }
  0x1f   : > { %s4521_s1 = sld [smem:[#allocation29_spill]] }
  0x20   : > { %p3173_p12 = pneg %p3157_p10 }
  0x25   : > { %s2787_s23 = scalar_lea.hbm %s4521_s1, 16 }
  0x26   : > { %p2788_p11 = scmp.ne.s32.totalorder %s4521_s1, %s2787_s23  ;;  %p2794_p3 = scmp.lt.u32.totalorder %s2787_s23, %s4521_s1 }
  0x28   : > { %p2790_p13 = pnand %p3173_p12, %p2788_p11 }
  0x2a   : > { %p2791_p0 = pneg %p2790_p13 }
  0x2c   : > { %p2796_p5 = pnand %p2794_p3, %p2791_p0 }
  0x2e   : > { %2799 = shalt.err (!%p2796_p5)
}
  0x2f   : > { %s2800_s21 = scalar_lea.vmem %s256_s15, 16  ;;  %s2807_s10 = scalar_lea.vmem %s256_s15, 32 }
  0x30   : > { %p2801_p7 = scmp.ne.s32.totalorder %s256_s15, %s2800_s21  ;;  %p2808_p2 = scmp.lt.s32.totalorder %s256_s15, %s256_s15 }
  0x31   : > { %p2809_p6 = scmp.lt.s32.totalorder %s2807_s10, %s2800_s21 }
  0x32   : > { %p2803_p9 = pnand %p2801_p7, %p3173_p12 }
  0x33   : > { %p2810_p4 = por %p2809_p6, %p2808_p2 }
  0x34   : > { %p2804_p1 = pneg %p2803_p9 }
  0x36   : > { %p2811_p8 = pnand %p2810_p4, %p2804_p1 }
  0x38   : > { %2814 = shalt.err (!%p2811_p8)
}
  0x39   : > { %2592 = dma.hbm_to_vmem [thread:$0]  (!%p3157_p10), %s4521_s1, 16, %s256_s15, [#allocation6]  }
  0x3a   : > { %s4523_s3 = sld [smem:[#allocation31_spill]] }
  0x40   : > { %s2815_s19 = scalar_lea.hbm %s4523_s3, 3072 }
  0x41   : > { %p2816_p11 = scmp.ne.s32.totalorder %s4523_s3, %s2815_s19  ;;  %p2822_p1 = scmp.lt.u32.totalorder %s2815_s19, %s4523_s3 }
  0x43   : > { %p2818_p13 = pnand %p2816_p11, %p3173_p12 }
  0x45   : > { %p2819_p2 = pneg %p2818_p13 }
  0x47   : > { %p2824_p4 = pnand %p2822_p1, %p2819_p2 }
  0x49   : > { %2827 = shalt.err (!%p2824_p4)
}
  0x4a   : > { %s2828_s15 = scalar_lea.vmem %s3161_s17, 3072  ;;  %p2836_p3 = scmp.lt.s32.totalorder %s3161_s17, %s3161_s17 }
  0x4b   : > { %p2829_p6 = scmp.ne.s32.totalorder %s3161_s17, %s2828_s15  ;;  %p2837_p5 = scmp.lt.s32.totalorder %s2828_s15, %s2828_s15 }
  0x4d   : > { %p2831_p8 = pnand %p2829_p6, %p3173_p12  ;;  %p2838_p7 = por %p2837_p5, %p2836_p3 }
  0x4f   : > { %p2832_p0 = pneg %p2831_p8 }
  0x51   : > { %p2839_p9 = pnand %p2838_p7, %p2832_p0 }
  0x53   : > { %2842 = shalt.err (!%p2839_p9)
}
  0x54   : > { %s3016_s7 = smov 192   ;;  %s3017_s24 = smov 12  }
  0x55   : > { %2598 = dma.hbm_to_vmem [thread:$0]  (!%p3157_p10), %s4523_s3, 3072, %s3161_s17, [#allocation9], %s3016_s7, %s3016_s7, %s3017_s24  }
  0x56   : > { %s4524_s2 = sld [smem:[#allocation30_spill]] }
  0x5c   : > { %s2843_s19 = scalar_lea.hbm %s4524_s2, 16 }
  0x5d   : > { %p2844_p11 = scmp.ne.s32.totalorder %s4524_s2, %s2843_s19  ;;  %p2850_p1 = scmp.lt.u32.totalorder %s2843_s19, %s4524_s2 }
  0x5f   : > { %p2846_p13 = pnand %p2844_p11, %p3173_p12 }
  0x61   : > { %p2847_p2 = pneg %p2846_p13 }
  0x63   : > { %p2852_p4 = pnand %p2850_p1, %p2847_p2 }
  0x65   : > { %2855 = shalt.err (!%p2852_p4)
}
  0x66   : > { %s2856_s22 = scalar_lea.vmem %s267_s20, 16  ;;  %s2863_s17 = scalar_lea.vmem %s267_s20, 32 }
  0x67   : > { %p2857_p6 = scmp.ne.s32.totalorder %s267_s20, %s2856_s22  ;;  %p2864_p3 = scmp.lt.s32.totalorder %s267_s20, %s267_s20 }
  0x68   : > { %p2865_p5 = scmp.lt.s32.totalorder %s2863_s17, %s2856_s22 }
  0x69   : > { %p2859_p8 = pnand %p2857_p6, %p3173_p12 }
  0x6a   : > { %p2866_p7 = por %p2865_p5, %p2864_p3 }
  0x6b   : > { %p2860_p0 = pneg %p2859_p8 }
  0x6d   : > { %p2867_p9 = pnand %p2866_p7, %p2860_p0 }
  0x6f   : > { %2870 = shalt.err (!%p2867_p9)
}
  0x70   : > { %2595 = dma.hbm_to_vmem [thread:$0]  (!%p3157_p10), %s4524_s2, 16, %s267_s20, [#allocation6]  }
  0x71   : > { %s3018_s1 = smov [#allocation10]   ;;  %s4525_s4 = sld [smem:[#allocation32_spill]] }
  0x72   : > { %s290_s14 = sshll.u32 %s3018_s1, 4  ;;  %s291_s14 = int_to_ptr.vmem [resolvable:$true] %s290_s14 }
  0x77   : > { %s2871_s19 = scalar_lea.hbm %s4525_s4, 48 }
  0x78   : > { %p2872_p11 = scmp.ne.s32.totalorder %s4525_s4, %s2871_s19  ;;  %p2878_p1 = scmp.lt.u32.totalorder %s2871_s19, %s4525_s4 }
  0x7a   : > { %p2874_p13 = pnand %p2872_p11, %p3173_p12 }
  0x7c   : > { %p2875_p2 = pneg %p2874_p13 }
  0x7e   : > { %p2880_p4 = pnand %p2878_p1, %p2875_p2 }
  0x80   : > { %2883 = shalt.err (!%p2880_p4)
}
  0x81   : > { %s2884_s20 = scalar_lea.vmem %s291_s14, 48  ;;  %s2891_s17 = scalar_lea.vmem %s291_s14, 64 }
  0x82   : > { %p2885_p6 = scmp.ne.s32.totalorder %s291_s14, %s2884_s20  ;;  %p2892_p3 = scmp.lt.s32.totalorder %s291_s14, %s291_s14 }
  0x83   : > { %p2893_p5 = scmp.lt.s32.totalorder %s2891_s17, %s2884_s20 }
  0x84   : > { %p2887_p8 = pnand %p2885_p6, %p3173_p12 }
  0x85   : > { %p2894_p7 = por %p2893_p5, %p2892_p3 }
  0x86   : > { %p2888_p0 = pneg %p2887_p8 }
  0x88   : > { %p2895_p9 = pnand %p2894_p7, %p2888_p0 }
  0x8a   : > { %2898 = shalt.err (!%p2895_p9)
}
  0x8b   : > { %2601 = dma.hbm_to_vmem [thread:$0]  (!%p3157_p10), %s4525_s4, 48, %s291_s14, [#allocation9]  }
  0x8c   : > { %s38_s16 = sadd.s32 1, %s3003_s29  ;;  %s41_s1 = sadd.s32 1, %s3007_s30 }
  0x8d   : > { %p39_p12 = scmp.ge.s32.totalorder %s38_s16, 2  ;;  %s50_s18 = sadd.s32 1, %s2991_s26 }
  0x8e   : > { %p57_p11 = scmp.ne.s32.totalorder %s2991_s26, %s2987_s25  ;;  %p58_p13 = scmp.eq.s32.totalorder %s3011_s8, 0 }
  0x8f   : > { %s4552_s16 = smov (%p39_p12, %s38_s16), 0  ;;  %s4554_s1 = smov (!%p39_p12, %s41_s1), %s3007_s30 }
  0x90   : > { %4526 = sst [smem:[#allocation28_spill]] %s4552_s16  ;;  %s46_s12 = ssub.s32 %s3003_s29, %s4552_s16 }
  0x91   : > { %p3260_p2 = por %p58_p13, %p57_p11  ;;  %p43_p10 = scmp.ge.s32.totalorder %s4554_s1, 2 }
  0x92   : > { %p4528_p1 = scmp.eq.s32.totalorder %s3128_s9, 3  ;;  %p2620_p6 = scmp.lt.s32.totalorder %s3011_s8, 4 }
  0x93   : > { %s301_s19 = sand.u32 1, %s2991_s26   ;;  %s4556_s1 = smov (%p43_p10, %s4554_s1), 0 }
  0x94   : > { %p3266_p4 = por %p4528_p1, %p57_p11  ;;  %s2206_s21 = sshll.u32 %s301_s19, 7 }
  0x95   : > { %s45_s10 = ssub.s32 %s3007_s30, %s4556_s1  ;;  %s2207_s22 = sshll.u32 %s3003_s29, 4 }
  0x96   : > { %s47_s15 = sor.u32 %s46_s12, %s45_s10  ;;  %s2208_s20 = sshll.u32 %s3007_s30, 5 }
  0x97   : > { %p48_p8 = scmp.eq.s32.totalorder %s47_s15, 0  ;;  %s311_s17 = sadd.s32 %s2208_s20, %s2207_s22 }
  0x98   : > { %s305_s7 = scalar_lea.vmem [#allocation2], %s2206_s21  ;;  %s2209_s3 = sshll.u32 %s311_s17, 7 }
  0x99   : > { %s314_s24 = sshll.u32 %s305_s7, 4  ;;  %s3286_s6 = scalar_lea.hbm %s4494_s0, %s2209_s3  ;;  %s3281_s24 = int_to_ptr.vmem [resolvable:$true] %s314_s24 }
  0x9a   : > { %s3279_s2 = scalar_select %p48_p8, %s2991_s26, %s50_s18  }
  0x9b   : > { %p3292_p0 = pnand %p2620_p6, %p3260_p2  ;;  %s3296_s18 = scalar_lea.sflag [#allocation3], %s301_s19 }
  0x9c   : > { %s2899_s21 = scalar_lea.hbm %s3286_s6, 2048  ;;  %s2904_s16 = scalar_lea.hbm %s4494_s0, 8192 }
  0x9d   : > { %p2900_p3 = scmp.ne.s32.totalorder %s3286_s6, %s2899_s21  ;;  %p2901_p5 = pneg %p3292_p0 }
  0x9e   : > { %p2905_p12 = scmp.lt.u32.totalorder %s3286_s6, %s4494_s0  ;;  %p2906_p11 = scmp.lt.u32.totalorder %s2904_s16, %s2899_s21 }
  0x9f   : > { %p2902_p7 = pnand %p2901_p5, %p2900_p3  ;;  %p2908_p2 = scmp.lt.u32.totalorder %s2899_s21, %s3286_s6 }
  0xa0   : > { %p2907_p13 = por %p2906_p11, %p2905_p12 }
  0xa1   : > { %p2903_p9 = pneg %p2902_p7 }
  0xa2   : > { %p2909_p10 = por %p2908_p2, %p2907_p13 }
  0xa4   : > { %p2910_p1 = pnand %p2909_p10, %p2903_p9 }
  0xa6   : > { %2913 = shalt.err (!%p2910_p1)
}
  0xa7   : > { %s2914_s19 = scalar_lea.vmem %s3281_s24, 2048  ;;  %s3019_s15 = smov [#allocation2]  }
  0xa8   : > { %p2915_p6 = scmp.ne.s32.totalorder %s3281_s24, %s2914_s19  ;;  %s2919_s22 = sshll.u32 %s3019_s15, 4  ;;  %s2920_s22 = int_to_ptr.vmem [resolvable:$false] %s2919_s22 }
  0xa9   : > { %s2921_s20 = scalar_lea.vmem %s2920_s22, 4096  ;;  %p2922_p7 = scmp.lt.s32.totalorder %s3281_s24, %s2920_s22 }
  0xaa   : > { %p2917_p8 = pnand %p2915_p6, %p2901_p5  ;;  %p2923_p12 = scmp.lt.s32.totalorder %s2921_s20, %s2914_s19 }
  0xac   : > { %p2918_p3 = pneg %p2917_p8  ;;  %p2924_p11 = por %p2923_p12, %p2922_p7 }
  0xae   : > { %p2925_p13 = pnand %p2924_p11, %p2918_p3 }
  0xb0   : > { %2928 = shalt.err (!%p2925_p13)
}
  0xb1   : > { %s3020_s17 = smov 128   ;;  %s3021_s7 = smov 8  }
  0xb2   : > { %2605 = dma.hbm_to_vmem [thread:$0]  (!%p3292_p0), %s3286_s6, 2048, %s3281_s24, %s3296_s18, %s3020_s17, %s3020_s17, %s3021_s7  }
  0xb3   : > { %p4531_p5 = scmp.ne.s32.totalorder %s4519_s13, 0 }
  0xb4   : > { %s3327_s21 = sand.u32 (!%p4531_p5), 1, %s2987_s25   ;;  %p4532_p9 = scmp.ne.s32.totalorder (!%p4531_p5), %s4516_s11, 0 }
  0xb5   : > { %326 = sbr.rel (%p4531_p5) target bundleno = 1164 (0x48c), region = 40  ;;  %s2211_s3 = sshll.u32 (!%p4531_p5), %s3327_s21, 7 }
  0xb6   : > { %s329_s4 = scalar_lea.sflag (!%p4531_p5), [#allocation3], %s3327_s21  ;;  %s3331_s16 = scalar_lea.vmem (!%p4531_p5), [#allocation2], %s2211_s3 }
  0xbc   : > { %2962 = dma.done.wait (%p4532_p9), %s329_s4, 2048  }
  0xbd   : > { %2964 = vsyncadd (%p4532_p9), %s329_s4, 4294965248  ;;  %p4533_p0 = scmp.eq.s32.totalorder %s3128_s9, 0 }
  0xbf   : > { %2966 = dma.done.wait (%p4533_p0), [#allocation6], 32   ;;  %p4534_p2 = pmov %p4533_p0 }
  0xc0   : > { %p4535_p10 = pmov %p4533_p0 }
  0xc1   : > { %2968 = vsyncadd (%p4534_p2), [#allocation6], 4294967264 }
  0xc2   : > { %2970 = dma.done.wait (%p4535_p10), [#allocation9], 3120   ;;  %p4536_p1 = pmov %p4533_p0 }
  0xc3   : > { %v394_v0 = vld [vmem:[%s3331_s16] sm:$0xff]  ;;  %v396_v1 = vld [vmem:[%s3331_s16 + $0x10] sm:$0xff]  ;;  %v395_v2 = vld [vmem:[%s3331_s16 + $0x8] sm:$0xff]  ;;  %s3530_s6 = sshll.u32 %s3327_s21, 8  ;;  %vm1108_vm0 = vcmask 257024   ;;  %s3023_s13 = smov 96  }
  0xc4   : > { %2972 = vsyncadd (%p4536_p1), [#allocation9], 4294964176  ;;  %412 = vadd.xlane.f32.xlu0 %v394_v0  ;;  %416 = vadd.xlane.f32.xlu1 %v396_v1  ;;  %v397_v3 = vld [vmem:[%s3331_s16 + $0x18] sm:$0xff]  ;;  %v398_v4 = vld [vmem:[%s3331_s16 + $0x20] sm:$0xff]  ;;  %s3541_s11 = scalar_lea.vmem [#allocation11], %s3530_s6  ;;  %s3548_s24 = scalar_lea.vmem [#allocation12], %s3530_s6 }
  0xc5   : > { %v399_v5 = vld [vmem:[%s3331_s16 + $0x28] sm:$0xff]  ;;  %v3352_v6 = vld [vmem:[%s3331_s16 + $0x30] sm:$0xff]  ;;  %v3355_v7 = vld [vmem:[%s3331_s16 + $0x38] sm:$0xff]  ;;  %s3569_s12 = scalar_lea.vmem [#allocation14], %s3530_s6  ;;  %s3024_s18 = smov 64  }
  0xc6   : > { %v3358_v8 = vld [vmem:[%s3331_s16 + $0x40] sm:$0xff]  ;;  %v3361_v9 = vld [vmem:[%s3331_s16 + $0x48] sm:$0xff]  ;;  %v3368_v10 = vld [vmem:[%s3331_s16 + $0x50] sm:$0xff]  ;;  %s3025_s23 = smov 32   ;;  %s1859_s10 = sand.u32 1, %s3128_s9  }
  0xc7   : > { %v3371_v11 = vld [vmem:[%s3331_s16 + $0x58] sm:$0xff]  ;;  %v3376_v12 = vld [vmem:[%s3331_s16 + $0x60] sm:$0xff]  ;;  %v3379_v13 = vld [vmem:[%s3331_s16 + $0x68] sm:$0xff]  ;;  %s1855_s19 = scalar_lea.sflag [#allocation4], %s3327_s21  ;;  %s4399_s15 = scalar_lea.sflag [#allocation13], %s1859_s10 }
  0xc8   : > { %414 = vadd.xlane.f32.xlu0 %v395_v2  ;;  %418 = vadd.xlane.f32.xlu1 %v397_v3  ;;  %v3384_v14 = vld [vmem:[%s3331_s16 + $0x70] sm:$0xff]  ;;  %v3387_v15 = vld [vmem:[%s3331_s16 + $0x78] sm:$0xff]  ;;  %v2726_v18 = vld [vmem:[#allocation8 + $0x1c] ss:$12 sps:$4 sm:$0xff]  }
  0xc9   : > { %v2723_v16 = vld [vmem:[#allocation8 + $0x4] ss:$12 sps:$4 sm:$0xff]   ;;  %v2725_v17 = vld [vmem:[#allocation8] ss:$12 sps:$4 sm:$0xff]   ;;  %v2728_v19 = vld [vmem:[#allocation8 + $0x8] ss:$12 sps:$4 sm:$0xff]  }
  0xca   : > { %818 = vmatprep.subr.bf16.mxu0 %v2723_v16  ;;  %2515 = vmatprep.subr.bf16.mxu1 %v2728_v19  ;;  %v2729_v58 = vld [vmem:[#allocation8 + $0x18] ss:$12 sps:$4 sm:$0xff]  }
  0xcb   : > { %819 = vmatpush1.bf16.msra.mxu0 %v2725_v17  ;;  %2516 = vmatpush3.bf16.msra.mxu1 %v2728_v19  ;;  %v2736_v19 = vld [vmem:[#allocation8 + $0x38] ss:$12 sps:$4 sm:$0xff]  }
  0xcc   : > { %420 = vadd.xlane.f32.xlu0 %v398_v4  ;;  %422 = vadd.xlane.f32.xlu1 %v399_v5 }
  0xcd   : > { %820 = vmatprep.subr.bf16.mxu0 %v2726_v18  ;;  %v2734_v18 = vld [vmem:[#allocation8 + $0x4c] ss:$12 sps:$4 sm:$0xff]  }
  0xcf   : > { %821 = vmatpush1.bf16.msra.mxu0 %v2729_v58 }
  0xd0   : > { %424 = vadd.xlane.f32.xlu0 %v3352_v6  ;;  %426 = vadd.xlane.f32.xlu1 %v3355_v7 }
  0xd4   : > { %428 = vadd.xlane.f32.xlu0 %v3358_v8  ;;  %430 = vadd.xlane.f32.xlu1 %v3361_v9 }
  0xd8   : > { %432 = vadd.xlane.f32.xlu0 %v3368_v10  ;;  %434 = vadd.xlane.f32.xlu1 %v3371_v11 }
  0xdc   : > { %436 = vadd.xlane.f32.xlu0 %v3376_v12  ;;  %438 = vadd.xlane.f32.xlu1 %v3379_v13 }
  0xe0   : > { %440 = vadd.xlane.f32.xlu0 %v3384_v14  ;;  %442 = vadd.xlane.f32.xlu1 %v3387_v15 }
 0x151   : > { %v413_v20 = vpop.xlane.xlu0 %412  ;;  %v417_v21 = vpop.xlane.xlu1 %416 }
 0x152   : > { %v445_v22 = vmul.f32 0.0078125, %v413_v20  ;;  %v447_v23 = vmul.f32 0.0078125, %v417_v21 }
 0x154   : > { %v3391_v24 = vsub.f32 %v394_v0, %v445_v22  ;;  %v3393_v25 = vsub.f32 %v396_v1, %v447_v23  ;;  %v2730_v0 = vld [vmem:[#allocation8 + $0x34] ss:$12 sps:$4 sm:$0xff]  }
 0x155   : > { %v415_v26 = vpop.xlane.xlu0 %414  ;;  %v419_v27 = vpop.xlane.xlu1 %418  ;;  %v2732_v1 = vld [vmem:[#allocation8 + $0x20] ss:$12 sps:$4 sm:$0xff]   ;;  %822 = vmatprep.subr.bf16.mxu0 %v2730_v0  ;;  %v2737_v22 = vld [vmem:[#allocation8 + $0x48] ss:$12 sps:$4 sm:$0xff]  }
 0x156   : > { %v446_v28 = vmul.f32 0.0078125, %v415_v26  ;;  %v477_v29 = vmul.f32 %v3391_v24, %v3391_v24  ;;  %v448_v30 = vmul.f32 0.0078125, %v419_v27  ;;  %v479_v31 = vmul.f32 %v3393_v25, %v3393_v25  ;;  %2517 = vmatprep.subr.bf16.mxu1 %v2732_v1 }
 0x157   : > { %2518 = vmatpush3.bf16.msra.mxu1 %v2732_v1 }
 0x158   : > { %493 = vadd.xlane.f32.xlu0 %v477_v29  ;;  %v3399_v32 = vsub.f32 %v395_v2, %v446_v28  ;;  %v3401_v33 = vsub.f32 %v397_v3, %v448_v30  ;;  %2519 = vmatprep.subr.bf16.mxu1 %v2736_v19  ;;  %v2738_v29 = vld [vmem:[#allocation8 + $0x64] ss:$12 sps:$4 sm:$0xff]  }
 0x159   : > { %v421_v34 = vpop.xlane.xlu0 %420  ;;  %v423_v35 = vpop.xlane.xlu1 %422  ;;  %v2740_v30 = vld [vmem:[#allocation8 + $0x50] ss:$12 sps:$4 sm:$0xff]  }
 0x15a   : > { %v449_v36 = vmul.f32 0.0078125, %v421_v34  ;;  %v478_v37 = vmul.f32 %v3399_v32, %v3399_v32  ;;  %v450_v38 = vmul.f32 0.0078125, %v423_v35  ;;  %v480_v39 = vmul.f32 %v3401_v33, %v3401_v33 }
 0x15b   : > { %2520 = vmatpush3.bf16.msra.mxu1 %v2736_v19 }
 0x15c   : > { %497 = vadd.xlane.f32.xlu0 %v479_v31  ;;  %495 = vadd.xlane.f32.xlu1 %v478_v37  ;;  %v3407_v40 = vsub.f32 %v398_v4, %v449_v36  ;;  %v3409_v41 = vsub.f32 %v399_v5, %v450_v38  ;;  %v2741_v31 = vld [vmem:[#allocation8 + $0x60] ss:$12 sps:$4 sm:$0xff]   ;;  %v2744_v36 = vld [vmem:[#allocation8 + $0x68] ss:$12 sps:$4 sm:$0xff]   ;;  %v2745_v37 = vld [vmem:[#allocation8 + $0x78] ss:$12 sps:$4 sm:$0xff]  }
 0x15d   : > { %v425_v42 = vpop.xlane.xlu0 %424  ;;  %v427_v43 = vpop.xlane.xlu1 %426  ;;  %2521 = vmatprep.subr.bf16.mxu1 %v2740_v30  ;;  %v2748_v38 = vld [vmem:[#allocation8 + $0x80] ss:$12 sps:$4 sm:$0xff]  }
 0x15e   : > { %v451_v44 = vmul.f32 0.0078125, %v425_v42  ;;  %v481_v45 = vmul.f32 %v3407_v40, %v3407_v40  ;;  %v452_v46 = vmul.f32 0.0078125, %v427_v43  ;;  %v482_v47 = vmul.f32 %v3409_v41, %v3409_v41  ;;  %v2750_v42 = vld [vmem:[#allocation8 + $0xac] ss:$12 sps:$4 sm:$0xff]  }
 0x15f   : > { %2522 = vmatpush3.bf16.msra.mxu1 %v2740_v30  ;;  %v2752_v43 = vld [vmem:[#allocation8 + $0x98] ss:$12 sps:$4 sm:$0xff]  }
 0x160   : > { %499 = vadd.xlane.f32.xlu1 %v480_v39  ;;  %501 = vadd.xlane.f32.xlu0 %v481_v45  ;;  %v3416_v48 = vsub.f32 %v3352_v6, %v451_v44  ;;  %v3419_v49 = vsub.f32 %v3355_v7, %v452_v46  ;;  %v2733_v7 = vld [vmem:[#allocation8 + $0x30] ss:$12 sps:$4 sm:$0xff]   ;;  %v2753_v44 = vld [vmem:[#allocation8 + $0xa8] ss:$12 sps:$4 sm:$0xff]   ;;  %v3022_v46 = vmov 0  }
 0x161   : > { %v429_v50 = vpop.xlane.xlu0 %428  ;;  %v431_v51 = vpop.xlane.xlu1 %430  ;;  %823 = vmatpush1.bf16.msra.mxu0 %v2733_v7  ;;  %2523 = vmatprep.subr.bf16.mxu1 %v2744_v36  ;;  %v2749_v39 = vld [vmem:[#allocation8 + $0x90] ss:$12 sps:$4 sm:$0xff]  }
 0x162   : > { %v453_v52 = vmul.f32 0.0078125, %v429_v50  ;;  %v483_v53 = vmul.f32 %v3416_v48, %v3416_v48  ;;  %v454_v54 = vmul.f32 0.0078125, %v431_v51  ;;  %v484_v55 = vmul.f32 %v3419_v49, %v3419_v49  ;;  %824 = vmatprep.subr.bf16.mxu0 %v2734_v18  ;;  %v2754_v45 = vld [vmem:[#allocation8 + $0xb0] ss:$12 sps:$4 sm:$0xff]   ;;  %850 = vmatprep.mubr.bf16.mxu0 %v3022_v46 }
 0x163   : > { %2524 = vmatpush3.bf16.msra.mxu1 %v2744_v36 }
 0x164   : > { %503 = vadd.xlane.f32.xlu1 %v482_v47  ;;  %505 = vadd.xlane.f32.xlu0 %v483_v53  ;;  %v3426_v56 = vsub.f32 %v3358_v8, %v453_v52  ;;  %v3429_v57 = vsub.f32 %v3361_v9, %v454_v54 }
 0x165   : > { %v433_v59 = vpop.xlane.xlu0 %432  ;;  %v435_v60 = vpop.xlane.xlu1 %434  ;;  %825 = vmatpush1.bf16.msra.mxu0 %v2737_v22  ;;  %2525 = vmatprep.subr.bf16.mxu1 %v2748_v38  ;;  %v3467_v22 = vld [vmem:[#allocation5] ss:$0 sm:$0xff] }
 0x166   : > { %v455_v61 = vmul.f32 0.0078125, %v433_v59  ;;  %v485_v62 = vmul.f32 %v3426_v56, %v3426_v56  ;;  %v456_v63 = vmul.f32 0.0078125, %v435_v60  ;;  %v486_v2 = vmul.f32 %v3429_v57, %v3429_v57  ;;  %826 = vmatprep.subr.bf16.mxu0 %v2738_v29 }
 0x167   : > { %2526 = vmatpush3.bf16.msra.mxu1 %v2748_v38 }
 0x168   : > { %507 = vadd.xlane.f32.xlu1 %v484_v55  ;;  %509 = vadd.xlane.f32.xlu0 %v485_v62  ;;  %v3436_v3 = vsub.f32 %v3368_v10, %v455_v61  ;;  %v3439_v4 = vsub.f32 %v3371_v11, %v456_v63 }
 0x169   : > { %v437_v5 = vpop.xlane.xlu0 %436  ;;  %v439_v6 = vpop.xlane.xlu1 %438  ;;  %827 = vmatpush1.bf16.msra.mxu0 %v2741_v31  ;;  %2527 = vmatprep.subr.bf16.mxu1 %v2752_v43 }
 0x16a   : > { %v457_v8 = vmul.f32 0.0078125, %v437_v5  ;;  %v487_v9 = vmul.f32 %v3436_v3, %v3436_v3  ;;  %v458_v16 = vmul.f32 0.0078125, %v439_v6  ;;  %v488_v10 = vmul.f32 %v3439_v4, %v3439_v4 }
 0x16b   : > { %2528 = vmatpush3.bf16.msra.mxu1 %v2752_v43 }
 0x16c   : > { %511 = vadd.xlane.f32.xlu1 %v486_v2  ;;  %513 = vadd.xlane.f32.xlu0 %v487_v9  ;;  %v3446_v11 = vsub.f32 %v3376_v12, %v457_v8  ;;  %v3449_v17 = vsub.f32 %v3379_v13, %v458_v16 }
 0x16d   : > { %v441_v20 = vpop.xlane.xlu0 %440  ;;  %v443_v21 = vpop.xlane.xlu1 %442  ;;  %2529 = vmatprep.subr.bf16.mxu1 %v2754_v45 }
 0x16e   : > { %v459_v23 = vmul.f32 0.0078125, %v441_v20  ;;  %v489_v26 = vmul.f32 %v3446_v11, %v3446_v11  ;;  %v460_v27 = vmul.f32 0.0078125, %v443_v21  ;;  %v490_v12 = vmul.f32 %v3449_v17, %v3449_v17 }
 0x16f   : > { %2530 = vmatpush3.bf16.msra.mxu1 %v2754_v45 }
 0x170   : > { %515 = vadd.xlane.f32.xlu1 %v488_v10  ;;  %517 = vadd.xlane.f32.xlu0 %v489_v26  ;;  %v3456_v13 = vsub.f32 %v3384_v14, %v459_v23  ;;  %v3459_v28 = vsub.f32 %v3387_v15, %v460_v27  ;;  %v2742_v14 = vld [vmem:[#allocation8 + $0x7c] ss:$12 sps:$4 sm:$0xff]   ;;  %v2746_v15 = vld [vmem:[#allocation8 + $0x94] ss:$12 sps:$4 sm:$0xff]  }
 0x171   : > { %828 = vmatprep.subr.bf16.mxu0 %v2742_v14 }
 0x172   : > { %v491_v34 = vmul.f32 %v3456_v13, %v3456_v13  ;;  %v492_v35 = vmul.f32 %v3459_v28, %v3459_v28  ;;  %829 = vmatpush1.bf16.msra.mxu0 %v2745_v37 }
 0x173   : > { %830 = vmatprep.subr.bf16.mxu0 %v2746_v15 }
 0x174   : > { %519 = vadd.xlane.f32.xlu1 %v490_v12  ;;  %521 = vadd.xlane.f32.xlu0 %v491_v34 }
 0x176   : > { %831 = vmatpush1.bf16.msra.mxu0 %v2749_v39 }
 0x177   : > { %832 = vmatprep.subr.bf16.mxu0 %v2750_v42 }
 0x178   : > { %523 = vadd.xlane.f32.xlu1 %v492_v35 }
 0x17a   : > { %833 = vmatpush1.bf16.msra.mxu0 %v2753_v44 }
 0x1e5   : > { %v494_v47 = vpop.xlane.xlu0 %493 }
 0x1e6   : > { %v525_v50 = vmul.f32 0.0078125, %v494_v47 }
 0x1e8   : > { %v541_v51 = vadd.f32 1e-05, %v525_v50 }
 0x1e9   : > { %v496_v52 = vpop.xlane.xlu1 %495  ;;  %v498_v53 = vpop.xlane.xlu0 %497 }
 0x1ea   : > { %2755 = vrsqrt.f32 %v541_v51  ;;  %v526_v54 = vmul.f32 0.0078125, %v496_v52  ;;  %v527_v55 = vmul.f32 0.0078125, %v498_v53 }
 0x1ec   : > { %v542_v58 = vadd.f32 1e-05, %v526_v54  ;;  %v543_v59 = vadd.f32 1e-05, %v527_v55 }
 0x1ed   : > { %v500_v60 = vpop.xlane.xlu1 %499  ;;  %v502_v61 = vpop.xlane.xlu0 %501 }
 0x1ee   : > { %2757 = vrsqrt.f32 %v542_v58  ;;  %v528_v62 = vmul.f32 0.0078125, %v500_v60  ;;  %v529_v63 = vmul.f32 0.0078125, %v502_v61 }
 0x1ef   : > { %2759 = vrsqrt.f32 %v543_v59 }
 0x1f0   : > { %v544_v0 = vadd.f32 1e-05, %v528_v62  ;;  %v545_v1 = vadd.f32 1e-05, %v529_v63 }
 0x1f1   : > { %v504_v2 = vpop.xlane.xlu1 %503  ;;  %v506_v5 = vpop.xlane.xlu0 %505 }
 0x1f2   : > { %2761 = vrsqrt.f32 %v544_v0  ;;  %v530_v6 = vmul.f32 0.0078125, %v504_v2  ;;  %v531_v7 = vmul.f32 0.0078125, %v506_v5 }
 0x1f3   : > { %2763 = vrsqrt.f32 %v545_v1 }
 0x1f4   : > { %v2756_v8 = vpop.eup %2755  ;;  %v546_v9 = vadd.f32 1e-05, %v530_v6  ;;  %v547_v16 = vadd.f32 1e-05, %v531_v7 }
 0x1f5   : > { %v508_v10 = vpop.xlane.xlu1 %507  ;;  %v510_v18 = vpop.xlane.xlu0 %509  ;;  %v573_v19 = vmul.f32 %v2756_v8, %v3391_v24  ;;  %v3471_v24 = vld [vmem:[#allocation7] ss:$0 sm:$0xff] }
 0x1f6   : > { %2765 = vrsqrt.f32 %v546_v9  ;;  %v532_v20 = vmul.f32 0.0078125, %v508_v10  ;;  %v533_v21 = vmul.f32 0.0078125, %v510_v18 }
 0x1f7   : > { %2767 = vrsqrt.f32 %v547_v16  ;;  %v595_v34 = vmul.f32 %v3467_v22, %v573_v19 }
 0x1f8   : > { %v2758_v23 = vpop.eup %2757  ;;  %v548_v26 = vadd.f32 1e-05, %v532_v20  ;;  %v549_v27 = vadd.f32 1e-05, %v533_v21 }
 0x1f9   : > { %v2760_v12 = vpop.eup %2759  ;;  %v512_v29 = vpop.xlane.xlu1 %511  ;;  %v574_v31 = vmul.f32 %v2758_v23, %v3399_v32  ;;  %v617_v45 = vadd.f32 %v3471_v24, %v595_v34 }
 0x1fa   : > { %v514_v30 = vpop.xlane.xlu0 %513  ;;  %2769 = vrsqrt.f32 %v548_v26  ;;  %v534_v35 = vmul.f32 0.0078125, %v512_v29  ;;  %v575_v36 = vmul.f32 %v2760_v12, %v3393_v25 }
 0x1fb   : > { %v535_v14 = vmul.f32 0.0078125, %v514_v30  ;;  %2771 = vrsqrt.f32 %v549_v27  ;;  %v596_v37 = vmul.f32 %v3467_v22, %v574_v31 }
 0x1fc   : > { %v2762_v15 = vpop.eup %2761  ;;  %v550_v38 = vadd.f32 1e-05, %v534_v35  ;;  %v597_v42 = vmul.f32 %v3467_v22, %v575_v36 }
 0x1fd   : > { %v551_v39 = vadd.f32 1e-05, %v535_v14  ;;  %v2764_v43 = vpop.eup %2763  ;;  %v516_v44 = vpop.xlane.xlu1 %515  ;;  %v618_v47 = vadd.f32 %v3471_v24, %v596_v37  ;;  %v576_v50 = vmul.f32 %v2762_v15, %v3401_v33 }
 0x1fe   : > { %v518_v32 = vpop.xlane.xlu0 %517  ;;  %2773 = vrsqrt.f32 %v550_v38  ;;  %v536_v51 = vmul.f32 0.0078125, %v516_v44  ;;  %v577_v54 = vmul.f32 %v2764_v43, %v3407_v40  ;;  %v619_v60 = vadd.f32 %v3471_v24, %v597_v42 }
 0x1ff   : > { %v537_v25 = vmul.f32 0.0078125, %v518_v32  ;;  %2775 = vrsqrt.f32 %v551_v39  ;;  %v633_v52 = vpack.c.bf16 %v618_v47, %v617_v45  ;;  %v598_v53 = vmul.f32 %v3467_v22, %v576_v50 }
 0x200   : > { %v2766_v55 = vpop.eup %2765  ;;  %v552_v58 = vadd.f32 1e-05, %v536_v51  ;;  %v599_v1 = vmul.f32 %v3467_v22, %v577_v54 }
 0x201   : > { %v553_v59 = vadd.f32 1e-05, %v537_v25  ;;  %v2768_v61 = vpop.eup %2767  ;;  %v520_v62 = vpop.xlane.xlu1 %519  ;;  %851 = vmatmul.mubr.bf16.vlgmr.msra.gmra.mrb[0].mxu0 %v633_v52  ;;  %2531 = vmatprep.mubr.bf16.mxu1 %v633_v52  ;;  %v620_v33 = vadd.f32 %v3471_v24, %v598_v53  ;;  %v578_v0 = vmul.f32 %v2766_v55, %v3409_v41 }
 0x202   : > { %v522_v63 = vpop.xlane.xlu0 %521  ;;  %2777 = vrsqrt.f32 %v552_v58  ;;  %v538_v2 = vmul.f32 0.0078125, %v520_v62  ;;  %860 = vmatprep.mubr.bf16.mxu0 %v3022_v46  ;;  %v579_v40 = vmul.f32 %v2768_v61, %v3416_v48  ;;  %v621_v19 = vadd.f32 %v3471_v24, %v599_v1 }
 0x203   : > { %v539_v5 = vmul.f32 0.0078125, %v522_v63  ;;  %2779 = vrsqrt.f32 %v553_v59  ;;  %v634_v6 = vpack.c.bf16 %v620_v33, %v619_v60  ;;  %v600_v7 = vmul.f32 %v3467_v22, %v578_v0  ;;  %v673_v33 = vld [vmem:[#allocation10] sm:$0x7] }
 0x204   : > { %v2770_v8 = vpop.eup %2769  ;;  %v554_v9 = vadd.f32 1e-05, %v538_v2  ;;  %v601_v10 = vmul.f32 %v3467_v22, %v579_v40 }
 0x205   : > { %v555_v16 = vadd.f32 1e-05, %v539_v5  ;;  %v2772_v18 = vpop.eup %2771  ;;  %v524_v41 = vpop.xlane.xlu1 %523  ;;  %2532 = vmatmul.mubr.bf16.vlgmr.msra.gmra.mrb[0].mxu1 %v634_v6  ;;  %v622_v20 = vadd.f32 %v3471_v24, %v600_v7  ;;  %v580_v21 = vmul.f32 %v2770_v8, %v3419_v49 }
 0x206   : > { %2781 = vrsqrt.f32 %v554_v9  ;;  %v540_v48 = vmul.f32 0.0078125, %v524_v41  ;;  %v581_v23 = vmul.f32 %v2772_v18, %v3426_v56  ;;  %v623_v30 = vadd.f32 %v3471_v24, %v601_v10 }
 0x207   : > { %2783 = vrsqrt.f32 %v555_v16  ;;  %v635_v26 = vpack.c.bf16 %v622_v20, %v621_v19  ;;  %v602_v27 = vmul.f32 %v3467_v22, %v580_v21 }
 0x208   : > { %v2774_v12 = vpop.eup %2773  ;;  %v556_v29 = vadd.f32 1e-05, %v540_v48  ;;  %v603_v49 = vmul.f32 %v3467_v22, %v581_v23 }
 0x209   : > { %v2776_v31 = vpop.eup %2775  ;;  %861 = vmatmul.mubr.bf16.gmra.mrb[4].mxu0 %v634_v6  ;;  %2535 = vmatprep.mubr.bf16.mxu1 %v635_v26  ;;  %v624_v34 = vadd.f32 %v3471_v24, %v602_v27  ;;  %v582_v35 = vmul.f32 %v2774_v12, %v3429_v57 }
 0x20a   : > { %2785 = vrsqrt.f32 %v556_v29  ;;  %870 = vmatprep.mubr.bf16.mxu0 %v3022_v46  ;;  %v583_v56 = vmul.f32 %v2776_v31, %v3436_v3  ;;  %v625_v39 = vadd.f32 %v3471_v24, %v603_v49 }
 0x20b   : > { %v636_v14 = vpack.c.bf16 %v624_v34, %v623_v30  ;;  %v604_v36 = vmul.f32 %v3467_v22, %v582_v35 }
 0x20c   : > { %v2778_v37 = vpop.eup %2777  ;;  %v605_v15 = vmul.f32 %v3467_v22, %v583_v56 }
 0x20d   : > { %v2780_v38 = vpop.eup %2779  ;;  %2536 = vmatmul.mubr.bf16.gmra.mrb[4].mxu1 %v636_v14  ;;  %v626_v42 = vadd.f32 %v3471_v24, %v604_v36  ;;  %v584_v57 = vmul.f32 %v2778_v37, %v3439_v4 }
 0x20e   : > { %v585_v43 = vmul.f32 %v2780_v38, %v3446_v11  ;;  %v627_v45 = vadd.f32 %v3471_v24, %v605_v15 }
 0x20f   : > { %v637_v44 = vpack.c.bf16 %v626_v42, %v625_v39  ;;  %v606_v32 = vmul.f32 %v3467_v22, %v584_v57 }
 0x210   : > { %v2782_v3 = vpop.eup %2781  ;;  %v607_v25 = vmul.f32 %v3467_v22, %v585_v43 }
 0x211   : > { %v2784_v47 = vpop.eup %2783  ;;  %871 = vmatmul.mubr.bf16.gmra.mrb[8].mxu0 %v635_v26  ;;  %2539 = vmatprep.mubr.bf16.mxu1 %v637_v44  ;;  %v628_v50 = vadd.f32 %v3471_v24, %v606_v32  ;;  %v586_v51 = vmul.f32 %v2782_v3, %v3449_v17 }
 0x212   : > { %880 = vmatprep.mubr.bf16.mxu0 %v3022_v46  ;;  %v587_v4 = vmul.f32 %v2784_v47, %v3456_v13  ;;  %v629_v54 = vadd.f32 %v3471_v24, %v607_v25 }
 0x213   : > { %v638_v11 = vpack.c.bf16 %v628_v50, %v627_v45  ;;  %v608_v52 = vmul.f32 %v3467_v22, %v586_v51 }
 0x214   : > { %v2786_v53 = vpop.eup %2785  ;;  %v609_v59 = vmul.f32 %v3467_v22, %v587_v4 }
 0x215   : > { %2540 = vmatmul.mubr.bf16.gmra.mrb[8].mxu1 %v638_v11  ;;  %v630_v55 = vadd.f32 %v3471_v24, %v608_v52  ;;  %v588_v58 = vmul.f32 %v2786_v53, %v3459_v28  ;;  %v675_v28 = vlaneseq }
 0x216   : > { %v631_v13 = vadd.f32 %v3471_v24, %v609_v59 }
 0x217   : > { %v639_v17 = vpack.c.bf16 %v630_v55, %v629_v54  ;;  %v610_v60 = vmul.f32 %v3467_v22, %v588_v58  ;;  %v676_v22 = vshrl.u32 %v675_v28, 7 }
 0x219   : > { %881 = vmatmul.mubr.bf16.gmra.mrb[12].mxu0 %v636_v14  ;;  %2543 = vmatprep.mubr.bf16.mxu1 %v639_v17  ;;  %v632_v61 = vadd.f32 %v3471_v24, %v610_v60  ;;  %v677_v63 = vsub.s32 0, %v676_v22  ;;  %v681_v24 = vsub.s32 1, %v676_v22  ;;  %v685_v1 = vsub.s32 2, %v676_v22 }
 0x21a   : > { %890 = vmatprep.mubr.bf16.mxu0 %v3022_v46 }
 0x21b   : > { %v640_v62 = vpack.c.bf16 %v632_v61, %v631_v13  ;;  %v3525_v0 = vrot.slane %v673_v33, %v677_v63  ;;  %v3527_v2 = vrot.slane %v673_v33, %v681_v24  ;;  %v3533_v7 = vrot.slane %v673_v33, %v685_v1 }
 0x21d   : > { %2544 = vmatmul.mubr.bf16.gmra.mrb[12].mxu1 %v640_v62 }
 0x221   : > { %891 = vmatmul.mubr.bf16.gmra.mrb[16].mxu0 %v637_v44 }
 0x222   : > { %900 = vmatprep.mubr.bf16.mxu0 %v3022_v46 }
 0x229   : > { %901 = vmatmul.mubr.bf16.gmra.mrb[20].mxu0 %v638_v11 }
 0x22a   : > { %910 = vmatprep.mubr.bf16.mxu0 %v3022_v46 }
 0x231   : > { %911 = vmatmul.mubr.bf16.gmra.mrb[24].mxu0 %v639_v17 }
 0x232   : > { %920 = vmatprep.mubr.bf16.mxu0 %v3022_v46 }
 0x239   : > { %921 = vmatmul.mubr.bf16.gmra.mrb[28].mxu0 %v640_v62 }
 0x2d4   : > { %v852_v5 = vpop.f32.mrb[0].mxu0 }
 0x2d5   : > { %v853_v40 = vadd.f32 %v852_v5, %v3525_v0  ;;  %v854_v6 = vpop.f32.mrb[1].mxu0 }
 0x2d6   : > { %v855_v46 = vadd.f32 %v854_v6, %v3527_v2  ;;  %v856_v8 = vpop.f32.mrb[2].mxu0 }
 0x2d7   : > { %v2451_v9 = vpack.c.bf16 %v853_v40, %v853_v40  ;;  %v857_v16 = vadd.f32 %v856_v8, %v3525_v0  ;;  %v858_v10 = vpop.f32.mrb[3].mxu0 }
 0x2d8   : > { %v3537_v18 = vpack.c.bf16 %v855_v46, %v855_v46  ;;  %v859_v41 = vadd.f32 %v858_v10, %v3527_v2  ;;  %v2533_v19 = vpop.f32.mrb[0].mxu1 }
 0x2d9   : > { %1109 = vst.msk [vmem:[%s3541_s11] sm:$0xf] %vm1108_vm0, %v2451_v9  ;;  %v2452_v20 = vpack.c.bf16 %v857_v16, %v857_v16  ;;  %v974_v21 = vadd.f32 %v2533_v19, %v3533_v7  ;;  %1269 = vrot.lane.b32.xlu0 %v2451_v9, %s3023_s13  ;;  %v965_v48 = vpop.f32.mrb[1].mxu1 }
 0x2da   : > { %1181 = vst.msk [vmem:[%s3548_s24] sm:$0xf] %vm1108_vm0, %v3537_v18  ;;  %v3553_v23 = vpack.c.bf16 %v859_v41, %v859_v41  ;;  %v966_v26 = vadd.f32 %v965_v48, %v3533_v7  ;;  %v2534_v27 = vpop.f32.mrb[2].mxu1 }
 0x2db   : > { %1110 = vst.msk [vmem:[%s3541_s11 + $0x4] sm:$0xf] %vm1108_vm0, %v2452_v20  ;;  %v3558_v12 = vpack.c.bf16 %v974_v21, %v974_v21  ;;  %v977_v29 = vadd.f32 %v2534_v27, %v3533_v7  ;;  %1271 = vrot.lane.b32.xlu1 %v2452_v20, %s3023_s13  ;;  %v968_v30 = vpop.f32.mrb[3].mxu1 }
 0x2dc   : > { %1182 = vst.msk [vmem:[%s3548_s24 + $0x4] sm:$0xf] %vm1108_vm0, %v3553_v23  ;;  %v3565_v31 = vpack.c.bf16 %v966_v26, %v966_v26  ;;  %v969_v34 = vadd.f32 %v968_v30, %v3533_v7  ;;  %v862_v35 = vpop.f32.mrb[4].mxu0 }
 0x2dd   : > { %1255 = vst.msk [vmem:[%s3569_s12 + $0x8] sm:$0xf] %vm1108_vm0, %v3558_v12  ;;  %v3574_v49 = vpack.c.bf16 %v977_v29, %v977_v29  ;;  %v863_v56 = vadd.f32 %v862_v35, %v3525_v0  ;;  %1464 = vrot.lane.b32.xlu0 %v2451_v9, %s3024_s18  ;;  %v864_v14 = vpop.f32.mrb[5].mxu0 }
 0x2de   : > { %1253 = vst.msk [vmem:[%s3569_s12] sm:$0xf] %vm1108_vm0, %v3565_v31  ;;  %v3581_v36 = vpack.c.bf16 %v969_v34, %v969_v34  ;;  %v865_v37 = vadd.f32 %v864_v14, %v3527_v2  ;;  %v866_v15 = vpop.f32.mrb[6].mxu0 }
 0x2df   : > { %1256 = vst.msk [vmem:[%s3569_s12 + $0xc] sm:$0xf] %vm1108_vm0, %v3574_v49  ;;  %v3587_v38 = vpack.c.bf16 %v863_v56, %v863_v56  ;;  %v867_v39 = vadd.f32 %v866_v15, %v3525_v0  ;;  %1466 = vrot.lane.b32.xlu1 %v2452_v20, %s3024_s18  ;;  %v868_v42 = vpop.f32.mrb[7].mxu0 }
 0x2e0   : > { %1254 = vst.msk [vmem:[%s3569_s12 + $0x4] sm:$0xf] %vm1108_vm0, %v3581_v36  ;;  %v3594_v57 = vpack.c.bf16 %v865_v37, %v865_v37  ;;  %v869_v43 = vadd.f32 %v868_v42, %v3527_v2  ;;  %v2537_v44 = vpop.f32.mrb[4].mxu1 }
 0x2e1   : > { %1111 = vst.msk [vmem:[%s3541_s11 + $0x8] sm:$0xf] %vm1108_vm0, %v3587_v38  ;;  %v3600_v32 = vpack.c.bf16 %v867_v39, %v867_v39  ;;  %v990_v3 = vadd.f32 %v2537_v44, %v3533_v7  ;;  %1659 = vrot.lane.b32.xlu0 %v2451_v9, %s3025_s23  ;;  %v981_v45 = vpop.f32.mrb[5].mxu1 }
 0x2e2   : > { %1183 = vst.msk [vmem:[%s3548_s24 + $0x8] sm:$0xf] %vm1108_vm0, %v3594_v57  ;;  %v3607_v47 = vpack.c.bf16 %v869_v43, %v869_v43  ;;  %v982_v50 = vadd.f32 %v981_v45, %v3533_v7  ;;  %v2538_v51 = vpop.f32.mrb[6].mxu1 }
 0x2e3   : > { %1112 = vst.msk [vmem:[%s3541_s11 + $0xc] sm:$0xf] %vm1108_vm0, %v3600_v32  ;;  %v3613_v25 = vpack.c.bf16 %v990_v3, %v990_v3  ;;  %v993_v4 = vadd.f32 %v2538_v51, %v3533_v7  ;;  %1661 = vrot.lane.b32.xlu1 %v2452_v20, %s3025_s23  ;;  %v984_v11 = vpop.f32.mrb[7].mxu1 }
 0x2e4   : > { %1184 = vst.msk [vmem:[%s3548_s24 + $0xc] sm:$0xf] %vm1108_vm0, %v3607_v47  ;;  %v3620_v52 = vpack.c.bf16 %v982_v50, %v982_v50  ;;  %v985_v53 = vadd.f32 %v984_v11, %v3533_v7  ;;  %v872_v54 = vpop.f32.mrb[8].mxu0 }
 0x2e5   : > { %1259 = vst.msk [vmem:[%s3569_s12 + $0x18] sm:$0xf] %vm1108_vm0, %v3613_v25  ;;  %v3626_v55 = vpack.c.bf16 %v993_v4, %v993_v4  ;;  %v873_v58 = vadd.f32 %v872_v54, %v3525_v0  ;;  %1334 = vrot.lane.b32.xlu0 %v3537_v18, %s3023_s13  ;;  %v874_v59 = vpop.f32.mrb[9].mxu0 }
 0x2e6   : > { %1257 = vst.msk [vmem:[%s3569_s12 + $0x10] sm:$0xf] %vm1108_vm0, %v3620_v52  ;;  %v3634_v17 = vpack.c.bf16 %v985_v53, %v985_v53  ;;  %v875_v60 = vadd.f32 %v874_v59, %v3527_v2  ;;  %v876_v13 = vpop.f32.mrb[10].mxu0 }
 0x2e7   : > { %1260 = vst.msk [vmem:[%s3569_s12 + $0x1c] sm:$0xf] %vm1108_vm0, %v3626_v55  ;;  %v3640_v61 = vpack.c.bf16 %v873_v58, %v873_v58  ;;  %v877_v62 = vadd.f32 %v876_v13, %v3525_v0  ;;  %1336 = vrot.lane.b32.xlu1 %v3553_v23, %s3023_s13  ;;  %v878_v28 = vpop.f32.mrb[11].mxu0 }
 0x2e8   : > { %1258 = vst.msk [vmem:[%s3569_s12 + $0x14] sm:$0xf] %vm1108_vm0, %v3634_v17  ;;  %v3648_v22 = vpack.c.bf16 %v875_v60, %v875_v60  ;;  %v879_v63 = vadd.f32 %v878_v28, %v3527_v2  ;;  %v2541_v33 = vpop.f32.mrb[8].mxu1 }
 0x2e9   : > { %1113 = vst.msk [vmem:[%s3541_s11 + $0x10] sm:$0xf] %vm1108_vm0, %v3640_v61  ;;  %v3654_v24 = vpack.c.bf16 %v877_v62, %v877_v62  ;;  %v1006_v1 = vadd.f32 %v2541_v33, %v3533_v7  ;;  %1403 = vrot.lane.b32.xlu0 %v3558_v12, %s3023_s13  ;;  %v997_v5 = vpop.f32.mrb[9].mxu1 }
 0x2ea   : > { %1185 = vst.msk [vmem:[%s3548_s24 + $0x10] sm:$0xf] %vm1108_vm0, %v3648_v22  ;;  %v3662_v40 = vpack.c.bf16 %v879_v63, %v879_v63  ;;  %v998_v6 = vadd.f32 %v997_v5, %v3533_v7  ;;  %v2542_v46 = vpop.f32.mrb[10].mxu1 }
 0x2eb   : > { %1114 = vst.msk [vmem:[%s3541_s11 + $0x14] sm:$0xf] %vm1108_vm0, %v3654_v24  ;;  %v3668_v8 = vpack.c.bf16 %v1006_v1, %v1006_v1  ;;  %v1009_v9 = vadd.f32 %v2542_v46, %v3533_v7  ;;  %1405 = vrot.lane.b32.xlu1 %v3574_v49, %s3023_s13  ;;  %v1000_v16 = vpop.f32.mrb[11].mxu1 }
 0x2ec   : > { %1186 = vst.msk [vmem:[%s3548_s24 + $0x14] sm:$0xf] %vm1108_vm0, %v3662_v40  ;;  %v3676_v10 = vpack.c.bf16 %v998_v6, %v998_v6  ;;  %v1001_v41 = vadd.f32 %v1000_v16, %v3533_v7  ;;  %v882_v19 = vpop.f32.mrb[12].mxu0 }
 0x2ed   : > { %1263 = vst.msk [vmem:[%s3569_s12 + $0x28] sm:$0xf] %vm1108_vm0, %v3668_v8  ;;  %v3682_v20 = vpack.c.bf16 %v1009_v9, %v1009_v9  ;;  %v883_v21 = vadd.f32 %v882_v19, %v3525_v0  ;;  %1529 = vrot.lane.b32.xlu0 %v3537_v18, %s3024_s18  ;;  %v884_v48 = vpop.f32.mrb[13].mxu0 }
 0x2ee   : > { %1261 = vst.msk [vmem:[%s3569_s12 + $0x20] sm:$0xf] %vm1108_vm0, %v3676_v10  ;;  %v3690_v26 = vpack.c.bf16 %v1001_v41, %v1001_v41  ;;  %v885_v27 = vadd.f32 %v884_v48, %v3527_v2  ;;  %v886_v29 = vpop.f32.mrb[14].mxu0 }
 0x2ef   : > { %1264 = vst.msk [vmem:[%s3569_s12 + $0x2c] sm:$0xf] %vm1108_vm0, %v3682_v20  ;;  %v3696_v30 = vpack.c.bf16 %v883_v21, %v883_v21  ;;  %v887_v34 = vadd.f32 %v886_v29, %v3525_v0  ;;  %1531 = vrot.lane.b32.xlu1 %v3553_v23, %s3024_s18  ;;  %v888_v35 = vpop.f32.mrb[15].mxu0 }
 0x2f0   : > { %1262 = vst.msk [vmem:[%s3569_s12 + $0x24] sm:$0xf] %vm1108_vm0, %v3690_v26  ;;  %v3704_v56 = vpack.c.bf16 %v885_v27, %v885_v27  ;;  %v889_v14 = vadd.f32 %v888_v35, %v3527_v2  ;;  %v2545_v37 = vpop.f32.mrb[12].mxu1 }
 0x2f1   : > { %1115 = vst.msk [vmem:[%s3541_s11 + $0x18] sm:$0xf] %vm1108_vm0, %v3696_v30  ;;  %v3710_v15 = vpack.c.bf16 %v887_v34, %v887_v34  ;;  %v1022_v39 = vadd.f32 %v2545_v37, %v3533_v7  ;;  %1598 = vrot.lane.b32.xlu0 %v3558_v12, %s3024_s18  ;;  %v1013_v42 = vpop.f32.mrb[13].mxu1 }
 0x2f2   : > { %1187 = vst.msk [vmem:[%s3548_s24 + $0x18] sm:$0xf] %vm1108_vm0, %v3704_v56  ;;  %v3718_v43 = vpack.c.bf16 %v889_v14, %v889_v14  ;;  %v1014_v44 = vadd.f32 %v1013_v42, %v3533_v7  ;;  %v2546_v3 = vpop.f32.mrb[14].mxu1 }
 0x2f3   : > { %1116 = vst.msk [vmem:[%s3541_s11 + $0x1c] sm:$0xf] %vm1108_vm0, %v3710_v15  ;;  %v3724_v45 = vpack.c.bf16 %v1022_v39, %v1022_v39  ;;  %v1025_v50 = vadd.f32 %v2546_v3, %v3533_v7  ;;  %1600 = vrot.lane.b32.xlu1 %v3574_v49, %s3024_s18  ;;  %v1016_v51 = vpop.f32.mrb[15].mxu1 }
 0x2f4   : > { %1188 = vst.msk [vmem:[%s3548_s24 + $0x1c] sm:$0xf] %vm1108_vm0, %v3718_v43  ;;  %v3732_v4 = vpack.c.bf16 %v1014_v44, %v1014_v44  ;;  %v1017_v11 = vadd.f32 %v1016_v51, %v3533_v7  ;;  %v892_v53 = vpop.f32.mrb[16].mxu0 }
 0x2f5   : > { %1267 = vst.msk [vmem:[%s3569_s12 + $0x38] sm:$0xf] %vm1108_vm0, %v3724_v45  ;;  %v3738_v54 = vpack.c.bf16 %v1025_v50, %v1025_v50  ;;  %v893_v58 = vadd.f32 %v892_v53, %v3525_v0  ;;  %1724 = vrot.lane.b32.xlu0 %v3537_v18, %s3025_s23  ;;  %v894_v59 = vpop.f32.mrb[17].mxu0 }
 0x2f6   : > { %1265 = vst.msk [vmem:[%s3569_s12 + $0x30] sm:$0xf] %vm1108_vm0, %v3732_v4  ;;  %v3746_v60 = vpack.c.bf16 %v1017_v11, %v1017_v11  ;;  %v895_v7 = vadd.f32 %v894_v59, %v3527_v2  ;;  %v896_v13 = vpop.f32.mrb[18].mxu0 }
 0x2f7   : > { %1268 = vst.msk [vmem:[%s3569_s12 + $0x3c] sm:$0xf] %vm1108_vm0, %v3738_v54  ;;  %v3752_v62 = vpack.c.bf16 %v893_v58, %v893_v58  ;;  %v897_v28 = vadd.f32 %v896_v13, %v3525_v0  ;;  %1726 = vrot.lane.b32.xlu1 %v3553_v23, %s3025_s23  ;;  %v898_v18 = vpop.f32.mrb[19].mxu0 }
 0x2f8   : > { %1266 = vst.msk [vmem:[%s3569_s12 + $0x34] sm:$0xf] %vm1108_vm0, %v3746_v60  ;;  %v3760_v63 = vpack.c.bf16 %v895_v7, %v895_v7  ;;  %v899_v33 = vadd.f32 %v898_v18, %v3527_v2 }
 0x2f9   : > { %1117 = vst.msk [vmem:[%s3541_s11 + $0x20] sm:$0xf] %vm1108_vm0, %v3752_v62  ;;  %v3766_v1 = vpack.c.bf16 %v897_v28, %v897_v28  ;;  %1793 = vrot.lane.b32.xlu0 %v3558_v12, %s3025_s23 }
 0x2fa   : > { %1189 = vst.msk [vmem:[%s3548_s24 + $0x20] sm:$0xf] %vm1108_vm0, %v3760_v63  ;;  %v3773_v23 = vpack.c.bf16 %v899_v33, %v899_v33 }
 0x2fb   : > { %1118 = vst.msk [vmem:[%s3541_s11 + $0x24] sm:$0xf] %vm1108_vm0, %v3766_v1  ;;  %1795 = vrot.lane.b32.xlu1 %v3574_v49, %s3025_s23 }
 0x2fc   : > { %1190 = vst.msk [vmem:[%s3548_s24 + $0x24] sm:$0xf] %vm1108_vm0, %v3773_v23  ;;  %v902_v5 = vpop.f32.mrb[20].mxu0 }
 0x2fd   : > { %v903_v6 = vadd.f32 %v902_v5, %v3525_v0  ;;  %1399 = vrot.lane.b32.xlu0 %v3565_v31, %s3023_s13  ;;  %v904_v12 = vpop.f32.mrb[21].mxu0 }
 0x2fe   : > { %v905_v46 = vadd.f32 %v904_v12, %v3527_v2  ;;  %v906_v9 = vpop.f32.mrb[22].mxu0 }
 0x2ff   : > { %v3787_v16 = vpack.c.bf16 %v903_v6, %v903_v6  ;;  %v907_v49 = vadd.f32 %v906_v9, %v3525_v0  ;;  %1401 = vrot.lane.b32.xlu1 %v3581_v36, %s3023_s13  ;;  %v908_v41 = vpop.f32.mrb[23].mxu0 }
 0x300   : > { %v3792_v19 = vpack.c.bf16 %v905_v46, %v905_v46  ;;  %v909_v21 = vadd.f32 %v908_v41, %v3527_v2 }
 0x301   : > { %1119 = vst.msk [vmem:[%s3541_s11 + $0x28] sm:$0xf] %vm1108_vm0, %v3787_v16  ;;  %v3798_v48 = vpack.c.bf16 %v907_v49, %v907_v49  ;;  %1594 = vrot.lane.b32.xlu0 %v3565_v31, %s3024_s18 }
 0x302   : > { %1191 = vst.msk [vmem:[%s3548_s24 + $0x28] sm:$0xf] %vm1108_vm0, %v3792_v19  ;;  %v3805_v27 = vpack.c.bf16 %v909_v21, %v909_v21 }
 0x303   : > { %1120 = vst.msk [vmem:[%s3541_s11 + $0x2c] sm:$0xf] %vm1108_vm0, %v3798_v48  ;;  %1596 = vrot.lane.b32.xlu1 %v3581_v36, %s3024_s18 }
 0x304   : > { %1192 = vst.msk [vmem:[%s3548_s24 + $0x2c] sm:$0xf] %vm1108_vm0, %v3805_v27  ;;  %v912_v29 = vpop.f32.mrb[24].mxu0 }
 0x305   : > { %v913_v34 = vadd.f32 %v912_v29, %v3525_v0  ;;  %1789 = vrot.lane.b32.xlu0 %v3565_v31, %s3025_s23  ;;  %v914_v35 = vpop.f32.mrb[25].mxu0 }
 0x306   : > { %v915_v14 = vadd.f32 %v914_v35, %v3527_v2  ;;  %v916_v37 = vpop.f32.mrb[26].mxu0 }
 0x307   : > { %v3819_v39 = vpack.c.bf16 %v913_v34, %v913_v34  ;;  %v917_v42 = vadd.f32 %v916_v37, %v3525_v0  ;;  %1791 = vrot.lane.b32.xlu1 %v3581_v36, %s3025_s23  ;;  %v918_v44 = vpop.f32.mrb[27].mxu0 }
 0x308   : > { %v3824_v3 = vpack.c.bf16 %v915_v14, %v915_v14  ;;  %v919_v50 = vadd.f32 %v918_v44, %v3527_v2 }
 0x309   : > { %1121 = vst.msk [vmem:[%s3541_s11 + $0x30] sm:$0xf] %vm1108_vm0, %v3819_v39  ;;  %v3830_v31 = vpack.c.bf16 %v917_v42, %v917_v42  ;;  %1468 = vrot.lane.b32.xlu0 %v3587_v38, %s3024_s18 }
 0x30a   : > { %1193 = vst.msk [vmem:[%s3548_s24 + $0x30] sm:$0xf] %vm1108_vm0, %v3824_v3  ;;  %v3837_v51 = vpack.c.bf16 %v919_v50, %v919_v50 }
 0x30b   : > { %1122 = vst.msk [vmem:[%s3541_s11 + $0x34] sm:$0xf] %vm1108_vm0, %v3830_v31  ;;  %1273 = vrot.lane.b32.xlu1 %v3587_v38, %s3023_s13 }
 0x30c   : > { %1194 = vst.msk [vmem:[%s3548_s24 + $0x34] sm:$0xf] %vm1108_vm0, %v3837_v51  ;;  %v922_v36 = vpop.f32.mrb[28].mxu0 }
 0x30d   : > { %v923_v11 = vadd.f32 %v922_v36, %v3525_v0  ;;  %1663 = vrot.lane.b32.xlu0 %v3587_v38, %s3025_s23  ;;  %v924_v53 = vpop.f32.mrb[29].mxu0 }
 0x30e   : > { %v925_v58 = vadd.f32 %v924_v53, %v3527_v2  ;;  %v926_v59 = vpop.f32.mrb[30].mxu0 }
 0x30f   : > { %v3851_v7 = vpack.c.bf16 %v923_v11, %v923_v11  ;;  %v927_v13 = vadd.f32 %v926_v59, %v3525_v0  ;;  %1275 = vrot.lane.b32.xlu1 %v3600_v32, %s3023_s13  ;;  %v928_v28 = vpop.f32.mrb[31].mxu0 }
 0x310   : > { %v3856_v18 = vpack.c.bf16 %v925_v58, %v925_v58  ;;  %v929_v33 = vadd.f32 %v928_v28, %v3527_v2 }
 0x311   : > { %1123 = vst.msk [vmem:[%s3541_s11 + $0x38] sm:$0xf] %vm1108_vm0, %v3851_v7  ;;  %v3862_v38 = vpack.c.bf16 %v927_v13, %v927_v13  ;;  %1338 = vrot.lane.b32.xlu0 %v3594_v57, %s3023_s13 }
 0x312   : > { %1195 = vst.msk [vmem:[%s3548_s24 + $0x38] sm:$0xf] %vm1108_vm0, %v3856_v18  ;;  %v3869_v0 = vpack.c.bf16 %v929_v33, %v929_v33 }
 0x313   : > { %1124 = vst.msk [vmem:[%s3541_s11 + $0x3c] sm:$0xf] %vm1108_vm0, %v3862_v38  ;;  %1470 = vrot.lane.b32.xlu1 %v3600_v32, %s3024_s18 }
 0x314   : > { %1196 = vst.msk [vmem:[%s3548_s24 + $0x3c] sm:$0xf] %vm1108_vm0, %v3869_v0 }
 0x315   : > { %1411 = vrot.lane.b32.xlu0 %v3613_v25, %s3023_s13 }
 0x317   : > { %1665 = vrot.lane.b32.xlu1 %v3600_v32, %s3025_s23 }
 0x319   : > { %1533 = vrot.lane.b32.xlu0 %v3594_v57, %s3024_s18 }
 0x31b   : > { %1340 = vrot.lane.b32.xlu1 %v3607_v47, %s3023_s13 }
 0x31d   : > { %1606 = vrot.lane.b32.xlu0 %v3613_v25, %s3024_s18 }
 0x31f   : > { %1413 = vrot.lane.b32.xlu1 %v3626_v55, %s3023_s13 }
 0x321   : > { %1728 = vrot.lane.b32.xlu0 %v3594_v57, %s3025_s23 }
 0x323   : > { %1535 = vrot.lane.b32.xlu1 %v3607_v47, %s3024_s18 }
 0x325   : > { %1801 = vrot.lane.b32.xlu0 %v3613_v25, %s3025_s23 }
 0x327   : > { %1608 = vrot.lane.b32.xlu1 %v3626_v55, %s3024_s18 }
 0x329   : > { %1407 = vrot.lane.b32.xlu0 %v3620_v52, %s3023_s13 }
 0x32b   : > { %1730 = vrot.lane.b32.xlu1 %v3607_v47, %s3025_s23 }
 0x32d   : > { %1602 = vrot.lane.b32.xlu0 %v3620_v52, %s3024_s18 }
 0x32f   : > { %1803 = vrot.lane.b32.xlu1 %v3626_v55, %s3025_s23 }
 0x331   : > { %1797 = vrot.lane.b32.xlu0 %v3620_v52, %s3025_s23 }
 0x333   : > { %1409 = vrot.lane.b32.xlu1 %v3634_v17, %s3023_s13 }
 0x335   : > { %1277 = vrot.lane.b32.xlu0 %v3640_v61, %s3023_s13 }
 0x337   : > { %1604 = vrot.lane.b32.xlu1 %v3634_v17, %s3024_s18 }
 0x339   : > { %1472 = vrot.lane.b32.xlu0 %v3640_v61, %s3024_s18 }
 0x33b   : > { %1799 = vrot.lane.b32.xlu1 %v3634_v17, %s3025_s23 }
 0x33d   : > { %1667 = vrot.lane.b32.xlu0 %v3640_v61, %s3025_s23 }
 0x33f   : > { %1279 = vrot.lane.b32.xlu1 %v3654_v24, %s3023_s13 }
 0x341   : > { %1342 = vrot.lane.b32.xlu0 %v3648_v22, %s3023_s13 }
 0x343   : > { %1474 = vrot.lane.b32.xlu1 %v3654_v24, %s3024_s18 }
 0x345   : > { %1419 = vrot.lane.b32.xlu0 %v3668_v8, %s3023_s13 }
 0x347   : > { %1669 = vrot.lane.b32.xlu1 %v3654_v24, %s3025_s23 }
 0x349   : > { %1537 = vrot.lane.b32.xlu0 %v3648_v22, %s3024_s18 }
 0x34b   : > { %1344 = vrot.lane.b32.xlu1 %v3662_v40, %s3023_s13  ;;  %v1270_v2 = vpop.permute.xlu0 %1269 }
 0x34c   : > { %2293 = vst.msk [vmem:[%s3541_s11 + $0x40] sm:$0xf] %vm1108_vm0, %v1270_v2 }
 0x34d   : > { %v1272_v57 = vpop.permute.xlu1 %1271  ;;  %1614 = vrot.lane.b32.xlu0 %v3668_v8, %s3024_s18 }
 0x34e   : > { %2294 = vst.msk [vmem:[%s3541_s11 + $0x44] sm:$0xf] %vm1108_vm0, %v1272_v57 }
 0x34f   : > { %1421 = vrot.lane.b32.xlu1 %v3682_v20, %s3023_s13  ;;  %v1465_v32 = vpop.permute.xlu0 %1464 }
 0x350   : > { %2341 = vst.msk [vmem:[%s3541_s11 + $0x80] sm:$0xf] %vm1108_vm0, %v1465_v32 }
 0x351   : > { %v1467_v47 = vpop.permute.xlu1 %1466  ;;  %1732 = vrot.lane.b32.xlu0 %v3648_v22, %s3025_s23 }
 0x352   : > { %2342 = vst.msk [vmem:[%s3541_s11 + $0x84] sm:$0xf] %vm1108_vm0, %v1467_v47 }
 0x353   : > { %1539 = vrot.lane.b32.xlu1 %v3662_v40, %s3024_s18  ;;  %v1660_v25 = vpop.permute.xlu0 %1659 }
 0x354   : > { %2389 = vst.msk [vmem:[%s3541_s11 + $0xc0] sm:$0xf] %vm1108_vm0, %v1660_v25 }
 0x355   : > { %v1662_v52 = vpop.permute.xlu1 %1661  ;;  %1809 = vrot.lane.b32.xlu0 %v3668_v8, %s3025_s23 }
 0x356   : > { %2390 = vst.msk [vmem:[%s3541_s11 + $0xc4] sm:$0xf] %vm1108_vm0, %v1662_v52 }
 0x357   : > { %1616 = vrot.lane.b32.xlu1 %v3682_v20, %s3024_s18  ;;  %v1335_v55 = vpop.permute.xlu0 %1334 }
 0x358   : > { %2309 = vst.msk [vmem:[%s3548_s24 + $0x40] sm:$0xf] %vm1108_vm0, %v1335_v55 }
 0x359   : > { %v1337_v17 = vpop.permute.xlu1 %1336  ;;  %1415 = vrot.lane.b32.xlu0 %v3676_v10, %s3023_s13 }
 0x35a   : > { %2310 = vst.msk [vmem:[%s3548_s24 + $0x44] sm:$0xf] %vm1108_vm0, %v1337_v17 }
 0x35b   : > { %1734 = vrot.lane.b32.xlu1 %v3662_v40, %s3025_s23  ;;  %v1404_v61 = vpop.permute.xlu0 %1403 }
 0x35c   : > { %2327 = vst.msk [vmem:[%s3569_s12 + $0x48] sm:$0xf] %vm1108_vm0, %v1404_v61 }
 0x35d   : > { %v1406_v22 = vpop.permute.xlu1 %1405  ;;  %1610 = vrot.lane.b32.xlu0 %v3676_v10, %s3024_s18 }
 0x35e   : > { %2328 = vst.msk [vmem:[%s3569_s12 + $0x4c] sm:$0xf] %vm1108_vm0, %v1406_v22 }
 0x35f   : > { %1811 = vrot.lane.b32.xlu1 %v3682_v20, %s3025_s23  ;;  %v1530_v24 = vpop.permute.xlu0 %1529 }
 0x360   : > { %2357 = vst.msk [vmem:[%s3548_s24 + $0x80] sm:$0xf] %vm1108_vm0, %v1530_v24 }
 0x361   : > { %v1532_v8 = vpop.permute.xlu1 %1531  ;;  %1805 = vrot.lane.b32.xlu0 %v3676_v10, %s3025_s23 }
 0x362   : > { %2358 = vst.msk [vmem:[%s3548_s24 + $0x84] sm:$0xf] %vm1108_vm0, %v1532_v8 }
 0x363   : > { %1417 = vrot.lane.b32.xlu1 %v3690_v26, %s3023_s13  ;;  %v1599_v40 = vpop.permute.xlu0 %1598 }
 0x364   : > { %2375 = vst.msk [vmem:[%s3569_s12 + $0x88] sm:$0xf] %vm1108_vm0, %v1599_v40 }
 0x365   : > { %v1601_v5 = vpop.permute.xlu1 %1600  ;;  %1281 = vrot.lane.b32.xlu0 %v3696_v30, %s3023_s13 }
 0x366   : > { %2376 = vst.msk [vmem:[%s3569_s12 + $0x8c] sm:$0xf] %vm1108_vm0, %v1601_v5 }
 0x367   : > { %1612 = vrot.lane.b32.xlu1 %v3690_v26, %s3024_s18  ;;  %v1725_v10 = vpop.permute.xlu0 %1724 }
 0x368   : > { %2405 = vst.msk [vmem:[%s3548_s24 + $0xc0] sm:$0xf] %vm1108_vm0, %v1725_v10 }
 0x369   : > { %v1727_v20 = vpop.permute.xlu1 %1726  ;;  %1476 = vrot.lane.b32.xlu0 %v3696_v30, %s3024_s18 }
 0x36a   : > { %2406 = vst.msk [vmem:[%s3548_s24 + $0xc4] sm:$0xf] %vm1108_vm0, %v1727_v20 }
 0x36b   : > { %1807 = vrot.lane.b32.xlu1 %v3690_v26, %s3025_s23  ;;  %v1794_v6 = vpop.permute.xlu0 %1793 }
 0x36c   : > { %2423 = vst.msk [vmem:[%s3569_s12 + $0xc8] sm:$0xf] %vm1108_vm0, %v1794_v6 }
 0x36d   : > { %v1796_v12 = vpop.permute.xlu1 %1795  ;;  %1671 = vrot.lane.b32.xlu0 %v3696_v30, %s3025_s23 }
 0x36e   : > { %2424 = vst.msk [vmem:[%s3569_s12 + $0xcc] sm:$0xf] %vm1108_vm0, %v1796_v12 }
 0x36f   : > { %1283 = vrot.lane.b32.xlu1 %v3710_v15, %s3023_s13  ;;  %v1400_v46 = vpop.permute.xlu0 %1399 }
 0x370   : > { %2325 = vst.msk [vmem:[%s3569_s12 + $0x40] sm:$0xf] %vm1108_vm0, %v1400_v46 }
 0x371   : > { %v1402_v9 = vpop.permute.xlu1 %1401  ;;  %1346 = vrot.lane.b32.xlu0 %v3704_v56, %s3023_s13 }
 0x372   : > { %2326 = vst.msk [vmem:[%s3569_s12 + $0x44] sm:$0xf] %vm1108_vm0, %v1402_v9 }
 0x373   : > { %1478 = vrot.lane.b32.xlu1 %v3710_v15, %s3024_s18  ;;  %v1595_v26 = vpop.permute.xlu0 %1594 }
 0x374   : > { %2373 = vst.msk [vmem:[%s3569_s12 + $0x80] sm:$0xf] %vm1108_vm0, %v1595_v26 }
 0x375   : > { %v1597_v30 = vpop.permute.xlu1 %1596  ;;  %1427 = vrot.lane.b32.xlu0 %v3724_v45, %s3023_s13 }
 0x376   : > { %2374 = vst.msk [vmem:[%s3569_s12 + $0x84] sm:$0xf] %vm1108_vm0, %v1597_v30 }
 0x377   : > { %1673 = vrot.lane.b32.xlu1 %v3710_v15, %s3025_s23  ;;  %v1790_v49 = vpop.permute.xlu0 %1789 }
 0x378   : > { %2421 = vst.msk [vmem:[%s3569_s12 + $0xc0] sm:$0xf] %vm1108_vm0, %v1790_v49 }
 0x379   : > { %v1792_v41 = vpop.permute.xlu1 %1791  ;;  %1541 = vrot.lane.b32.xlu0 %v3704_v56, %s3024_s18 }
 0x37a   : > { %2422 = vst.msk [vmem:[%s3569_s12 + $0xc4] sm:$0xf] %vm1108_vm0, %v1792_v41 }
 0x37b   : > { %1348 = vrot.lane.b32.xlu1 %v3718_v43, %s3023_s13  ;;  %v1469_v21 = vpop.permute.xlu0 %1468 }
 0x37c   : > { %2343 = vst.msk [vmem:[%s3541_s11 + $0x88] sm:$0xf] %vm1108_vm0, %v1469_v21 }
 0x37d   : > { %v1274_v29 = vpop.permute.xlu1 %1273  ;;  %1622 = vrot.lane.b32.xlu0 %v3724_v45, %s3024_s18 }
 0x37e   : > { %2295 = vst.msk [vmem:[%s3541_s11 + $0x48] sm:$0xf] %vm1108_vm0, %v1274_v29 }
 0x37f   : > { %1429 = vrot.lane.b32.xlu1 %v3738_v54, %s3023_s13  ;;  %v1664_v15 = vpop.permute.xlu0 %1663 }
 0x380   : > { %2391 = vst.msk [vmem:[%s3541_s11 + $0xc8] sm:$0xf] %vm1108_vm0, %v1664_v15 }
 0x381   : > { %v1276_v34 = vpop.permute.xlu1 %1275  ;;  %1736 = vrot.lane.b32.xlu0 %v3704_v56, %s3025_s23 }
 0x382   : > { %2296 = vst.msk [vmem:[%s3541_s11 + $0x4c] sm:$0xf] %vm1108_vm0, %v1276_v34 }
 0x383   : > { %1543 = vrot.lane.b32.xlu1 %v3718_v43, %s3024_s18  ;;  %v1339_v35 = vpop.permute.xlu0 %1338 }
 0x384   : > { %2311 = vst.msk [vmem:[%s3548_s24 + $0x48] sm:$0xf] %vm1108_vm0, %v1339_v35 }
 0x385   : > { %v1471_v14 = vpop.permute.xlu1 %1470  ;;  %1423 = vrot.lane.b32.xlu0 %v3732_v4, %s3023_s13 }
 0x386   : > { %2344 = vst.msk [vmem:[%s3541_s11 + $0x8c] sm:$0xf] %vm1108_vm0, %v1471_v14 }
 0x387   : > { %1624 = vrot.lane.b32.xlu1 %v3738_v54, %s3024_s18  ;;  %v1412_v56 = vpop.permute.xlu0 %1411 }
 0x388   : > { %2331 = vst.msk [vmem:[%s3569_s12 + $0x58] sm:$0xf] %vm1108_vm0, %v1412_v56 }
 0x389   : > { %v1666_v37 = vpop.permute.xlu1 %1665  ;;  %1618 = vrot.lane.b32.xlu0 %v3732_v4, %s3024_s18 }
 0x38a   : > { %2392 = vst.msk [vmem:[%s3541_s11 + $0xcc] sm:$0xf] %vm1108_vm0, %v1666_v37 }
 0x38b   : > { %1738 = vrot.lane.b32.xlu1 %v3718_v43, %s3025_s23  ;;  %v1534_v42 = vpop.permute.xlu0 %1533 }
 0x38c   : > { %2359 = vst.msk [vmem:[%s3548_s24 + $0x88] sm:$0xf] %vm1108_vm0, %v1534_v42 }
 0x38d   : > { %v1341_v44 = vpop.permute.xlu1 %1340  ;;  %1813 = vrot.lane.b32.xlu0 %v3732_v4, %s3025_s23 }
 0x38e   : > { %2312 = vst.msk [vmem:[%s3548_s24 + $0x4c] sm:$0xf] %vm1108_vm0, %v1341_v44 }
 0x38f   : > { %1425 = vrot.lane.b32.xlu1 %v3746_v60, %s3023_s13  ;;  %v1607_v50 = vpop.permute.xlu0 %1606 }
 0x390   : > { %2379 = vst.msk [vmem:[%s3569_s12 + $0x98] sm:$0xf] %vm1108_vm0, %v1607_v50 }
 0x391   : > { %v1414_v36 = vpop.permute.xlu1 %1413  ;;  %1285 = vrot.lane.b32.xlu0 %v3752_v62, %s3023_s13 }
 0x392   : > { %2332 = vst.msk [vmem:[%s3569_s12 + $0x5c] sm:$0xf] %vm1108_vm0, %v1414_v36 }
 0x393   : > { %1620 = vrot.lane.b32.xlu1 %v3746_v60, %s3024_s18  ;;  %v1729_v43 = vpop.permute.xlu0 %1728 }
 0x394   : > { %2407 = vst.msk [vmem:[%s3548_s24 + $0xc8] sm:$0xf] %vm1108_vm0, %v1729_v43 }
 0x395   : > { %v1536_v4 = vpop.permute.xlu1 %1535  ;;  %1480 = vrot.lane.b32.xlu0 %v3752_v62, %s3024_s18 }
 0x396   : > { %2360 = vst.msk [vmem:[%s3548_s24 + $0x8c] sm:$0xf] %vm1108_vm0, %v1536_v4 }
 0x397   : > { %1815 = vrot.lane.b32.xlu1 %v3746_v60, %s3025_s23  ;;  %v1802_v11 = vpop.permute.xlu0 %1801 }
 0x398   : > { %2427 = vst.msk [vmem:[%s3569_s12 + $0xd8] sm:$0xf] %vm1108_vm0, %v1802_v11 }
 0x399   : > { %v1609_v53 = vpop.permute.xlu1 %1608  ;;  %1675 = vrot.lane.b32.xlu0 %v3752_v62, %s3025_s23 }
 0x39a   : > { %2380 = vst.msk [vmem:[%s3569_s12 + $0x9c] sm:$0xf] %vm1108_vm0, %v1609_v53 }
 0x39b   : > { %1287 = vrot.lane.b32.xlu1 %v3766_v1, %s3023_s13  ;;  %v1408_v58 = vpop.permute.xlu0 %1407 }
 0x39c   : > { %2329 = vst.msk [vmem:[%s3569_s12 + $0x50] sm:$0xf] %vm1108_vm0, %v1408_v58 }
 0x39d   : > { %v1731_v59 = vpop.permute.xlu1 %1730  ;;  %1350 = vrot.lane.b32.xlu0 %v3760_v63, %s3023_s13 }
 0x39e   : > { %2408 = vst.msk [vmem:[%s3548_s24 + $0xcc] sm:$0xf] %vm1108_vm0, %v1731_v59 }
 0x39f   : > { %1482 = vrot.lane.b32.xlu1 %v3766_v1, %s3024_s18  ;;  %v1603_v60 = vpop.permute.xlu0 %1602 }
 0x3a0   : > { %2377 = vst.msk [vmem:[%s3569_s12 + $0x90] sm:$0xf] %vm1108_vm0, %v1603_v60 }
 0x3a1   : > { %v1804_v62 = vpop.permute.xlu1 %1803  ;;  %1545 = vrot.lane.b32.xlu0 %v3760_v63, %s3024_s18 }
 0x3a2   : > { %2428 = vst.msk [vmem:[%s3569_s12 + $0xdc] sm:$0xf] %vm1108_vm0, %v1804_v62 }
 0x3a3   : > { %1677 = vrot.lane.b32.xlu1 %v3766_v1, %s3025_s23  ;;  %v1798_v13 = vpop.permute.xlu0 %1797 }
 0x3a4   : > { %2425 = vst.msk [vmem:[%s3569_s12 + $0xd0] sm:$0xf] %vm1108_vm0, %v1798_v13 }
 0x3a5   : > { %v1410_v28 = vpop.permute.xlu1 %1409  ;;  %1740 = vrot.lane.b32.xlu0 %v3760_v63, %s3025_s23 }
 0x3a6   : > { %2330 = vst.msk [vmem:[%s3569_s12 + $0x54] sm:$0xf] %vm1108_vm0, %v1410_v28 }
 0x3a7   : > { %1352 = vrot.lane.b32.xlu1 %v3773_v23, %s3023_s13  ;;  %v1278_v33 = vpop.permute.xlu0 %1277 }
 0x3a8   : > { %2297 = vst.msk [vmem:[%s3541_s11 + $0x50] sm:$0xf] %vm1108_vm0, %v1278_v33 }
 0x3a9   : > { %v1605_v2 = vpop.permute.xlu1 %1604  ;;  %1289 = vrot.lane.b32.xlu0 %v3787_v16, %s3023_s13 }
 0x3aa   : > { %2378 = vst.msk [vmem:[%s3569_s12 + $0x94] sm:$0xf] %vm1108_vm0, %v1605_v2 }
 0x3ab   : > { %1547 = vrot.lane.b32.xlu1 %v3773_v23, %s3024_s18  ;;  %v1473_v63 = vpop.permute.xlu0 %1472 }
 0x3ac   : > { %2345 = vst.msk [vmem:[%s3541_s11 + $0x90] sm:$0xf] %vm1108_vm0, %v1473_v63 }
 0x3ad   : > { %v1800_v1 = vpop.permute.xlu1 %1799  ;;  %1484 = vrot.lane.b32.xlu0 %v3787_v16, %s3024_s18 }
 0x3ae   : > { %2426 = vst.msk [vmem:[%s3569_s12 + $0xd4] sm:$0xf] %vm1108_vm0, %v1800_v1 }
 0x3af   : > { %1742 = vrot.lane.b32.xlu1 %v3773_v23, %s3025_s23  ;;  %v1668_v57 = vpop.permute.xlu0 %1667 }
 0x3b0   : > { %2393 = vst.msk [vmem:[%s3541_s11 + $0xd0] sm:$0xf] %vm1108_vm0, %v1668_v57 }
 0x3b1   : > { %v1280_v32 = vpop.permute.xlu1 %1279  ;;  %1679 = vrot.lane.b32.xlu0 %v3787_v16, %s3025_s23 }
 0x3b2   : > { %2298 = vst.msk [vmem:[%s3541_s11 + $0x54] sm:$0xf] %vm1108_vm0, %v1280_v32 }
 0x3b3   : > { %1291 = vrot.lane.b32.xlu1 %v3798_v48, %s3023_s13  ;;  %v1343_v47 = vpop.permute.xlu0 %1342 }
 0x3b4   : > { %2313 = vst.msk [vmem:[%s3548_s24 + $0x50] sm:$0xf] %vm1108_vm0, %v1343_v47 }
 0x3b5   : > { %v1475_v25 = vpop.permute.xlu1 %1474  ;;  %1354 = vrot.lane.b32.xlu0 %v3792_v19, %s3023_s13 }
 0x3b6   : > { %2346 = vst.msk [vmem:[%s3541_s11 + $0x94] sm:$0xf] %vm1108_vm0, %v1475_v25 }
 0x3b7   : > { %1486 = vrot.lane.b32.xlu1 %v3798_v48, %s3024_s18  ;;  %v1420_v23 = vpop.permute.xlu0 %1419 }
 0x3b8   : > { %2335 = vst.msk [vmem:[%s3569_s12 + $0x68] sm:$0xf] %vm1108_vm0, %v1420_v23 }
 0x3b9   : > { %v1670_v16 = vpop.permute.xlu1 %1669  ;;  %1549 = vrot.lane.b32.xlu0 %v3792_v19, %s3024_s18 }
 0x3ba   : > { %2394 = vst.msk [vmem:[%s3541_s11 + $0xd4] sm:$0xf] %vm1108_vm0, %v1670_v16 }
 0x3bb   : > { %1681 = vrot.lane.b32.xlu1 %v3798_v48, %s3025_s23  ;;  %v1538_v52 = vpop.permute.xlu0 %1537 }
 0x3bc   : > { %2361 = vst.msk [vmem:[%s3548_s24 + $0x90] sm:$0xf] %vm1108_vm0, %v1538_v52 }
 0x3bd   : > { %v1345_v55 = vpop.permute.xlu1 %1344  ;;  %1744 = vrot.lane.b32.xlu0 %v3792_v19, %s3025_s23 }
 0x3be   : > { %2314 = vst.msk [vmem:[%s3548_s24 + $0x54] sm:$0xf] %vm1108_vm0, %v1345_v55 }
 0x3bf   : > { %1356 = vrot.lane.b32.xlu1 %v3805_v27, %s3023_s13  ;;  %v1615_v17 = vpop.permute.xlu0 %1614 }
 0x3c0   : > { %2383 = vst.msk [vmem:[%s3569_s12 + $0xa8] sm:$0xf] %vm1108_vm0, %v1615_v17 }
 0x3c1   : > { %v1422_v61 = vpop.permute.xlu1 %1421  ;;  %1293 = vrot.lane.b32.xlu0 %v3819_v39, %s3023_s13 }
 0x3c2   : > { %2336 = vst.msk [vmem:[%s3569_s12 + $0x6c] sm:$0xf] %vm1108_vm0, %v1422_v61 }
 0x3c3   : > { %1551 = vrot.lane.b32.xlu1 %v3805_v27, %s3024_s18  ;;  %v1733_v19 = vpop.permute.xlu0 %1732 }
 0x3c4   : > { %2409 = vst.msk [vmem:[%s3548_s24 + $0xd0] sm:$0xf] %vm1108_vm0, %v1733_v19 }
 0x3c5   : > { %v1540_v48 = vpop.permute.xlu1 %1539  ;;  %1488 = vrot.lane.b32.xlu0 %v3819_v39, %s3024_s18 }
 0x3c6   : > { %2362 = vst.msk [vmem:[%s3548_s24 + $0x94] sm:$0xf] %vm1108_vm0, %v1540_v48 }
 0x3c7   : > { %1746 = vrot.lane.b32.xlu1 %v3805_v27, %s3025_s23  ;;  %v1810_v22 = vpop.permute.xlu0 %1809 }
 0x3c8   : > { %2431 = vst.msk [vmem:[%s3569_s12 + $0xe8] sm:$0xf] %vm1108_vm0, %v1810_v22 }
 0x3c9   : > { %v1617_v24 = vpop.permute.xlu1 %1616  ;;  %1683 = vrot.lane.b32.xlu0 %v3819_v39, %s3025_s23 }
 0x3ca   : > { %2384 = vst.msk [vmem:[%s3569_s12 + $0xac] sm:$0xf] %vm1108_vm0, %v1617_v24 }
 0x3cb   : > { %1295 = vrot.lane.b32.xlu1 %v3830_v31, %s3023_s13  ;;  %v1416_v8 = vpop.permute.xlu0 %1415 }
 0x3cc   : > { %2333 = vst.msk [vmem:[%s3569_s12 + $0x60] sm:$0xf] %vm1108_vm0, %v1416_v8 }
 0x3cd   : > { %v1735_v40 = vpop.permute.xlu1 %1734  ;;  %1358 = vrot.lane.b32.xlu0 %v3824_v3, %s3023_s13 }
 0x3ce   : > { %2410 = vst.msk [vmem:[%s3548_s24 + $0xd4] sm:$0xf] %vm1108_vm0, %v1735_v40 }
 0x3cf   : > { %1490 = vrot.lane.b32.xlu1 %v3830_v31, %s3024_s18  ;;  %v1611_v27 = vpop.permute.xlu0 %1610 }
 0x3d0   : > { %2381 = vst.msk [vmem:[%s3569_s12 + $0xa0] sm:$0xf] %vm1108_vm0, %v1611_v27 }
 0x3d1   : > { %v1812_v39 = vpop.permute.xlu1 %1811  ;;  %1553 = vrot.lane.b32.xlu0 %v3824_v3, %s3024_s18 }
 0x3d2   : > { %2432 = vst.msk [vmem:[%s3569_s12 + $0xec] sm:$0xf] %vm1108_vm0, %v1812_v39 }
 0x3d3   : > { %1685 = vrot.lane.b32.xlu1 %v3830_v31, %s3025_s23  ;;  %v1806_v5 = vpop.permute.xlu0 %1805 }
 0x3d4   : > { %2429 = vst.msk [vmem:[%s3569_s12 + $0xe0] sm:$0xf] %vm1108_vm0, %v1806_v5 }
 0x3d5   : > { %v1418_v10 = vpop.permute.xlu1 %1417  ;;  %1748 = vrot.lane.b32.xlu0 %v3824_v3, %s3025_s23 }
 0x3d6   : > { %2334 = vst.msk [vmem:[%s3569_s12 + $0x64] sm:$0xf] %vm1108_vm0, %v1418_v10 }
 0x3d7   : > { %1360 = vrot.lane.b32.xlu1 %v3837_v51, %s3023_s13  ;;  %v1282_v20 = vpop.permute.xlu0 %1281 }
 0x3d8   : > { %2299 = vst.msk [vmem:[%s3541_s11 + $0x58] sm:$0xf] %vm1108_vm0, %v1282_v20 }
 0x3d9   : > { %v1613_v6 = vpop.permute.xlu1 %1612  ;;  %1297 = vrot.lane.b32.xlu0 %v3851_v7, %s3023_s13 }
 0x3da   : > { %2382 = vst.msk [vmem:[%s3569_s12 + $0xa4] sm:$0xf] %vm1108_vm0, %v1613_v6 }
 0x3db   : > { %1555 = vrot.lane.b32.xlu1 %v3837_v51, %s3024_s18  ;;  %v1477_v3 = vpop.permute.xlu0 %1476 }
 0x3dc   : > { %2347 = vst.msk [vmem:[%s3541_s11 + $0x98] sm:$0xf] %vm1108_vm0, %v1477_v3 }
 0x3dd   : > { %v1808_v31 = vpop.permute.xlu1 %1807  ;;  %1492 = vrot.lane.b32.xlu0 %v3851_v7, %s3024_s18 }
 0x3de   : > { %2430 = vst.msk [vmem:[%s3569_s12 + $0xe4] sm:$0xf] %vm1108_vm0, %v1808_v31 }
 0x3df   : > { %1750 = vrot.lane.b32.xlu1 %v3837_v51, %s3025_s23  ;;  %v1672_v12 = vpop.permute.xlu0 %1671 }
 0x3e0   : > { %2395 = vst.msk [vmem:[%s3541_s11 + $0xd8] sm:$0xf] %vm1108_vm0, %v1672_v12 }
 0x3e1   : > { %v1284_v46 = vpop.permute.xlu1 %1283  ;;  %1687 = vrot.lane.b32.xlu0 %v3851_v7, %s3025_s23 }
 0x3e2   : > { %2300 = vst.msk [vmem:[%s3541_s11 + $0x5c] sm:$0xf] %vm1108_vm0, %v1284_v46 }
 0x3e3   : > { %1299 = vrot.lane.b32.xlu1 %v3862_v38, %s3023_s13  ;;  %v1347_v9 = vpop.permute.xlu0 %1346 }
 0x3e4   : > { %2315 = vst.msk [vmem:[%s3548_s24 + $0x58] sm:$0xf] %vm1108_vm0, %v1347_v9 }
 0x3e5   : > { %v1479_v51 = vpop.permute.xlu1 %1478  ;;  %1362 = vrot.lane.b32.xlu0 %v3856_v18, %s3023_s13 }
 0x3e6   : > { %2348 = vst.msk [vmem:[%s3541_s11 + $0x9c] sm:$0xf] %vm1108_vm0, %v1479_v51 }
 0x3e7   : > { %1494 = vrot.lane.b32.xlu1 %v3862_v38, %s3024_s18  ;;  %v1428_v7 = vpop.permute.xlu0 %1427 }
 0x3e8   : > { %2339 = vst.msk [vmem:[%s3569_s12 + $0x78] sm:$0xf] %vm1108_vm0, %v1428_v7 }
 0x3e9   : > { %v1674_v26 = vpop.permute.xlu1 %1673  ;;  %1557 = vrot.lane.b32.xlu0 %v3856_v18, %s3024_s18 }
 0x3ea   : > { %2396 = vst.msk [vmem:[%s3541_s11 + $0xdc] sm:$0xf] %vm1108_vm0, %v1674_v26 }
 0x3eb   : > { %1689 = vrot.lane.b32.xlu1 %v3862_v38, %s3025_s23  ;;  %v1542_v30 = vpop.permute.xlu0 %1541 }
 0x3ec   : > { %2363 = vst.msk [vmem:[%s3548_s24 + $0x98] sm:$0xf] %vm1108_vm0, %v1542_v30 }
 0x3ed   : > { %v1349_v49 = vpop.permute.xlu1 %1348  ;;  %1752 = vrot.lane.b32.xlu0 %v3856_v18, %s3025_s23 }
 0x3ee   : > { %2316 = vst.msk [vmem:[%s3548_s24 + $0x5c] sm:$0xf] %vm1108_vm0, %v1349_v49 }
 0x3ef   : > { %1364 = vrot.lane.b32.xlu1 %v3869_v0, %s3023_s13  ;;  %v1623_v41 = vpop.permute.xlu0 %1622 }
 0x3f0   : > { %2387 = vst.msk [vmem:[%s3569_s12 + $0xb8] sm:$0xf] %vm1108_vm0, %v1623_v41 }
 0x3f1   : > { %v1430_v38 = vpop.permute.xlu1 %1429  ;;  %1817 = vrot.lane.b32.xlu0 %v3724_v45, %s3025_s23 }
 0x3f2   : > { %2340 = vst.msk [vmem:[%s3569_s12 + $0x7c] sm:$0xf] %vm1108_vm0, %v1430_v38 }
 0x3f3   : > { %1559 = vrot.lane.b32.xlu1 %v3869_v0, %s3024_s18  ;;  %v1737_v18 = vpop.permute.xlu0 %1736 }
 0x3f4   : > { %2411 = vst.msk [vmem:[%s3548_s24 + $0xd8] sm:$0xf] %vm1108_vm0, %v1737_v18 }
 0x3f5   : > { %v1544_v21 = vpop.permute.xlu1 %1543 }
 0x3f6   : > { %2364 = vst.msk [vmem:[%s3548_s24 + $0x9c] sm:$0xf] %vm1108_vm0, %v1544_v21 }
 0x3f7   : > { %1754 = vrot.lane.b32.xlu1 %v3869_v0, %s3025_s23  ;;  %v1424_v29 = vpop.permute.xlu0 %1423 }
 0x3f8   : > { %2337 = vst.msk [vmem:[%s3569_s12 + $0x70] sm:$0xf] %vm1108_vm0, %v1424_v29 }
 0x3f9   : > { %v1625_v45 = vpop.permute.xlu1 %1624 }
 0x3fa   : > { %2388 = vst.msk [vmem:[%s3569_s12 + $0xbc] sm:$0xf] %vm1108_vm0, %v1625_v45 }
 0x3fb   : > { %1819 = vrot.lane.b32.xlu1 %v3738_v54, %s3025_s23  ;;  %v1619_v15 = vpop.permute.xlu0 %1618 }
 0x3fc   : > { %2385 = vst.msk [vmem:[%s3569_s12 + $0xb0] sm:$0xf] %vm1108_vm0, %v1619_v15 }
 0x3fd   : > { %v1739_v34 = vpop.permute.xlu1 %1738 }
 0x3fe   : > { %2412 = vst.msk [vmem:[%s3548_s24 + $0xdc] sm:$0xf] %vm1108_vm0, %v1739_v34 }
 0x3ff   : > { %v1814_v0 = vpop.permute.xlu0 %1813 }
 0x400   : > { %2433 = vst.msk [vmem:[%s3569_s12 + $0xf0] sm:$0xf] %vm1108_vm0, %v1814_v0 }
 0x401   : > { %v1426_v35 = vpop.permute.xlu1 %1425 }
 0x402   : > { %2338 = vst.msk [vmem:[%s3569_s12 + $0x74] sm:$0xf] %vm1108_vm0, %v1426_v35 }
 0x403   : > { %v1286_v14 = vpop.permute.xlu0 %1285 }
 0x404   : > { %2301 = vst.msk [vmem:[%s3541_s11 + $0x60] sm:$0xf] %vm1108_vm0, %v1286_v14 }
 0x405   : > { %v1621_v54 = vpop.permute.xlu1 %1620 }
 0x406   : > { %2386 = vst.msk [vmem:[%s3569_s12 + $0xb4] sm:$0xf] %vm1108_vm0, %v1621_v54 }
 0x407   : > { %v1481_v56 = vpop.permute.xlu0 %1480 }
 0x408   : > { %2349 = vst.msk [vmem:[%s3541_s11 + $0xa0] sm:$0xf] %vm1108_vm0, %v1481_v56 }
 0x409   : > { %v1816_v37 = vpop.permute.xlu1 %1815 }
 0x40a   : > { %2434 = vst.msk [vmem:[%s3569_s12 + $0xf4] sm:$0xf] %vm1108_vm0, %v1816_v37 }
 0x40b   : > { %v1676_v42 = vpop.permute.xlu0 %1675 }
 0x40c   : > { %2397 = vst.msk [vmem:[%s3541_s11 + $0xe0] sm:$0xf] %vm1108_vm0, %v1676_v42 }
 0x40d   : > { %v1288_v44 = vpop.permute.xlu1 %1287 }
 0x40e   : > { %2302 = vst.msk [vmem:[%s3541_s11 + $0x64] sm:$0xf] %vm1108_vm0, %v1288_v44 }
 0x40f   : > { %v1351_v50 = vpop.permute.xlu0 %1350 }
 0x410   : > { %2317 = vst.msk [vmem:[%s3548_s24 + $0x60] sm:$0xf] %vm1108_vm0, %v1351_v50 }
 0x411   : > { %v1483_v36 = vpop.permute.xlu1 %1482 }
 0x412   : > { %2350 = vst.msk [vmem:[%s3541_s11 + $0xa4] sm:$0xf] %vm1108_vm0, %v1483_v36 }
 0x413   : > { %v1546_v43 = vpop.permute.xlu0 %1545 }
 0x414   : > { %2365 = vst.msk [vmem:[%s3548_s24 + $0xa0] sm:$0xf] %vm1108_vm0, %v1546_v43 }
 0x415   : > { %v1678_v4 = vpop.permute.xlu1 %1677 }
 0x416   : > { %2398 = vst.msk [vmem:[%s3541_s11 + $0xe4] sm:$0xf] %vm1108_vm0, %v1678_v4 }
 0x417   : > { %v1741_v11 = vpop.permute.xlu0 %1740 }
 0x418   : > { %2413 = vst.msk [vmem:[%s3548_s24 + $0xe0] sm:$0xf] %vm1108_vm0, %v1741_v11 }
 0x419   : > { %v1353_v53 = vpop.permute.xlu1 %1352 }
 0x41a   : > { %2318 = vst.msk [vmem:[%s3548_s24 + $0x64] sm:$0xf] %vm1108_vm0, %v1353_v53 }
 0x41b   : > { %v1290_v58 = vpop.permute.xlu0 %1289 }
 0x41c   : > { %2303 = vst.msk [vmem:[%s3541_s11 + $0x68] sm:$0xf] %vm1108_vm0, %v1290_v58 }
 0x41d   : > { %v1548_v59 = vpop.permute.xlu1 %1547 }
 0x41e   : > { %2366 = vst.msk [vmem:[%s3548_s24 + $0xa4] sm:$0xf] %vm1108_vm0, %v1548_v59 }
 0x41f   : > { %v1485_v60 = vpop.permute.xlu0 %1484 }
 0x420   : > { %2351 = vst.msk [vmem:[%s3541_s11 + $0xa8] sm:$0xf] %vm1108_vm0, %v1485_v60 }
 0x421   : > { %v1743_v62 = vpop.permute.xlu1 %1742 }
 0x422   : > { %2414 = vst.msk [vmem:[%s3548_s24 + $0xe4] sm:$0xf] %vm1108_vm0, %v1743_v62 }
 0x423   : > { %v1680_v13 = vpop.permute.xlu0 %1679 }
 0x424   : > { %2399 = vst.msk [vmem:[%s3541_s11 + $0xe8] sm:$0xf] %vm1108_vm0, %v1680_v13 }
 0x425   : > { %v1292_v28 = vpop.permute.xlu1 %1291 }
 0x426   : > { %2304 = vst.msk [vmem:[%s3541_s11 + $0x6c] sm:$0xf] %vm1108_vm0, %v1292_v28 }
 0x427   : > { %v1355_v33 = vpop.permute.xlu0 %1354 }
 0x428   : > { %2319 = vst.msk [vmem:[%s3548_s24 + $0x68] sm:$0xf] %vm1108_vm0, %v1355_v33 }
 0x429   : > { %v1487_v2 = vpop.permute.xlu1 %1486 }
 0x42a   : > { %2352 = vst.msk [vmem:[%s3541_s11 + $0xac] sm:$0xf] %vm1108_vm0, %v1487_v2 }
 0x42b   : > { %v1550_v63 = vpop.permute.xlu0 %1549 }
 0x42c   : > { %2367 = vst.msk [vmem:[%s3548_s24 + $0xa8] sm:$0xf] %vm1108_vm0, %v1550_v63 }
 0x42d   : > { %v1682_v1 = vpop.permute.xlu1 %1681 }
 0x42e   : > { %2400 = vst.msk [vmem:[%s3541_s11 + $0xec] sm:$0xf] %vm1108_vm0, %v1682_v1 }
 0x42f   : > { %v1745_v57 = vpop.permute.xlu0 %1744 }
 0x430   : > { %2415 = vst.msk [vmem:[%s3548_s24 + $0xe8] sm:$0xf] %vm1108_vm0, %v1745_v57 }
 0x431   : > { %v1357_v32 = vpop.permute.xlu1 %1356 }
 0x432   : > { %2320 = vst.msk [vmem:[%s3548_s24 + $0x6c] sm:$0xf] %vm1108_vm0, %v1357_v32 }
 0x433   : > { %v1294_v47 = vpop.permute.xlu0 %1293 }
 0x434   : > { %2305 = vst.msk [vmem:[%s3541_s11 + $0x70] sm:$0xf] %vm1108_vm0, %v1294_v47 }
 0x435   : > { %v1552_v25 = vpop.permute.xlu1 %1551 }
 0x436   : > { %2368 = vst.msk [vmem:[%s3548_s24 + $0xac] sm:$0xf] %vm1108_vm0, %v1552_v25 }
 0x437   : > { %v1489_v23 = vpop.permute.xlu0 %1488 }
 0x438   : > { %2353 = vst.msk [vmem:[%s3541_s11 + $0xb0] sm:$0xf] %vm1108_vm0, %v1489_v23 }
 0x439   : > { %v1747_v16 = vpop.permute.xlu1 %1746 }
 0x43a   : > { %2416 = vst.msk [vmem:[%s3548_s24 + $0xec] sm:$0xf] %vm1108_vm0, %v1747_v16 }
 0x43b   : > { %v1684_v52 = vpop.permute.xlu0 %1683 }
 0x43c   : > { %2401 = vst.msk [vmem:[%s3541_s11 + $0xf0] sm:$0xf] %vm1108_vm0, %v1684_v52 }
 0x43d   : > { %v1296_v55 = vpop.permute.xlu1 %1295 }
 0x43e   : > { %2306 = vst.msk [vmem:[%s3541_s11 + $0x74] sm:$0xf] %vm1108_vm0, %v1296_v55 }
 0x43f   : > { %v1359_v17 = vpop.permute.xlu0 %1358 }
 0x440   : > { %2321 = vst.msk [vmem:[%s3548_s24 + $0x70] sm:$0xf] %vm1108_vm0, %v1359_v17 }
 0x441   : > { %v1491_v61 = vpop.permute.xlu1 %1490 }
 0x442   : > { %2354 = vst.msk [vmem:[%s3541_s11 + $0xb4] sm:$0xf] %vm1108_vm0, %v1491_v61 }
 0x443   : > { %v1554_v19 = vpop.permute.xlu0 %1553 }
 0x444   : > { %2369 = vst.msk [vmem:[%s3548_s24 + $0xb0] sm:$0xf] %vm1108_vm0, %v1554_v19 }
 0x445   : > { %v1686_v48 = vpop.permute.xlu1 %1685 }
 0x446   : > { %2402 = vst.msk [vmem:[%s3541_s11 + $0xf4] sm:$0xf] %vm1108_vm0, %v1686_v48 }
 0x447   : > { %v1749_v22 = vpop.permute.xlu0 %1748 }
 0x448   : > { %2417 = vst.msk [vmem:[%s3548_s24 + $0xf0] sm:$0xf] %vm1108_vm0, %v1749_v22 }
 0x449   : > { %v1361_v24 = vpop.permute.xlu1 %1360 }
 0x44a   : > { %2322 = vst.msk [vmem:[%s3548_s24 + $0x74] sm:$0xf] %vm1108_vm0, %v1361_v24 }
 0x44b   : > { %v1298_v8 = vpop.permute.xlu0 %1297 }
 0x44c   : > { %2307 = vst.msk [vmem:[%s3541_s11 + $0x78] sm:$0xf] %vm1108_vm0, %v1298_v8 }
 0x44d   : > { %v1556_v40 = vpop.permute.xlu1 %1555 }
 0x44e   : > { %2370 = vst.msk [vmem:[%s3548_s24 + $0xb4] sm:$0xf] %vm1108_vm0, %v1556_v40 }
 0x44f   : > { %v1493_v27 = vpop.permute.xlu0 %1492 }
 0x450   : > { %2355 = vst.msk [vmem:[%s3541_s11 + $0xb8] sm:$0xf] %vm1108_vm0, %v1493_v27 }
 0x451   : > { %v1751_v39 = vpop.permute.xlu1 %1750 }
 0x452   : > { %2418 = vst.msk [vmem:[%s3548_s24 + $0xf4] sm:$0xf] %vm1108_vm0, %v1751_v39 }
 0x453   : > { %v1688_v5 = vpop.permute.xlu0 %1687 }
 0x454   : > { %2403 = vst.msk [vmem:[%s3541_s11 + $0xf8] sm:$0xf] %vm1108_vm0, %v1688_v5 }
 0x455   : > { %v1300_v10 = vpop.permute.xlu1 %1299 }
 0x456   : > { %2308 = vst.msk [vmem:[%s3541_s11 + $0x7c] sm:$0xf] %vm1108_vm0, %v1300_v10 }
 0x457   : > { %v1363_v20 = vpop.permute.xlu0 %1362 }
 0x458   : > { %2323 = vst.msk [vmem:[%s3548_s24 + $0x78] sm:$0xf] %vm1108_vm0, %v1363_v20 }
 0x459   : > { %v1495_v6 = vpop.permute.xlu1 %1494 }
 0x45a   : > { %2356 = vst.msk [vmem:[%s3541_s11 + $0xbc] sm:$0xf] %vm1108_vm0, %v1495_v6 }
 0x45b   : > { %v1558_v3 = vpop.permute.xlu0 %1557 }
 0x45c   : > { %2371 = vst.msk [vmem:[%s3548_s24 + $0xb8] sm:$0xf] %vm1108_vm0, %v1558_v3 }
 0x45d   : > { %v1690_v31 = vpop.permute.xlu1 %1689 }
 0x45e   : > { %2404 = vst.msk [vmem:[%s3541_s11 + $0xfc] sm:$0xf] %vm1108_vm0, %v1690_v31 }
 0x45f   : > { %v1753_v12 = vpop.permute.xlu0 %1752 }
 0x460   : > { %2419 = vst.msk [vmem:[%s3548_s24 + $0xf8] sm:$0xf] %vm1108_vm0, %v1753_v12 }
 0x461   : > { %v1365_v46 = vpop.permute.xlu1 %1364 }
 0x462   : > { %2324 = vst.msk [vmem:[%s3548_s24 + $0x7c] sm:$0xf] %vm1108_vm0, %v1365_v46 }
 0x463   : > { %v1818_v9 = vpop.permute.xlu0 %1817 }
 0x464   : > { %2435 = vst.msk [vmem:[%s3569_s12 + $0xf8] sm:$0xf] %vm1108_vm0, %v1818_v9 }
 0x465   : > { %v1560_v51 = vpop.permute.xlu1 %1559 }
 0x466   : > { %2372 = vst.msk [vmem:[%s3548_s24 + $0xbc] sm:$0xf] %vm1108_vm0, %v1560_v51 }
 0x469   : > { %v1755_v7 = vpop.permute.xlu1 %1754 }
 0x46a   : > { %2420 = vst.msk [vmem:[%s3548_s24 + $0xfc] sm:$0xf] %vm1108_vm0, %v1755_v7 }
 0x46d   : > { %v1820_v26 = vpop.permute.xlu1 %1819 }
 0x46e   : > { %2436 = vst.msk [vmem:[%s3569_s12 + $0xfc] sm:$0xf] %vm1108_vm0, %v1820_v26 }
 0x46f   : > { %s2440_s22 = sshll.u32 %s2995_s27, 4  ;;  %s2441_s20 = sshll.u32 %s2999_s28, 7 }
 0x470   : > { %s1877_s17 = sadd.s32 %s2441_s20, %s2440_s22  ;;  %s1896_s7 = sshll.u32 %s3541_s11, 4  ;;  %s1897_s7 = int_to_ptr.vmem [resolvable:$true] %s1896_s7 }
 0x471   : > { %s4404_s3 = sshll.u32 %s1877_s17, 6  ;;  %s3026_s16 = smov 1024  }
 0x472   : > { %s1879_s4 = scalar_lea.hbm %s4499_s5, %s4404_s3  ;;  %2565 = sst [smem:[#allocation16]] (%p3266_p4), %s3026_s16 }
 0x473   : > { %s3027_s6 = smov 2048   ;;  %s3028_s27 = smov 16  }
 0x474   : > { %2566 = sst [smem:[#allocation16 + $0x1]] (%p3266_p4), %s3027_s6  ;;  %s3029_s28 = smov 64  }
 0x475   : > { %2567 = sst [smem:[#allocation16 + $0x2]] (%p3266_p4), %s3028_s27  ;;  %s3030_s11 = smov 4  }
 0x476   : > { %2568 = sst [smem:[#allocation16 + $0x3]] (%p3266_p4), %s3029_s28  ;;  %s3031_s13 = smov [#allocation15]  }
 0x477   : > { %2569 = sst [smem:[#allocation16 + $0x4]] (%p3266_p4), %s3029_s28  ;;  %s3032_s18 = smov 0  }
 0x478   : > { %2570 = sst [smem:[#allocation16 + $0x5]] (%p3266_p4), %s3030_s11 }
 0x479   : > { %2571 = dma.general (%p3266_p4), %s1897_s7, 4096, %s1879_s4, %s1855_s19, %s3031_s13, [#allocation16], %s3032_s18, 0  }
 0x47a   : > { %s4537_s22 = sld [smem:[#allocation33_spill]]  ;;  %s1943_s17 = sshll.u32 %s3548_s24, 4  ;;  %s1944_s17 = int_to_ptr.vmem [resolvable:$true] %s1943_s17 }
 0x47b   : > { %s3033_s9 = smov 1024   ;;  %s3034_s19 = smov 2048  }
 0x47c   : > { %2572 = sst [smem:[#allocation18]] (%p3266_p4), %s3033_s9  ;;  %s3035_s7 = smov 16  }
 0x47d   : > { %2573 = sst [smem:[#allocation18 + $0x1]] (%p3266_p4), %s3034_s19  ;;  %s3036_s21 = smov 64  }
 0x47e   : > { %2574 = sst [smem:[#allocation18 + $0x2]] (%p3266_p4), %s3035_s7  ;;  %s3037_s4 = smov 4  }
 0x47f   : > { %2575 = sst [smem:[#allocation18 + $0x3]] (%p3266_p4), %s3036_s21  ;;  %s3038_s16 = smov [#allocation17]  }
 0x480   : > { %s1926_s20 = scalar_lea.hbm %s4537_s22, %s4404_s3  ;;  %2576 = sst [smem:[#allocation18 + $0x4]] (%p3266_p4), %s3036_s21 }
 0x481   : > { %2577 = sst [smem:[#allocation18 + $0x5]] (%p3266_p4), %s3037_s4  ;;  %s3039_s24 = smov 0  }
 0x482   : > { %2578 = dma.general (%p3266_p4), %s1944_s17, 4096, %s1926_s20, %s4399_s15, %s3038_s16, [#allocation18], %s3039_s24, 0  }
 0x483   : > { %s4538_s28 = sld [smem:[#allocation34_spill]]  ;;  %s1990_s13 = sshll.u32 %s3569_s12, 4  ;;  %s1991_s13 = int_to_ptr.vmem [resolvable:$true] %s1990_s13 }
 0x484   : > { %s3040_s18 = smov 1024   ;;  %s3041_s23 = smov 2048  }
 0x485   : > { %2579 = sst [smem:[#allocation20]] (%p3266_p4), %s3040_s18  ;;  %s3042_s10 = smov 16  }
 0x486   : > { %2580 = sst [smem:[#allocation20 + $0x1]] (%p3266_p4), %s3041_s23  ;;  %s3043_s22 = smov 64  }
 0x487   : > { %2581 = sst [smem:[#allocation20 + $0x2]] (%p3266_p4), %s3042_s10  ;;  %s3044_s20 = smov 4  }
 0x488   : > { %2582 = sst [smem:[#allocation20 + $0x3]] (%p3266_p4), %s3043_s22  ;;  %s3046_s12 = smov 0  }
 0x489   : > { %s1973_s11 = scalar_lea.hbm %s4538_s28, %s4404_s3  ;;  %2583 = sst [smem:[#allocation20 + $0x4]] (%p3266_p4), %s3043_s22 }
 0x48a   : > { %2584 = sst [smem:[#allocation20 + $0x5]] (%p3266_p4), %s3044_s20  ;;  %s3045_s3 = smov [#allocation19]  }
 0x48b   : > { %2585 = dma.general (%p3266_p4), %s1991_s13, 4096, %s1973_s11, %s4399_s15, %s3045_s3, [#allocation20], %s3046_s12, 0  }
 0x48c PF: > { %s4539_s17 = sld [smem:[#allocation26_spill]]  ;;  %s4540_s9 = sld [smem:[#allocation27_spill]] }
 0x48d   : > { %p2625_p6 = scmp.ge.s32.totalorder %s3011_s8, 2 }
 0x492   : > { %s2018_s19 = sand.u32 1, %s4539_s17   ;;  %p4541_p8 = scmp.ne.s32.totalorder %s4540_s9, 0 }
 0x493   : > { %s2019_s7 = scalar_lea.sflag [#allocation4], %s2018_s19 }
 0x494   : > { %p2607_p3 = pnand %p2625_p6, %p4541_p8 }
 0x496   : > { %2974 = dma.done.wait (!%p2607_p3), %s2019_s7, 4096  }
 0x497   : > { %2976 = vsyncadd (!%p2607_p3), %s2019_s7, 4294963200  ;;  %s4542_s21 = sadd.s32 4294967294, %s3011_s8  }
 0x498   : > { %s2027_s4 = sand.u32 1, %s4542_s21  }
 0x499   : > { %s2028_s16 = scalar_lea.sflag [#allocation13], %s2027_s4 }
 0x49a   : > { %2978 = dma.done.wait (!%p2607_p3), %s2028_s16, 8192  }
 0x49b   : > { %2980 = vsyncadd (!%p2607_p3), %s2028_s16, 4294959104  ;;  %s29_s8 = sadd.s32 1, %s3011_s8   ;;  %s4543_s14 = sld [smem:[#allocation28_spill]] }
 0x49c   : > { %p26_p4 = scmp.ge.s32.totalorder %s29_s8, 6   ;;  %s4544_s24 = smov %s2987_s25 }
 0x49d   : > { %s4545_s25 = smov %s2991_s26  ;;  %s4546_s26 = smov %s3279_s2 }
 0x49e   : > { %s4547_s27 = smov %s3003_s29  ;;  %s4548_s28 = smov %s3007_s30 }
 0x49f   : > { %s4550_s30 = smov %s4556_s1  ;;  %28 = sbr.rel (!%p26_p4) target bundleno = 18 (0x12), region = 157 }
 0x4a1   : > { %s4549_s29 = smov %s4543_s14 }
 0x4a6   :  { %2042 = vsyncpa [#allocation3], 1 }
 0x4a7   :  { %2044 = vsyncpa [#allocation3 + $0x1], 1 }
 0x4a8   :  { %2045 = vsyncpa [#allocation6], 1 }
 0x4a9   :  { %2046 = vsyncpa [#allocation9], 1 }
 0x4aa   :  { %2047 = vsyncpa [#allocation4], 1 }
 0x4ab   :  { %2049 = vsyncpa [#allocation4 + $0x1], 1 }
 0x4ac   :  { %2050 = vsyncpa [#allocation13], 1 }
 0x4ad   :  { %2052 = vsyncpa [#allocation13 + $0x1], 1 }

</bundles_post_ra>
